<compile_context>
chip_gen: v6e
topology: v6e:2x2x1
jax: 0.10.0
libtpu: 0.0.40
codegen_flags: <defaults>
</compile_context>

<pallas_src>
import functools

import jax
import jax.numpy as jnp
from jax import lax
from jax.experimental import pallas as pl
from jax.experimental.pallas import tpu as pltpu

MAX_TILE_B = 512  # rows per grid step for throughput batches (sweep 512/1024)


def _round_up(n, m):
    return ((n + m - 1) // m) * m


def _tile_and_pad(batch):
    """Pick (tile_b, padded_batch).

    - tiny batches: one step, padded only to the 8-row sublane quantum
    - otherwise: an even number of steps (keeps both v7x TensorCores busy and
      the grid balanced) with at most MAX_TILE_B rows each; padding waste is
      at most one 8-row quantum per step.
    """
    if batch <= 16:
        tile = _round_up(batch, 8)
        return tile, tile
    steps = 2 * pl.cdiv(batch, 2 * MAX_TILE_B)
    tile = _round_up(pl.cdiv(batch, steps), 8)
    return tile, steps * tile


def _default_flags():
    """bf16 epilogues on v6e/v7x (bf16-capable VALU); layer-4 on VPU elsewhere."""
    try:
        kind = jax.devices()[0].device_kind.lower()
    except Exception:  # pragma: no cover
        kind = ""
    modern = ("v6" in kind) or ("v7" in kind) or ("7x" in kind)
    return modern, (not modern)


def rk4_kernel(x_ref, w1_ref, b1_ref, w2_ref, b2_ref, w3_ref, b3_ref,
               w4_ref, b4_ref, o_ref, *, bf16_epilogue, layer4_on_vpu):
    x = x_ref[...]                        # (tile, 2) f32
    w1, b1 = w1_ref[...], b1_ref[...]     # (2, 512), (1, 512)
    w2, b2 = w2_ref[...], b2_ref[...]     # (512, 512) bf16, (1, 512)
    w3, b3 = w3_ref[...], b3_ref[...]     # (512, 512) bf16, (1, 512)
    w4, b4 = w4_ref[...], b4_ref[...]     # (512,2)/(2,512), (1, 2) f32

    if bf16_epilogue:
        # v6e / v7x: bf16 layer-1 FMAs + bf16 bias/ReLU epilogues.
        # MXU accumulates in f32 internally and pops bf16; layer 4 + RK4 in f32.
        def stack(z):
            zb = z.astype(jnp.bfloat16)
            h = zb[:, 0:1] * w1[0:1, :] + zb[:, 1:2] * w1[1:2, :] + b1
            h = jnp.maximum(h, 0.0)
            h = jnp.maximum(
                jnp.dot(h, w2, preferred_element_type=jnp.bfloat16) + b2, 0.0)
            h = jnp.maximum(
                jnp.dot(h, w3, preferred_element_type=jnp.bfloat16) + b3, 0.0)
            return jnp.dot(h, w4, preferred_element_type=jnp.float32) + b4
    else:
        # v5e path: f32 VPU layer 1 / epilogues; layer 4 off the MXU (the N=2
        # matmul wastes ~10% of MXU pushes on the MXU-bound v5e).
        def stack(z):
            h = jnp.maximum(
                z[:, 0:1] * w1[0:1, :] + z[:, 1:2] * w1[1:2, :] + b1, 0.0)
            h = jnp.maximum(
                jnp.dot(h.astype(jnp.bfloat16), w2,
                        preferred_element_type=jnp.float32) + b2, 0.0)
            h = jnp.maximum(
                jnp.dot(h.astype(jnp.bfloat16), w3,
                        preferred_element_type=jnp.float32) + b3, 0.0)
            if layer4_on_vpu:
                # w4 arrives transposed as (2, 512): VPU multiply + XLU reduce.
                o0 = jnp.sum(h * w4[0:1, :], axis=-1, keepdims=True)
                o1 = jnp.sum(h * w4[1:2, :], axis=-1, keepdims=True)
                col = lax.broadcasted_iota(jnp.int32, (1, 2), 1)
                return jnp.where(col == 0, o0, o1) + b4
            return jnp.dot(h.astype(jnp.bfloat16), w4,
                           preferred_element_type=jnp.float32) + b4

    k1 = stack(x)
    k2 = stack(x + k1 * 0.5)
    k3 = stack(x + k2 * 0.5)
    k4 = stack(x + k3)
    o_ref[...] = x + (k1 + 2.0 * (k2 + k3) + k4) * (1.0 / 6.0)


def rk4net_forward(x, params, *, bf16_epilogue=None, layer4_on_vpu=None):
    """x: (B, ...) with prod(trailing dims) == 2 (mirrors nn.Flatten)."""
    x = x.reshape(x.shape[0], -1).astype(jnp.float32)
    B, F = x.shape
    assert F == 2

    def_bf16, def_l4 = _default_flags()
    if bf16_epilogue is None:
        bf16_epilogue = def_bf16
    if layer4_on_vpu is None:
        layer4_on_vpu = def_l4
    if bf16_epilogue:
        layer4_on_vpu = False  # keep layer 4 on the MXU in the bf16 path

    tile_b, b_pad = _tile_and_pad(B)
    if b_pad != B:
        x = jnp.pad(x, ((0, b_pad - B), (0, 0)))

    f32, bf16 = jnp.float32, jnp.bfloat16
    wdt = bf16 if bf16_epilogue else f32   # layer-1 / epilogue dtype
    w1 = params["w1"].astype(wdt)
    b1 = params["b1"].astype(wdt)
    w2 = params["w2"].astype(bf16)
    b2 = params["b2"].astype(wdt)
    w3 = params["w3"].astype(bf16)
    b3 = params["b3"].astype(wdt)
    if layer4_on_vpu:
        w4 = params["w4"].T.astype(f32)    # (2, 512) for the VPU/XLU path
    else:
        w4 = params["w4"].astype(bf16)     # (512, 2) for the MXU path
    b4 = params["b4"].astype(f32)

    def const_spec(shape):
        # Full-array block, constant index map -> stays VMEM-resident.
        return pl.BlockSpec(shape, lambda i: (0, 0))

    kernel = functools.partial(rk4_kernel, bf16_epilogue=bf16_epilogue,
                               layer4_on_vpu=layer4_on_vpu)

    out = pl.pallas_call(
        kernel,
        out_shape=jax.ShapeDtypeStruct((b_pad, F), jnp.float32),
        grid=(b_pad // tile_b,),
        in_specs=[
            pl.BlockSpec((tile_b, 2), lambda i: (i, 0)),   # x
            const_spec(w1.shape), const_spec(b1.shape),
            const_spec(w2.shape), const_spec(b2.shape),
            const_spec(w3.shape), const_spec(b3.shape),
            const_spec(w4.shape), const_spec(b4.shape),
        ],
        out_specs=pl.BlockSpec((tile_b, 2), lambda i: (i, 0)),
        compiler_params=pltpu.CompilerParams(
            dimension_semantics=("parallel",)),
    )(x, w1, b1, w2, b2, w3, b3, w4, b4)
    return out[:B]


def init_params(key):
    """Mimics nn.Linear init U(-1/sqrt(fan_in), 1/sqrt(fan_in)).

    Weights stored as (in_features, out_features)."""
    def linear(key, fan_in, fan_out):
        kw, kb = jax.random.split(key)
        bound = 1.0 / jnp.sqrt(jnp.float32(fan_in))
        w = jax.random.uniform(kw, (fan_in, fan_out), jnp.float32, -bound, bound)
        b = jax.random.uniform(kb, (1, fan_out), jnp.float32, -bound, bound)
        return w, b

    k1, k2, k3, k4 = jax.random.split(key, 4)
    w1, b1 = linear(k1, 2, 512)
    w2, b2 = linear(k2, 512, 512)
    w3, b3 = linear(k3, 512, 512)
    w4, b4 = linear(k4, 512, 2)
    return {"w1": w1, "b1": b1, "w2": w2, "b2": b2,
            "w3": w3, "b3": b3, "w4": w4, "b4": b4}


def rk4net_reference_kernel_math(x, p, *, bf16_epilogue, layer4_on_vpu):
    """Pure-JAX reference reproducing the kernel's rounding points."""
    x = x.reshape(x.shape[0], -1).astype(jnp.float32)
    f32, bf16 = jnp.float32, jnp.bfloat16
    wdt = bf16 if bf16_epilogue else f32
    w1, b1 = p["w1"].astype(wdt), p["b1"].astype(wdt)
    w2, b2 = p["w2"].astype(bf16), p["b2"].astype(wdt)
    w3, b3 = p["w3"].astype(bf16), p["b3"].astype(wdt)
    b4 = p["b4"].astype(f32)

    if bf16_epilogue:
        w4 = p["w4"].astype(bf16)

        def stack(z):
            zb = z.astype(bf16)
            h = jnp.maximum(zb[:, 0:1] * w1[0:1, :] + zb[:, 1:2] * w1[1:2, :] + b1, 0.0)
            h = jnp.maximum(jnp.dot(h, w2, preferred_element_type=bf16) + b2, 0.0)
            h = jnp.maximum(jnp.dot(h, w3, preferred_element_type=bf16) + b3, 0.0)
            return jnp.dot(h, w4, preferred_element_type=f32) + b4
    else:
        w4 = p["w4"].T.astype(f32) if layer4_on_vpu else p["w4"].astype(bf16)

        def stack(z):
            h = jnp.maximum(z[:, 0:1] * w1[0:1, :] + z[:, 1:2] * w1[1:2, :] + b1, 0.0)
            h = jnp.maximum(jnp.dot(h.astype(bf16), w2,
                                    preferred_element_type=f32) + b2, 0.0)
            h = jnp.maximum(jnp.dot(h.astype(bf16), w3,
                                    preferred_element_type=f32) + b3, 0.0)
            if layer4_on_vpu:
                return jnp.einsum("bk,nk->bn", h, w4,
                                  preferred_element_type=f32) + b4
            return jnp.dot(h.astype(bf16), w4, preferred_element_type=f32) + b4

    k1 = stack(x)
    k2 = stack(x + k1 / 2.0)
    k3 = stack(x + k2 / 2.0)
    k4 = stack(x + k3)
    return x + (k1 + 2.0 * k2 + 2.0 * k3 + k4) / 6.0


def rk4net_reference_f32(x, p):
    """Full-f32 reference (semantic check, loose tolerance vs bf16 kernel)."""
    x = x.reshape(x.shape[0], -1).astype(jnp.float32)

    def stack(z):
        h = jnp.maximum(z @ p["w1"] + p["b1"], 0.0)
        h = jnp.maximum(h @ p["w2"] + p["b2"], 0.0)
        h = jnp.maximum(h @ p["w3"] + p["b3"], 0.0)
        return h @ p["w4"] + p["b4"]

    k1 = stack(x)
    k2 = stack(x + k1 / 2.0)
    k3 = stack(x + k2 / 2.0)
    k4 = stack(x + k3)
    return x + (k1 + 2.0 * k2 + 2.0 * k3 + k4) / 6.0


if __name__ == "__main__":
    key = jax.random.PRNGKey(0)
    kp, kx1, kx2 = jax.random.split(key, 3)
    params = init_params(kp)

    # Latency-sized batch: exercises the tiny-tile path (tile = 8, grid = 1).
    x_small = jax.random.normal(kx1, (8, 2), jnp.float32)   # flatten(x) -> (B, 2)
    out_small = rk4net_forward(x_small, params)
    jax.block_until_ready(out_small)
    assert out_small.shape == (8, 2)

    # Throughput batch that is NOT a multiple of the tile: exercises the
    # multi-step even grid (both v7x TensorCores) and the padding/slice logic.
    x_big = jax.random.normal(kx2, (1040, 2), jnp.float32)
    out_big = rk4net_forward(x_big, params)
    jax.block_until_ready(out_big)
    assert out_big.shape == (1040, 2)

    bf16_epilogue, layer4_on_vpu = _default_flags()
    for xin, out in ((x_small, out_small), (x_big, out_big)):
        ref = rk4net_reference_kernel_math(
            xin, params, bf16_epilogue=bf16_epilogue, layer4_on_vpu=layer4_on_vpu)
        assert jnp.allclose(out, ref, atol=2e-2, rtol=2e-2), \
            "mismatch vs kernel-math-emulating reference"
        ref32 = rk4net_reference_f32(xin, params)
        assert jnp.allclose(out, ref32, atol=1e-1, rtol=1e-1), \
            "mismatch vs f32 reference"

    print("KERNEL_OK")
</pallas_src>

<mosaic_0001>
module attributes {stable_mosaic.version = 11 : i64} {
  func.func @rk4_kernel(%arg0: i32, %arg1: memref<8x2xf32, #tpu.memory_space<vmem>>, %arg2: memref<2x512xf32, #tpu.memory_space<vmem>>, %arg3: memref<1x512xf32, #tpu.memory_space<vmem>>, %arg4: memref<512x512xbf16, #tpu.memory_space<vmem>>, %arg5: memref<1x512xf32, #tpu.memory_space<vmem>>, %arg6: memref<512x512xbf16, #tpu.memory_space<vmem>>, %arg7: memref<1x512xf32, #tpu.memory_space<vmem>>, %arg8: memref<2x512xf32, #tpu.memory_space<vmem>>, %arg9: memref<1x2xf32, #tpu.memory_space<vmem>>, %arg10: memref<8x2xf32, #tpu.memory_space<vmem>>) attributes {dimension_semantics = [#tpu.dimension_semantics<parallel>], iteration_bounds = array<i64: 1>, scalar_prefetch = 0 : i64, scratch_operands = 0 : i64, tpu.core_type = #tpu.core_type<tc>, window_params = [{transform_indices = @transform_0, window_bounds = array<i64: 8, 2>}, {pipeline_mode = #tpu.pipeline_mode<synchronous>, transform_indices = @transform_1, window_bounds = array<i64: 2, 512>}, {pipeline_mode = #tpu.pipeline_mode<synchronous>, transform_indices = @transform_2, window_bounds = array<i64: 1, 512>}, {pipeline_mode = #tpu.pipeline_mode<synchronous>, transform_indices = @transform_3, window_bounds = array<i64: 512, 512>}, {pipeline_mode = #tpu.pipeline_mode<synchronous>, transform_indices = @transform_4, window_bounds = array<i64: 1, 512>}, {pipeline_mode = #tpu.pipeline_mode<synchronous>, transform_indices = @transform_5, window_bounds = array<i64: 512, 512>}, {pipeline_mode = #tpu.pipeline_mode<synchronous>, transform_indices = @transform_6, window_bounds = array<i64: 1, 512>}, {pipeline_mode = #tpu.pipeline_mode<synchronous>, transform_indices = @transform_7, window_bounds = array<i64: 2, 512>}, {pipeline_mode = #tpu.pipeline_mode<synchronous>, transform_indices = @transform_8, window_bounds = array<i64: 1, 2>}, {transform_indices = @transform_9, window_bounds = array<i64: 8, 2>}]} {
    %c0 = arith.constant 0 : index
    %c0_0 = arith.constant 0 : index
    %0 = vector.load %arg1[%c0, %c0_0] : memref<8x2xf32, #tpu.memory_space<vmem>>, vector<8x2xf32>
    %c0_1 = arith.constant 0 : index
    %c0_2 = arith.constant 0 : index
    %1 = vector.load %arg2[%c0_1, %c0_2] : memref<2x512xf32, #tpu.memory_space<vmem>>, vector<2x512xf32>
    %c0_3 = arith.constant 0 : index
    %c0_4 = arith.constant 0 : index
    %2 = vector.load %arg3[%c0_3, %c0_4] : memref<1x512xf32, #tpu.memory_space<vmem>>, vector<1x512xf32>
    %c0_5 = arith.constant 0 : index
    %c0_6 = arith.constant 0 : index
    %3 = vector.load %arg4[%c0_5, %c0_6] : memref<512x512xbf16, #tpu.memory_space<vmem>>, vector<512x512xbf16>
    %c0_7 = arith.constant 0 : index
    %c0_8 = arith.constant 0 : index
    %4 = vector.load %arg5[%c0_7, %c0_8] : memref<1x512xf32, #tpu.memory_space<vmem>>, vector<1x512xf32>
    %c0_9 = arith.constant 0 : index
    %c0_10 = arith.constant 0 : index
    %5 = vector.load %arg6[%c0_9, %c0_10] : memref<512x512xbf16, #tpu.memory_space<vmem>>, vector<512x512xbf16>
    %c0_11 = arith.constant 0 : index
    %c0_12 = arith.constant 0 : index
    %6 = vector.load %arg7[%c0_11, %c0_12] : memref<1x512xf32, #tpu.memory_space<vmem>>, vector<1x512xf32>
    %c0_13 = arith.constant 0 : index
    %c0_14 = arith.constant 0 : index
    %7 = vector.load %arg8[%c0_13, %c0_14] : memref<2x512xf32, #tpu.memory_space<vmem>>, vector<2x512xf32>
    %c0_15 = arith.constant 0 : index
    %c0_16 = arith.constant 0 : index
    %8 = vector.load %arg9[%c0_15, %c0_16] : memref<1x2xf32, #tpu.memory_space<vmem>>, vector<1x2xf32>
    %9 = vector.extract_strided_slice %0 {offsets = [0, 0], sizes = [8, 1], strides = [1, 1]} : vector<8x2xf32> to vector<8x1xf32>
    %10 = vector.extract_strided_slice %1 {offsets = [0, 0], sizes = [1, 512], strides = [1, 1]} : vector<2x512xf32> to vector<1x512xf32>
    %11 = vector.broadcast %9 : vector<8x1xf32> to vector<8x512xf32>
    %12 = vector.broadcast %10 : vector<1x512xf32> to vector<8x512xf32>
    %13 = arith.mulf %11, %12 : vector<8x512xf32>
    %14 = vector.extract_strided_slice %0 {offsets = [0, 1], sizes = [8, 1], strides = [1, 1]} : vector<8x2xf32> to vector<8x1xf32>
    %15 = vector.extract_strided_slice %1 {offsets = [1, 0], sizes = [1, 512], strides = [1, 1]} : vector<2x512xf32> to vector<1x512xf32>
    %16 = vector.broadcast %14 : vector<8x1xf32> to vector<8x512xf32>
    %17 = vector.broadcast %15 : vector<1x512xf32> to vector<8x512xf32>
    %18 = arith.mulf %16, %17 : vector<8x512xf32>
    %19 = arith.addf %13, %18 : vector<8x512xf32>
    %20 = vector.broadcast %2 : vector<1x512xf32> to vector<8x512xf32>
    %21 = arith.addf %19, %20 : vector<8x512xf32>
    %cst = arith.constant 0.000000e+00 : f32
    %22 = vector.broadcast %cst : f32 to vector<8x512xf32>
    %23 = arith.maximumf %21, %22 : vector<8x512xf32>
    %24 = arith.truncf %23 : vector<8x512xf32> to vector<8x512xbf16>
    %cst_17 = arith.constant dense<0.000000e+00> : vector<8x512xf32>
    %25 = tpu.matmul %24, %3, %cst_17 {dimension_numbers = #tpu.dot_dimension_numbers<[1], [0], [0], [1], [0, 0, 1, 1], [], []>} : vector<8x512xbf16>, vector<512x512xbf16>, vector<8x512xf32> -> vector<8x512xf32>
    %26 = vector.broadcast %4 : vector<1x512xf32> to vector<8x512xf32>
    %27 = arith.addf %25, %26 : vector<8x512xf32>
    %cst_18 = arith.constant 0.000000e+00 : f32
    %28 = vector.broadcast %cst_18 : f32 to vector<8x512xf32>
    %29 = arith.maximumf %27, %28 : vector<8x512xf32>
    %30 = arith.truncf %29 : vector<8x512xf32> to vector<8x512xbf16>
    %cst_19 = arith.constant dense<0.000000e+00> : vector<8x512xf32>
    %31 = tpu.matmul %30, %5, %cst_19 {dimension_numbers = #tpu.dot_dimension_numbers<[1], [0], [0], [1], [0, 0, 1, 1], [], []>} : vector<8x512xbf16>, vector<512x512xbf16>, vector<8x512xf32> -> vector<8x512xf32>
    %32 = vector.broadcast %6 : vector<1x512xf32> to vector<8x512xf32>
    %33 = arith.addf %31, %32 : vector<8x512xf32>
    %cst_20 = arith.constant 0.000000e+00 : f32
    %34 = vector.broadcast %cst_20 : f32 to vector<8x512xf32>
    %35 = arith.maximumf %33, %34 : vector<8x512xf32>
    %36 = vector.extract_strided_slice %7 {offsets = [0, 0], sizes = [1, 512], strides = [1, 1]} : vector<2x512xf32> to vector<1x512xf32>
    %37 = vector.broadcast %36 : vector<1x512xf32> to vector<8x512xf32>
    %38 = arith.mulf %35, %37 : vector<8x512xf32>
    %cst_21 = arith.constant dense<0.000000e+00> : vector<8xf32>
    %39 = vector.multi_reduction <add>, %38, %cst_21 [1] : vector<8x512xf32> to vector<8xf32>
    %40 = vector.shape_cast %39 : vector<8xf32> to vector<8x1xf32>
    %41 = vector.extract_strided_slice %7 {offsets = [1, 0], sizes = [1, 512], strides = [1, 1]} : vector<2x512xf32> to vector<1x512xf32>
    %42 = vector.broadcast %41 : vector<1x512xf32> to vector<8x512xf32>
    %43 = arith.mulf %35, %42 : vector<8x512xf32>
    %cst_22 = arith.constant dense<0.000000e+00> : vector<8xf32>
    %44 = vector.multi_reduction <add>, %43, %cst_22 [1] : vector<8x512xf32> to vector<8xf32>
    %45 = vector.shape_cast %44 : vector<8xf32> to vector<8x1xf32>
    %46 = tpu.iota {dimensions = array<i32: 1>} : vector<1x2xi32>
    %c0_i32 = arith.constant 0 : i32
    %47 = vector.broadcast %c0_i32 : i32 to vector<1x2xi32>
    %48 = arith.cmpi eq, %46, %47 : vector<1x2xi32>
    %49 = vector.shape_cast %48 : vector<1x2xi1> to vector<1x2xi1>
    %50 = vector.broadcast %49 : vector<1x2xi1> to vector<8x2xi1>
    %51 = vector.shape_cast %40 : vector<8x1xf32> to vector<8x1xf32>
    %52 = vector.broadcast %51 : vector<8x1xf32> to vector<8x2xf32>
    %53 = vector.shape_cast %45 : vector<8x1xf32> to vector<8x1xf32>
    %54 = vector.broadcast %53 : vector<8x1xf32> to vector<8x2xf32>
    %55 = arith.select %50, %52, %54 : vector<8x2xi1>, vector<8x2xf32>
    %56 = vector.broadcast %8 : vector<1x2xf32> to vector<8x2xf32>
    %57 = arith.addf %55, %56 : vector<8x2xf32>
    %cst_23 = arith.constant 5.000000e-01 : f32
    %58 = vector.broadcast %cst_23 : f32 to vector<8x2xf32>
    %59 = arith.mulf %57, %58 : vector<8x2xf32>
    %60 = arith.addf %0, %59 : vector<8x2xf32>
    %61 = vector.extract_strided_slice %60 {offsets = [0, 0], sizes = [8, 1], strides = [1, 1]} : vector<8x2xf32> to vector<8x1xf32>
    %62 = vector.extract_strided_slice %1 {offsets = [0, 0], sizes = [1, 512], strides = [1, 1]} : vector<2x512xf32> to vector<1x512xf32>
    %63 = vector.broadcast %61 : vector<8x1xf32> to vector<8x512xf32>
    %64 = vector.broadcast %62 : vector<1x512xf32> to vector<8x512xf32>
    %65 = arith.mulf %63, %64 : vector<8x512xf32>
    %66 = vector.extract_strided_slice %60 {offsets = [0, 1], sizes = [8, 1], strides = [1, 1]} : vector<8x2xf32> to vector<8x1xf32>
    %67 = vector.extract_strided_slice %1 {offsets = [1, 0], sizes = [1, 512], strides = [1, 1]} : vector<2x512xf32> to vector<1x512xf32>
    %68 = vector.broadcast %66 : vector<8x1xf32> to vector<8x512xf32>
    %69 = vector.broadcast %67 : vector<1x512xf32> to vector<8x512xf32>
    %70 = arith.mulf %68, %69 : vector<8x512xf32>
    %71 = arith.addf %65, %70 : vector<8x512xf32>
    %72 = vector.broadcast %2 : vector<1x512xf32> to vector<8x512xf32>
    %73 = arith.addf %71, %72 : vector<8x512xf32>
    %cst_24 = arith.constant 0.000000e+00 : f32
    %74 = vector.broadcast %cst_24 : f32 to vector<8x512xf32>
    %75 = arith.maximumf %73, %74 : vector<8x512xf32>
    %76 = arith.truncf %75 : vector<8x512xf32> to vector<8x512xbf16>
    %cst_25 = arith.constant dense<0.000000e+00> : vector<8x512xf32>
    %77 = tpu.matmul %76, %3, %cst_25 {dimension_numbers = #tpu.dot_dimension_numbers<[1], [0], [0], [1], [0, 0, 1, 1], [], []>} : vector<8x512xbf16>, vector<512x512xbf16>, vector<8x512xf32> -> vector<8x512xf32>
    %78 = vector.broadcast %4 : vector<1x512xf32> to vector<8x512xf32>
    %79 = arith.addf %77, %78 : vector<8x512xf32>
    %cst_26 = arith.constant 0.000000e+00 : f32
    %80 = vector.broadcast %cst_26 : f32 to vector<8x512xf32>
    %81 = arith.maximumf %79, %80 : vector<8x512xf32>
    %82 = arith.truncf %81 : vector<8x512xf32> to vector<8x512xbf16>
    %cst_27 = arith.constant dense<0.000000e+00> : vector<8x512xf32>
    %83 = tpu.matmul %82, %5, %cst_27 {dimension_numbers = #tpu.dot_dimension_numbers<[1], [0], [0], [1], [0, 0, 1, 1], [], []>} : vector<8x512xbf16>, vector<512x512xbf16>, vector<8x512xf32> -> vector<8x512xf32>
    %84 = vector.broadcast %6 : vector<1x512xf32> to vector<8x512xf32>
    %85 = arith.addf %83, %84 : vector<8x512xf32>
    %cst_28 = arith.constant 0.000000e+00 : f32
    %86 = vector.broadcast %cst_28 : f32 to vector<8x512xf32>
    %87 = arith.maximumf %85, %86 : vector<8x512xf32>
    %88 = vector.extract_strided_slice %7 {offsets = [0, 0], sizes = [1, 512], strides = [1, 1]} : vector<2x512xf32> to vector<1x512xf32>
    %89 = vector.broadcast %88 : vector<1x512xf32> to vector<8x512xf32>
    %90 = arith.mulf %87, %89 : vector<8x512xf32>
    %cst_29 = arith.constant dense<0.000000e+00> : vector<8xf32>
    %91 = vector.multi_reduction <add>, %90, %cst_29 [1] : vector<8x512xf32> to vector<8xf32>
    %92 = vector.shape_cast %91 : vector<8xf32> to vector<8x1xf32>
    %93 = vector.extract_strided_slice %7 {offsets = [1, 0], sizes = [1, 512], strides = [1, 1]} : vector<2x512xf32> to vector<1x512xf32>
    %94 = vector.broadcast %93 : vector<1x512xf32> to vector<8x512xf32>
    %95 = arith.mulf %87, %94 : vector<8x512xf32>
    %cst_30 = arith.constant dense<0.000000e+00> : vector<8xf32>
    %96 = vector.multi_reduction <add>, %95, %cst_30 [1] : vector<8x512xf32> to vector<8xf32>
    %97 = vector.shape_cast %96 : vector<8xf32> to vector<8x1xf32>
    %98 = tpu.iota {dimensions = array<i32: 1>} : vector<1x2xi32>
    %c0_i32_31 = arith.constant 0 : i32
    %99 = vector.broadcast %c0_i32_31 : i32 to vector<1x2xi32>
    %100 = arith.cmpi eq, %98, %99 : vector<1x2xi32>
    %101 = vector.shape_cast %100 : vector<1x2xi1> to vector<1x2xi1>
    %102 = vector.broadcast %101 : vector<1x2xi1> to vector<8x2xi1>
    %103 = vector.shape_cast %92 : vector<8x1xf32> to vector<8x1xf32>
    %104 = vector.broadcast %103 : vector<8x1xf32> to vector<8x2xf32>
    %105 = vector.shape_cast %97 : vector<8x1xf32> to vector<8x1xf32>
    %106 = vector.broadcast %105 : vector<8x1xf32> to vector<8x2xf32>
    %107 = arith.select %102, %104, %106 : vector<8x2xi1>, vector<8x2xf32>
    %108 = vector.broadcast %8 : vector<1x2xf32> to vector<8x2xf32>
    %109 = arith.addf %107, %108 : vector<8x2xf32>
    %cst_32 = arith.constant 5.000000e-01 : f32
    %110 = vector.broadcast %cst_32 : f32 to vector<8x2xf32>
    %111 = arith.mulf %109, %110 : vector<8x2xf32>
    %112 = arith.addf %0, %111 : vector<8x2xf32>
    %113 = vector.extract_strided_slice %112 {offsets = [0, 0], sizes = [8, 1], strides = [1, 1]} : vector<8x2xf32> to vector<8x1xf32>
    %114 = vector.extract_strided_slice %1 {offsets = [0, 0], sizes = [1, 512], strides = [1, 1]} : vector<2x512xf32> to vector<1x512xf32>
    %115 = vector.broadcast %113 : vector<8x1xf32> to vector<8x512xf32>
    %116 = vector.broadcast %114 : vector<1x512xf32> to vector<8x512xf32>
    %117 = arith.mulf %115, %116 : vector<8x512xf32>
    %118 = vector.extract_strided_slice %112 {offsets = [0, 1], sizes = [8, 1], strides = [1, 1]} : vector<8x2xf32> to vector<8x1xf32>
    %119 = vector.extract_strided_slice %1 {offsets = [1, 0], sizes = [1, 512], strides = [1, 1]} : vector<2x512xf32> to vector<1x512xf32>
    %120 = vector.broadcast %118 : vector<8x1xf32> to vector<8x512xf32>
    %121 = vector.broadcast %119 : vector<1x512xf32> to vector<8x512xf32>
    %122 = arith.mulf %120, %121 : vector<8x512xf32>
    %123 = arith.addf %117, %122 : vector<8x512xf32>
    %124 = vector.broadcast %2 : vector<1x512xf32> to vector<8x512xf32>
    %125 = arith.addf %123, %124 : vector<8x512xf32>
    %cst_33 = arith.constant 0.000000e+00 : f32
    %126 = vector.broadcast %cst_33 : f32 to vector<8x512xf32>
    %127 = arith.maximumf %125, %126 : vector<8x512xf32>
    %128 = arith.truncf %127 : vector<8x512xf32> to vector<8x512xbf16>
    %cst_34 = arith.constant dense<0.000000e+00> : vector<8x512xf32>
    %129 = tpu.matmul %128, %3, %cst_34 {dimension_numbers = #tpu.dot_dimension_numbers<[1], [0], [0], [1], [0, 0, 1, 1], [], []>} : vector<8x512xbf16>, vector<512x512xbf16>, vector<8x512xf32> -> vector<8x512xf32>
    %130 = vector.broadcast %4 : vector<1x512xf32> to vector<8x512xf32>
    %131 = arith.addf %129, %130 : vector<8x512xf32>
    %cst_35 = arith.constant 0.000000e+00 : f32
    %132 = vector.broadcast %cst_35 : f32 to vector<8x512xf32>
    %133 = arith.maximumf %131, %132 : vector<8x512xf32>
    %134 = arith.truncf %133 : vector<8x512xf32> to vector<8x512xbf16>
    %cst_36 = arith.constant dense<0.000000e+00> : vector<8x512xf32>
    %135 = tpu.matmul %134, %5, %cst_36 {dimension_numbers = #tpu.dot_dimension_numbers<[1], [0], [0], [1], [0, 0, 1, 1], [], []>} : vector<8x512xbf16>, vector<512x512xbf16>, vector<8x512xf32> -> vector<8x512xf32>
    %136 = vector.broadcast %6 : vector<1x512xf32> to vector<8x512xf32>
    %137 = arith.addf %135, %136 : vector<8x512xf32>
    %cst_37 = arith.constant 0.000000e+00 : f32
    %138 = vector.broadcast %cst_37 : f32 to vector<8x512xf32>
    %139 = arith.maximumf %137, %138 : vector<8x512xf32>
    %140 = vector.extract_strided_slice %7 {offsets = [0, 0], sizes = [1, 512], strides = [1, 1]} : vector<2x512xf32> to vector<1x512xf32>
    %141 = vector.broadcast %140 : vector<1x512xf32> to vector<8x512xf32>
    %142 = arith.mulf %139, %141 : vector<8x512xf32>
    %cst_38 = arith.constant dense<0.000000e+00> : vector<8xf32>
    %143 = vector.multi_reduction <add>, %142, %cst_38 [1] : vector<8x512xf32> to vector<8xf32>
    %144 = vector.shape_cast %143 : vector<8xf32> to vector<8x1xf32>
    %145 = vector.extract_strided_slice %7 {offsets = [1, 0], sizes = [1, 512], strides = [1, 1]} : vector<2x512xf32> to vector<1x512xf32>
    %146 = vector.broadcast %145 : vector<1x512xf32> to vector<8x512xf32>
    %147 = arith.mulf %139, %146 : vector<8x512xf32>
    %cst_39 = arith.constant dense<0.000000e+00> : vector<8xf32>
    %148 = vector.multi_reduction <add>, %147, %cst_39 [1] : vector<8x512xf32> to vector<8xf32>
    %149 = vector.shape_cast %148 : vector<8xf32> to vector<8x1xf32>
    %150 = tpu.iota {dimensions = array<i32: 1>} : vector<1x2xi32>
    %c0_i32_40 = arith.constant 0 : i32
    %151 = vector.broadcast %c0_i32_40 : i32 to vector<1x2xi32>
    %152 = arith.cmpi eq, %150, %151 : vector<1x2xi32>
    %153 = vector.shape_cast %152 : vector<1x2xi1> to vector<1x2xi1>
    %154 = vector.broadcast %153 : vector<1x2xi1> to vector<8x2xi1>
    %155 = vector.shape_cast %144 : vector<8x1xf32> to vector<8x1xf32>
    %156 = vector.broadcast %155 : vector<8x1xf32> to vector<8x2xf32>
    %157 = vector.shape_cast %149 : vector<8x1xf32> to vector<8x1xf32>
    %158 = vector.broadcast %157 : vector<8x1xf32> to vector<8x2xf32>
    %159 = arith.select %154, %156, %158 : vector<8x2xi1>, vector<8x2xf32>
    %160 = vector.broadcast %8 : vector<1x2xf32> to vector<8x2xf32>
    %161 = arith.addf %159, %160 : vector<8x2xf32>
    %162 = arith.addf %0, %161 : vector<8x2xf32>
    %163 = vector.extract_strided_slice %162 {offsets = [0, 0], sizes = [8, 1], strides = [1, 1]} : vector<8x2xf32> to vector<8x1xf32>
    %164 = vector.extract_strided_slice %1 {offsets = [0, 0], sizes = [1, 512], strides = [1, 1]} : vector<2x512xf32> to vector<1x512xf32>
    %165 = vector.broadcast %163 : vector<8x1xf32> to vector<8x512xf32>
    %166 = vector.broadcast %164 : vector<1x512xf32> to vector<8x512xf32>
    %167 = arith.mulf %165, %166 : vector<8x512xf32>
    %168 = vector.extract_strided_slice %162 {offsets = [0, 1], sizes = [8, 1], strides = [1, 1]} : vector<8x2xf32> to vector<8x1xf32>
    %169 = vector.extract_strided_slice %1 {offsets = [1, 0], sizes = [1, 512], strides = [1, 1]} : vector<2x512xf32> to vector<1x512xf32>
    %170 = vector.broadcast %168 : vector<8x1xf32> to vector<8x512xf32>
    %171 = vector.broadcast %169 : vector<1x512xf32> to vector<8x512xf32>
    %172 = arith.mulf %170, %171 : vector<8x512xf32>
    %173 = arith.addf %167, %172 : vector<8x512xf32>
    %174 = vector.broadcast %2 : vector<1x512xf32> to vector<8x512xf32>
    %175 = arith.addf %173, %174 : vector<8x512xf32>
    %cst_41 = arith.constant 0.000000e+00 : f32
    %176 = vector.broadcast %cst_41 : f32 to vector<8x512xf32>
    %177 = arith.maximumf %175, %176 : vector<8x512xf32>
    %178 = arith.truncf %177 : vector<8x512xf32> to vector<8x512xbf16>
    %cst_42 = arith.constant dense<0.000000e+00> : vector<8x512xf32>
    %179 = tpu.matmul %178, %3, %cst_42 {dimension_numbers = #tpu.dot_dimension_numbers<[1], [0], [0], [1], [0, 0, 1, 1], [], []>} : vector<8x512xbf16>, vector<512x512xbf16>, vector<8x512xf32> -> vector<8x512xf32>
    %180 = vector.broadcast %4 : vector<1x512xf32> to vector<8x512xf32>
    %181 = arith.addf %179, %180 : vector<8x512xf32>
    %cst_43 = arith.constant 0.000000e+00 : f32
    %182 = vector.broadcast %cst_43 : f32 to vector<8x512xf32>
    %183 = arith.maximumf %181, %182 : vector<8x512xf32>
    %184 = arith.truncf %183 : vector<8x512xf32> to vector<8x512xbf16>
    %cst_44 = arith.constant dense<0.000000e+00> : vector<8x512xf32>
    %185 = tpu.matmul %184, %5, %cst_44 {dimension_numbers = #tpu.dot_dimension_numbers<[1], [0], [0], [1], [0, 0, 1, 1], [], []>} : vector<8x512xbf16>, vector<512x512xbf16>, vector<8x512xf32> -> vector<8x512xf32>
    %186 = vector.broadcast %6 : vector<1x512xf32> to vector<8x512xf32>
    %187 = arith.addf %185, %186 : vector<8x512xf32>
    %cst_45 = arith.constant 0.000000e+00 : f32
    %188 = vector.broadcast %cst_45 : f32 to vector<8x512xf32>
    %189 = arith.maximumf %187, %188 : vector<8x512xf32>
    %190 = vector.extract_strided_slice %7 {offsets = [0, 0], sizes = [1, 512], strides = [1, 1]} : vector<2x512xf32> to vector<1x512xf32>
    %191 = vector.broadcast %190 : vector<1x512xf32> to vector<8x512xf32>
    %192 = arith.mulf %189, %191 : vector<8x512xf32>
    %cst_46 = arith.constant dense<0.000000e+00> : vector<8xf32>
    %193 = vector.multi_reduction <add>, %192, %cst_46 [1] : vector<8x512xf32> to vector<8xf32>
    %194 = vector.shape_cast %193 : vector<8xf32> to vector<8x1xf32>
    %195 = vector.extract_strided_slice %7 {offsets = [1, 0], sizes = [1, 512], strides = [1, 1]} : vector<2x512xf32> to vector<1x512xf32>
    %196 = vector.broadcast %195 : vector<1x512xf32> to vector<8x512xf32>
    %197 = arith.mulf %189, %196 : vector<8x512xf32>
    %cst_47 = arith.constant dense<0.000000e+00> : vector<8xf32>
    %198 = vector.multi_reduction <add>, %197, %cst_47 [1] : vector<8x512xf32> to vector<8xf32>
    %199 = vector.shape_cast %198 : vector<8xf32> to vector<8x1xf32>
    %200 = tpu.iota {dimensions = array<i32: 1>} : vector<1x2xi32>
    %c0_i32_48 = arith.constant 0 : i32
    %201 = vector.broadcast %c0_i32_48 : i32 to vector<1x2xi32>
    %202 = arith.cmpi eq, %200, %201 : vector<1x2xi32>
    %203 = vector.shape_cast %202 : vector<1x2xi1> to vector<1x2xi1>
    %204 = vector.broadcast %203 : vector<1x2xi1> to vector<8x2xi1>
    %205 = vector.shape_cast %194 : vector<8x1xf32> to vector<8x1xf32>
    %206 = vector.broadcast %205 : vector<8x1xf32> to vector<8x2xf32>
    %207 = vector.shape_cast %199 : vector<8x1xf32> to vector<8x1xf32>
    %208 = vector.broadcast %207 : vector<8x1xf32> to vector<8x2xf32>
    %209 = arith.select %204, %206, %208 : vector<8x2xi1>, vector<8x2xf32>
    %210 = vector.broadcast %8 : vector<1x2xf32> to vector<8x2xf32>
    %211 = arith.addf %209, %210 : vector<8x2xf32>
    %212 = arith.addf %109, %161 : vector<8x2xf32>
    %cst_49 = arith.constant 2.000000e+00 : f32
    %213 = vector.broadcast %cst_49 : f32 to vector<8x2xf32>
    %214 = arith.mulf %213, %212 : vector<8x2xf32>
    %215 = arith.addf %57, %214 : vector<8x2xf32>
    %216 = arith.addf %215, %211 : vector<8x2xf32>
    %cst_50 = arith.constant 0.166666672 : f32
    %217 = vector.broadcast %cst_50 : f32 to vector<8x2xf32>
    %218 = arith.mulf %216, %217 : vector<8x2xf32>
    %219 = arith.addf %0, %218 : vector<8x2xf32>
    %c0_51 = arith.constant 0 : index
    %c0_52 = arith.constant 0 : index
    %220 = vector.load %arg10[%c0_51, %c0_52] : memref<8x2xf32, #tpu.memory_space<vmem>>, vector<8x2xf32>
    tpu.vector_store %arg10[%c0_51, %c0_52], %219 {strides = array<i32>} : memref<8x2xf32, #tpu.memory_space<vmem>>, vector<8x2xf32>,
    return
  }
  func.func @transform_0(%arg0: i32) -> (i32, i32) {
    %c0_i32 = arith.constant 0 : i32
    %c0_i32_0 = arith.constant 0 : i32
    return %arg0, %c0_i32 : i32, i32
  }
  func.func @transform_1(%arg0: i32) -> (i32, i32) {
    %c0_i32 = arith.constant 0 : i32
    %c0_i32_0 = arith.constant 0 : i32
    %c0_i32_1 = arith.constant 0 : i32
    return %c0_i32, %c0_i32_0 : i32, i32
  }
  func.func @transform_2(%arg0: i32) -> (i32, i32) {
    %c0_i32 = arith.constant 0 : i32
    %c0_i32_0 = arith.constant 0 : i32
    %c0_i32_1 = arith.constant 0 : i32
    return %c0_i32, %c0_i32_0 : i32, i32
  }
  func.func @transform_3(%arg0: i32) -> (i32, i32) {
    %c0_i32 = arith.constant 0 : i32
    %c0_i32_0 = arith.constant 0 : i32
    %c0_i32_1 = arith.constant 0 : i32
    return %c0_i32, %c0_i32_0 : i32, i32
  }
  func.func @transform_4(%arg0: i32) -> (i32, i32) {
    %c0_i32 = arith.constant 0 : i32
    %c0_i32_0 = arith.constant 0 : i32
    %c0_i32_1 = arith.constant 0 : i32
    return %c0_i32, %c0_i32_0 : i32, i32
  }
  func.func @transform_5(%arg0: i32) -> (i32, i32) {
    %c0_i32 = arith.constant 0 : i32
    %c0_i32_0 = arith.constant 0 : i32
    %c0_i32_1 = arith.constant 0 : i32
    return %c0_i32, %c0_i32_0 : i32, i32
  }
  func.func @transform_6(%arg0: i32) -> (i32, i32) {
    %c0_i32 = arith.constant 0 : i32
    %c0_i32_0 = arith.constant 0 : i32
    %c0_i32_1 = arith.constant 0 : i32
    return %c0_i32, %c0_i32_0 : i32, i32
  }
  func.func @transform_7(%arg0: i32) -> (i32, i32) {
    %c0_i32 = arith.constant 0 : i32
    %c0_i32_0 = arith.constant 0 : i32
    %c0_i32_1 = arith.constant 0 : i32
    return %c0_i32, %c0_i32_0 : i32, i32
  }
  func.func @transform_8(%arg0: i32) -> (i32, i32) {
    %c0_i32 = arith.constant 0 : i32
    %c0_i32_0 = arith.constant 0 : i32
    %c0_i32_1 = arith.constant 0 : i32
    return %c0_i32, %c0_i32_0 : i32, i32
  }
  func.func @transform_9(%arg0: i32) -> (i32, i32) {
    %c0_i32 = arith.constant 0 : i32
    %c0_i32_0 = arith.constant 0 : i32
    return %arg0, %c0_i32 : i32, i32
  }
}

</mosaic_0001>

<bundles_post_ra>
// kernel: tpu_custom_call.1
= control target key start
LH: loop header
LB: loop body
LE: loop exit
PB: predicated region body
PF: predicated region fallthrough
CT: control target
= control target key end

     0   :  { %14 = vsyncpa [#allocation3], 0  ;;  %s6451_s0 = inlined_call_operand.vmem [shape: f32[8,2], index: 0, kind: input, shape index: {}]   ;;  %s6452_s1 = inlined_call_operand.vmem [shape: f32[2,512], index: 1, kind: input, shape index: {}]   ;;  %s6453_s2 = inlined_call_operand.hbm [shape: f32[1,512], index: 2, kind: input, shape index: {}]   ;;  %s6454_s3 = inlined_call_operand.hbm [shape: bf16[512,512], index: 3, kind: input, shape index: {}]   ;;  %s6455_s4 = inlined_call_operand.hbm [shape: f32[1,512], index: 4, kind: input, shape index: {}]   ;;  %s6456_s5 = inlined_call_operand.hbm [shape: bf16[512,512], index: 5, kind: input, shape index: {}]   ;;  %s6457_s6 = inlined_call_operand.vmem [shape: f32[1,512], index: 6, kind: input, shape index: {}]   ;;  %s6458_s7 = inlined_call_operand.vmem [shape: f32[2,512], index: 7, kind: input, shape index: {}]   ;;  %s6459_s8 = inlined_call_operand.vmem [shape: f32[1,2], index: 8, kind: input, shape index: {}]   ;;  %s6460_s9 = inlined_call_operand.vmem [shape: f32[8,2], index: 9, kind: output, shape index: {}]  }
   0x1   :  { %15 = vsyncpa [#allocation5], 0 }
   0x2   :  { %16 = vsyncpa [#allocation8], 0  ;;  %s4600_s30 = smov [#allocation4]  }
   0x3   :  { %s36_s10 = sshll.u32 %s4600_s30, 4  ;;  %s37_s10 = int_to_ptr.vmem [resolvable:$true] %s36_s10 }
   0x4   :  { %s4522_s11 = scalar_lea.vmem %s37_s10, 16384  ;;  %p4527_p1 = scmp.lt.s32.totalorder %s37_s10, %s37_s10 }
   0x5   :  { %p4523_p0 = scmp.ne.s32.totalorder %s37_s10, %s4522_s11  ;;  %p4528_p2 = scmp.lt.s32.totalorder %s4522_s11, %s4522_s11 }
   0x7   :  { %p4529_p3 = por %p4528_p2, %p4527_p1 }
   0x9   :  { %p4530_p4 = pnand %p4529_p3, %p4523_p0 }
   0xb   :  { %4533 = shalt.err (!%p4530_p4)
}
   0xc   :  { %s4601_s12 = smov 256   ;;  %s4602_s13 = smov 16  }
   0xd   :  { %42 = dma.hbm_to_vmem [thread:$0]  %s6454_s3, 16384, %s37_s10, [#allocation5], %s4601_s12, %s4601_s12, %s4602_s13  }
   0xe   :  { %s4603_s16 = smov [#allocation2]   ;;  %s4604_s18 = smov [#allocation6]  }
   0xf   :  { %s27_s17 = sshll.u32 %s4603_s16, 4  ;;  %s49_s19 = sshll.u32 %s4604_s18, 4  ;;  %s28_s17 = int_to_ptr.vmem [resolvable:$true] %s27_s17  ;;  %s50_s19 = int_to_ptr.vmem [resolvable:$true] %s49_s19 }
  0x10   :  { %s4542_s20 = scalar_lea.vmem %s28_s17, 64  ;;  %p4547_p6 = scmp.lt.s32.totalorder %s28_s17, %s28_s17 }
  0x11   :  { %p4543_p5 = scmp.ne.s32.totalorder %s28_s17, %s4542_s20  ;;  %p4548_p7 = scmp.lt.s32.totalorder %s4542_s20, %s4542_s20 }
  0x13   :  { %p4549_p8 = por %p4548_p7, %p4547_p6 }
  0x15   :  { %p4550_p9 = pnand %p4549_p8, %p4543_p5 }
  0x17   :  { %4553 = shalt.err (!%p4550_p9)
}
  0x18   :  { %30 = dma.hbm_to_vmem [thread:$0]  %s6453_s2, 64, %s28_s17, [#allocation3]  }
  0x19   :  { %s4562_s23 = scalar_lea.vmem %s50_s19, 64  ;;  %p4567_p11 = scmp.lt.s32.totalorder %s50_s19, %s50_s19 }
  0x1a   :  { %p4563_p10 = scmp.ne.s32.totalorder %s50_s19, %s4562_s23  ;;  %p4568_p12 = scmp.lt.s32.totalorder %s4562_s23, %s4562_s23 }
  0x1c   :  { %p4569_p13 = por %p4568_p12, %p4567_p11 }
  0x1e   :  { %p4570_p0 = pnand %p4569_p13, %p4563_p10 }
  0x20   :  { %4573 = shalt.err (!%p4570_p0)
}
  0x21   :  { %52 = dma.hbm_to_vmem [thread:$0]  %s6455_s4, 64, %s50_s19, [#allocation5]  }
  0x22   :  { %s4605_s25 = smov [#allocation7]  }
  0x23   :  { %s58_s26 = sshll.u32 %s4605_s25, 4  ;;  %s59_s26 = int_to_ptr.vmem [resolvable:$true] %s58_s26 }
  0x24   :  { %s4582_s27 = scalar_lea.vmem %s59_s26, 16384  ;;  %p4587_p2 = scmp.lt.s32.totalorder %s59_s26, %s59_s26 }
  0x25   :  { %p4583_p1 = scmp.ne.s32.totalorder %s59_s26, %s4582_s27  ;;  %p4588_p3 = scmp.lt.s32.totalorder %s4582_s27, %s4582_s27 }
  0x27   :  { %p4589_p4 = por %p4588_p3, %p4587_p2 }
  0x29   :  { %p4590_p5 = pnand %p4589_p4, %p4583_p1 }
  0x2b   :  { %4593 = shalt.err (!%p4590_p5)
}
  0x2c   :  { %64 = dma.hbm_to_vmem [thread:$0]  %s6456_s5, 16384, %s59_s26, [#allocation8], %s4601_s12, %s4601_s12, %s4602_s13  }
  0x2d   :  { %4594 = dma.done.wait [#allocation3], 64  }
  0x2e   :  { %4595 = vsyncadd [#allocation3], 4294967232 }
  0x2f   :  { %4596 = dma.done.wait [#allocation5], 16448  }
  0x30   :  { %4597 = vsyncadd [#allocation5], 4294950848 }
  0x31   :  { %4598 = dma.done.wait [#allocation8], 16384  }
  0x32   :  { %4599 = vsyncadd [#allocation8], 4294950912  ;;  %v6463_v0 = vmov 0   ;;  %v83_v1 = vld [vmem:[%s6451_s0] sm:$0xff]  ;;  %v3710_v2 = vld [vmem:[#allocation4 + $0xe4] ss:$16 sps:$4 sm:$0xff]  }
  0x33   :  { %3703 = vset.pattern.permute.xlu0 %v6463_v0  ;;  %3705 = vset.pattern.permute.xlu1 %v6463_v0  ;;  %v3712_v3 = vld [vmem:[#allocation4 + $0x2e4] ss:$16 sps:$4 sm:$0xff]   ;;  %v3714_v4 = vld [vmem:[#allocation4 + $0xe0] ss:$16 sps:$4 sm:$0xff]   ;;  %v6461_v8 = vmov 1   ;;  %vm3429_vm1 = vcmask 15360  }
  0x34   :  { %348 = vperm.xlu0 %3703, %v83_v1   ;;  %v3715_v5 = vld [vmem:[#allocation4 + $0x2e0] ss:$16 sps:$4 sm:$0xff]   ;;  %1134 = vmatprep.subr.bf16.mxu0 %v3710_v2  ;;  %v3716_v6 = vld [vmem:[#allocation4 + $0xc4] ss:$16 sps:$4 sm:$0xff]  }
  0x35   :  { %1175 = vmatprep.subr.bf16.mxu1 %v3712_v3  ;;  %1135 = vmatpush1.bf16.msra.mxu0 %v3714_v4  ;;  %v3718_v7 = vld [vmem:[#allocation4 + $0x2c4] ss:$16 sps:$4 sm:$0xff]   ;;  %v3720_v9 = vld [vmem:[#allocation4 + $0xc0] ss:$16 sps:$4 sm:$0xff]   ;;  %v3806_v4 = vld [vmem:[#allocation4 + $0xec] ss:$16 sps:$4 sm:$0xff]  }
  0x36   :  { %1176 = vmatpush1.bf16.msra.mxu1 %v3715_v5  ;;  %v3721_v10 = vld [vmem:[#allocation4 + $0x2c0] ss:$16 sps:$4 sm:$0xff]   ;;  %1136 = vmatprep.subr.bf16.mxu0 %v3716_v6  ;;  %v3722_v11 = vld [vmem:[#allocation4 + $0xa4] ss:$16 sps:$4 sm:$0xff]   ;;  %v3808_v5 = vld [vmem:[#allocation4 + $0x2ec] ss:$16 sps:$4 sm:$0xff]   ;;  %v6465_v6 = vlaneseq }
  0x37   :  { %1177 = vmatprep.subr.bf16.mxu1 %v3718_v7  ;;  %v3724_v12 = vld [vmem:[#allocation4 + $0x2a4] ss:$16 sps:$4 sm:$0xff]   ;;  %v3726_v13 = vld [vmem:[#allocation4 + $0xa0] ss:$16 sps:$4 sm:$0xff]  }
  0x38   :  { %3704 = vset.pattern.permute.xlu0 %v6461_v8  ;;  %v3727_v14 = vld [vmem:[#allocation4 + $0x2a0] ss:$16 sps:$4 sm:$0xff]   ;;  %v3728_v15 = vld [vmem:[#allocation4 + $0x84] ss:$16 sps:$4 sm:$0xff]   ;;  %v4683_v7 = vshrl.u32 %v6465_v6, 7 }
  0x39   :  { %393 = vperm.xlu0 %3704, %v83_v1   ;;  %1137 = vmatpush1.bf16.msra.mxu0 %v3720_v9  ;;  %v3730_v16 = vld [vmem:[#allocation4 + $0x284] ss:$16 sps:$4 sm:$0xff]   ;;  %v3732_v17 = vld [vmem:[#allocation4 + $0x80] ss:$16 sps:$4 sm:$0xff]  }
  0x3a   :  { %1178 = vmatpush1.bf16.msra.mxu1 %v3721_v10  ;;  %1138 = vmatprep.subr.bf16.mxu0 %v3722_v11  ;;  %v3733_v18 = vld [vmem:[#allocation4 + $0x280] ss:$16 sps:$4 sm:$0xff]   ;;  %v3734_v19 = vld [vmem:[#allocation4 + $0x64] ss:$16 sps:$4 sm:$0xff]   ;;  %v4686_v9 = vsub.s32 0, %v4683_v7  ;;  %v4689_v10 = vsub.s32 2, %v4683_v7 }
  0x3b   :  { %1179 = vmatprep.subr.bf16.mxu1 %v3724_v12  ;;  %v3736_v20 = vld [vmem:[#allocation4 + $0x264] ss:$16 sps:$4 sm:$0xff]   ;;  %v3738_v21 = vld [vmem:[#allocation4 + $0x60] ss:$16 sps:$4 sm:$0xff]   ;;  %v6469_v11 = vsub.s32 4, %v4683_v7  ;;  %v6467_v12 = vsub.s32 6, %v4683_v7 }
  0x3c   :  { %v3739_v22 = vld [vmem:[#allocation4 + $0x260] ss:$16 sps:$4 sm:$0xff]   ;;  %v3740_v23 = vld [vmem:[#allocation4 + $0x44] ss:$16 sps:$4 sm:$0xff]  }
  0x3d   :  { %1139 = vmatpush1.bf16.msra.mxu0 %v3726_v13  ;;  %v3742_v24 = vld [vmem:[#allocation4 + $0x244] ss:$16 sps:$4 sm:$0xff]   ;;  %v3744_v25 = vld [vmem:[#allocation4 + $0x40] ss:$16 sps:$4 sm:$0xff]   ;;  %v4694_v13 = vsub.s32 1, %v4683_v7 }
  0x3e   :  { %1180 = vmatpush1.bf16.msra.mxu1 %v3727_v14  ;;  %1140 = vmatprep.subr.bf16.mxu0 %v3728_v15  ;;  %v3745_v26 = vld [vmem:[#allocation4 + $0x240] ss:$16 sps:$4 sm:$0xff]   ;;  %v3746_v27 = vld [vmem:[#allocation4 + $0x24] ss:$16 sps:$4 sm:$0xff]   ;;  %v4700_v15 = vsub.s32 3, %v4683_v7 }
  0x3f   :  { %1181 = vmatprep.subr.bf16.mxu1 %v3730_v16  ;;  %v3748_v28 = vld [vmem:[#allocation4 + $0x224] ss:$16 sps:$4 sm:$0xff]   ;;  %v3750_v29 = vld [vmem:[#allocation4 + $0x20] ss:$16 sps:$4 sm:$0xff]   ;;  %v6468_v16 = vsub.s32 5, %v4683_v7 }
  0x40   :  { %v3751_v30 = vld [vmem:[#allocation4 + $0x220] ss:$16 sps:$4 sm:$0xff]   ;;  %v3752_v31 = vld [vmem:[#allocation4 + $0x4] ss:$16 sps:$4 sm:$0xff]  }
  0x41   :  { %1141 = vmatpush1.bf16.msra.mxu0 %v3732_v17  ;;  %v3754_v32 = vld [vmem:[#allocation4 + $0x204] ss:$16 sps:$4 sm:$0xff]   ;;  %v3756_v33 = vld [vmem:[#allocation4] ss:$16 sps:$4 sm:$0xff]   ;;  %v6466_v17 = vsub.s32 7, %v4683_v7 }
  0x42   :  { %1182 = vmatpush1.bf16.msra.mxu1 %v3733_v18  ;;  %1142 = vmatprep.subr.bf16.mxu0 %v3734_v19  ;;  %v3757_v34 = vld [vmem:[#allocation4 + $0x200] ss:$16 sps:$4 sm:$0xff]   ;;  %v3758_v35 = vld [vmem:[#allocation4 + $0x1e4] ss:$16 sps:$4 sm:$0xff]  }
  0x43   :  { %1183 = vmatprep.subr.bf16.mxu1 %v3736_v20  ;;  %v3760_v36 = vld [vmem:[#allocation4 + $0x3e4] ss:$16 sps:$4 sm:$0xff]   ;;  %v3762_v37 = vld [vmem:[#allocation4 + $0x1e0] ss:$16 sps:$4 sm:$0xff]  }
  0x44   :  { %v3763_v38 = vld [vmem:[#allocation4 + $0x3e0] ss:$16 sps:$4 sm:$0xff]   ;;  %v3764_v39 = vld [vmem:[#allocation4 + $0x1c4] ss:$16 sps:$4 sm:$0xff]  }
  0x45   :  { %1143 = vmatpush1.bf16.msra.mxu0 %v3738_v21  ;;  %v3766_v40 = vld [vmem:[#allocation4 + $0x3c4] ss:$16 sps:$4 sm:$0xff]   ;;  %v3768_v41 = vld [vmem:[#allocation4 + $0x1c0] ss:$16 sps:$4 sm:$0xff]  }
  0x46   :  { %1184 = vmatpush1.bf16.msra.mxu1 %v3739_v22  ;;  %1144 = vmatprep.subr.bf16.mxu0 %v3740_v23  ;;  %v3769_v42 = vld [vmem:[#allocation4 + $0x3c0] ss:$16 sps:$4 sm:$0xff]   ;;  %v3770_v43 = vld [vmem:[#allocation4 + $0x1a4] ss:$16 sps:$4 sm:$0xff]  }
  0x47   :  { %1185 = vmatprep.subr.bf16.mxu1 %v3742_v24  ;;  %v3772_v44 = vld [vmem:[#allocation4 + $0x3a4] ss:$16 sps:$4 sm:$0xff]   ;;  %v3774_v45 = vld [vmem:[#allocation4 + $0x1a0] ss:$16 sps:$4 sm:$0xff]  }
  0x48   :  { %v3775_v46 = vld [vmem:[#allocation4 + $0x3a0] ss:$16 sps:$4 sm:$0xff]   ;;  %v3776_v47 = vld [vmem:[#allocation4 + $0x184] ss:$16 sps:$4 sm:$0xff]  }
  0x49   :  { %1145 = vmatpush1.bf16.msra.mxu0 %v3744_v25  ;;  %v3778_v48 = vld [vmem:[#allocation4 + $0x384] ss:$16 sps:$4 sm:$0xff]   ;;  %v3780_v49 = vld [vmem:[#allocation4 + $0x180] ss:$16 sps:$4 sm:$0xff]  }
  0x4a   :  { %1186 = vmatpush1.bf16.msra.mxu1 %v3745_v26  ;;  %1146 = vmatprep.subr.bf16.mxu0 %v3746_v27  ;;  %v3781_v50 = vld [vmem:[#allocation4 + $0x380] ss:$16 sps:$4 sm:$0xff]   ;;  %v3782_v51 = vld [vmem:[#allocation4 + $0x164] ss:$16 sps:$4 sm:$0xff]   ;;  %v85_v26 = vld [vmem:[#allocation2] sm:$0xf] }
  0x4b   :  { %1187 = vmatprep.subr.bf16.mxu1 %v3748_v28  ;;  %v3784_v52 = vld [vmem:[#allocation4 + $0x364] ss:$16 sps:$4 sm:$0xff]   ;;  %v3786_v53 = vld [vmem:[#allocation4 + $0x160] ss:$16 sps:$4 sm:$0xff]  }
  0x4c   :  { %v3787_v54 = vld [vmem:[#allocation4 + $0x360] ss:$16 sps:$4 sm:$0xff]   ;;  %v3788_v55 = vld [vmem:[#allocation4 + $0x144] ss:$16 sps:$4 sm:$0xff]  }
  0x4d   :  { %1147 = vmatpush1.bf16.msra.mxu0 %v3750_v29  ;;  %v3790_v56 = vld [vmem:[#allocation4 + $0x344] ss:$16 sps:$4 sm:$0xff]   ;;  %v3792_v57 = vld [vmem:[#allocation4 + $0x140] ss:$16 sps:$4 sm:$0xff]  }
  0x4e   :  { %1188 = vmatpush1.bf16.msra.mxu1 %v3751_v30  ;;  %1148 = vmatprep.subr.bf16.mxu0 %v3752_v31  ;;  %v3793_v58 = vld [vmem:[#allocation4 + $0x340] ss:$16 sps:$4 sm:$0xff]   ;;  %v3794_v59 = vld [vmem:[#allocation4 + $0x124] ss:$16 sps:$4 sm:$0xff]  }
  0x4f   :  { %1189 = vmatprep.subr.bf16.mxu1 %v3754_v32  ;;  %v3796_v60 = vld [vmem:[#allocation4 + $0x324] ss:$16 sps:$4 sm:$0xff]   ;;  %v3798_v61 = vld [vmem:[#allocation4 + $0x120] ss:$16 sps:$4 sm:$0xff]  }
  0x50   :  { %v3799_v62 = vld [vmem:[#allocation4 + $0x320] ss:$16 sps:$4 sm:$0xff]   ;;  %v3800_v63 = vld [vmem:[#allocation4 + $0x104] ss:$16 sps:$4 sm:$0xff]  }
  0x51   :  { %1149 = vmatpush1.bf16.msra.mxu0 %v3756_v33  ;;  %v3802_v1 = vld [vmem:[#allocation4 + $0x304] ss:$16 sps:$4 sm:$0xff]   ;;  %v3804_v2 = vld [vmem:[#allocation4 + $0x100] ss:$16 sps:$4 sm:$0xff]  }
  0x52   :  { %1190 = vmatpush1.bf16.msra.mxu1 %v3757_v34  ;;  %1150 = vmatprep.subr.bf16.mxu0 %v3758_v35  ;;  %v3805_v3 = vld [vmem:[#allocation4 + $0x300] ss:$16 sps:$4 sm:$0xff]  }
  0x53   :  { %1191 = vmatprep.subr.bf16.mxu1 %v3760_v36  ;;  %v84_v14 = vld [vmem:[%s6452_s1] sm:$0xff]  ;;  %v4741_v36 = vrot.slane %v85_v26, %v4694_v13 }
  0x54   :  { %v355_v18 = vrot.slane %v84_v14, %v4686_v9  ;;  %v359_v19 = vrot.slane %v84_v14, %v4689_v10  ;;  %v363_v20 = vrot.slane %v84_v14, %v6469_v11  ;;  %v367_v21 = vrot.slane %v84_v14, %v6467_v12 }
  0x55   :  { %1151 = vmatpush2.bf16.msra.mxu0 %v3762_v37  ;;  %v399_v22 = vrot.slane %v84_v14, %v4694_v13  ;;  %v403_v23 = vrot.slane %v84_v14, %v4700_v15  ;;  %v407_v24 = vrot.slane %v84_v14, %v6468_v16  ;;  %v411_v25 = vrot.slane %v84_v14, %v6466_v17  ;;  %v3816_v14 = vld [vmem:[#allocation4 + $0xc8] ss:$16 sps:$4 sm:$0xff]  }
  0x56   :  { %1192 = vmatpush2.bf16.msra.mxu1 %v3763_v38  ;;  %1152 = vmatprep.subr.bf16.mxu0 %v3764_v39  ;;  %v4717_v28 = vrot.slane %v355_v18, %v4686_v9  ;;  %v4720_v29 = vrot.slane %v359_v19, %v4686_v9  ;;  %v4723_v30 = vrot.slane %v363_v20, %v4686_v9  ;;  %v3817_v18 = vld [vmem:[#allocation4 + $0x2c8] ss:$16 sps:$4 sm:$0xff]   ;;  %v3818_v19 = vld [vmem:[#allocation4 + $0xac] ss:$16 sps:$4 sm:$0xff]  }
  0x57   :  { %1193 = vmatprep.subr.bf16.mxu1 %v3766_v40  ;;  %v4726_v31 = vrot.slane %v367_v21, %v4686_v9  ;;  %v4729_v32 = vrot.slane %v399_v22, %v4694_v13  ;;  %v4732_v33 = vrot.slane %v403_v23, %v4694_v13  ;;  %v4735_v34 = vrot.slane %v407_v24, %v4694_v13  ;;  %v3820_v20 = vld [vmem:[#allocation4 + $0x2ac] ss:$16 sps:$4 sm:$0xff]   ;;  %v3822_v21 = vld [vmem:[#allocation4 + $0xa8] ss:$16 sps:$4 sm:$0xff]  }
  0x58   :  { %6785 = vst [vmem:[#allocation12_spill] sm:$0xff] %v4717_v28  ;;  %6786 = vst [vmem:[#allocation13_spill] sm:$0xff] %v4720_v29  ;;  %v4738_v35 = vrot.slane %v411_v25, %v4694_v13  ;;  %v4744_v37 = vrot.slane %v85_v26, %v4700_v15  ;;  %v4747_v38 = vrot.slane %v85_v26, %v4686_v9  ;;  %v3823_v22 = vld [vmem:[#allocation4 + $0x2a8] ss:$16 sps:$4 sm:$0xff]   ;;  %v3824_v23 = vld [vmem:[#allocation4 + $0x8c] ss:$16 sps:$4 sm:$0xff]  }
  0x59   :  { %1153 = vmatpush2.bf16.msra.mxu0 %v3768_v41  ;;  %6787 = vst [vmem:[#allocation14_spill] sm:$0xff] %v4723_v30  ;;  %6788 = vst [vmem:[#allocation15_spill] sm:$0xff] %v4729_v32  ;;  %v4750_v39 = vrot.slane %v85_v26, %v4689_v10  ;;  %v3826_v24 = vld [vmem:[#allocation4 + $0x28c] ss:$16 sps:$4 sm:$0xff]   ;;  %v3828_v25 = vld [vmem:[#allocation4 + $0x88] ss:$16 sps:$4 sm:$0xff]  }
  0x5a   :  { %1194 = vmatpush2.bf16.msra.mxu1 %v3769_v42  ;;  %1154 = vmatprep.subr.bf16.mxu0 %v3770_v43  ;;  %6789 = vst [vmem:[#allocation16_spill] sm:$0xff] %v4732_v33  ;;  %6790 = vst [vmem:[#allocation17_spill] sm:$0xff] %v4735_v34  ;;  %v3829_v26 = vld [vmem:[#allocation4 + $0x288] ss:$16 sps:$4 sm:$0xff]  }
  0x5b   :  { %1195 = vmatprep.subr.bf16.mxu1 %v3772_v44  ;;  %6791 = vst [vmem:[#allocation18_spill] sm:$0xff] %v4738_v35 }
  0x5d   :  { %1155 = vmatpush2.bf16.msra.mxu0 %v3774_v45 }
  0x5e   :  { %1196 = vmatpush2.bf16.msra.mxu1 %v3775_v46  ;;  %1156 = vmatprep.subr.bf16.mxu0 %v3776_v47 }
  0x5f   :  { %1197 = vmatprep.subr.bf16.mxu1 %v3778_v48 }
  0x61   :  { %1157 = vmatpush2.bf16.msra.mxu0 %v3780_v49 }
  0x62   :  { %1198 = vmatpush2.bf16.msra.mxu1 %v3781_v50  ;;  %1158 = vmatprep.subr.bf16.mxu0 %v3782_v51 }
  0x63   :  { %1199 = vmatprep.subr.bf16.mxu1 %v3784_v52 }
  0x65   :  { %1159 = vmatpush2.bf16.msra.mxu0 %v3786_v53 }
  0x66   :  { %1200 = vmatpush2.bf16.msra.mxu1 %v3787_v54  ;;  %1160 = vmatprep.subr.bf16.mxu0 %v3788_v55 }
  0x67   :  { %1201 = vmatprep.subr.bf16.mxu1 %v3790_v56 }
  0x69   :  { %1161 = vmatpush2.bf16.msra.mxu0 %v3792_v57 }
  0x6a   :  { %1202 = vmatpush2.bf16.msra.mxu1 %v3793_v58  ;;  %1162 = vmatprep.subr.bf16.mxu0 %v3794_v59 }
  0x6b   :  { %1203 = vmatprep.subr.bf16.mxu1 %v3796_v60 }
  0x6d   :  { %1163 = vmatpush2.bf16.msra.mxu0 %v3798_v61  ;;  %v3810_v61 = vld [vmem:[#allocation4 + $0xe8] ss:$16 sps:$4 sm:$0xff]  }
  0x6e   :  { %1204 = vmatpush2.bf16.msra.mxu1 %v3799_v62  ;;  %1164 = vmatprep.subr.bf16.mxu0 %v3800_v63 }
  0x6f   :  { %1205 = vmatprep.subr.bf16.mxu1 %v3802_v1 }
  0x71   :  { %1165 = vmatpush2.bf16.msra.mxu0 %v3804_v2 }
  0x72   :  { %1206 = vmatpush2.bf16.msra.mxu1 %v3805_v3  ;;  %1216 = vmatprep.subr.bf16.mxu0 %v3806_v4  ;;  %v3811_v3 = vld [vmem:[#allocation4 + $0x2e8] ss:$16 sps:$4 sm:$0xff]   ;;  %v3812_v4 = vld [vmem:[#allocation4 + $0xcc] ss:$16 sps:$4 sm:$0xff]  }
  0x73   :  { %1257 = vmatprep.subr.bf16.mxu1 %v3808_v5  ;;  %v3814_v5 = vld [vmem:[#allocation4 + $0x2cc] ss:$16 sps:$4 sm:$0xff]  }
  0xaf   :  { %v349_v27 = vpop.permute.xlu0 %348 }
  0xb0   :  { %v388_v40 = vmul.f32 %v4717_v28, %v349_v27  ;;  %v389_v41 = vmul.f32 %v4720_v29, %v349_v27  ;;  %v390_v42 = vmul.f32 %v4723_v30, %v349_v27  ;;  %v391_v43 = vmul.f32 %v4726_v31, %v349_v27  ;;  %v3830_v27 = vld [vmem:[#allocation4 + $0x6c] ss:$16 sps:$4 sm:$0xff]  }
  0xb4   :  { %v394_v44 = vpop.permute.xlu0 %393 }
  0xb5   :  { %v432_v45 = vmul.f32 %v4729_v32, %v394_v44  ;;  %v433_v46 = vmul.f32 %v4732_v33, %v394_v44  ;;  %v434_v47 = vmul.f32 %v4735_v34, %v394_v44  ;;  %v435_v48 = vmul.f32 %v4738_v35, %v394_v44  ;;  %v3838_v44 = vld [vmem:[#allocation4 + $0x24c] ss:$16 sps:$4 sm:$0xff]  }
  0xb7   :  { %v437_v49 = vadd.f32 %v433_v46, %v389_v41  ;;  %v439_v50 = vadd.f32 %v435_v48, %v391_v43  ;;  %v436_v51 = vadd.f32 %v432_v45, %v388_v40  ;;  %v438_v52 = vadd.f32 %v434_v47, %v390_v42  ;;  %v3832_v40 = vld [vmem:[#allocation4 + $0x26c] ss:$16 sps:$4 sm:$0xff]   ;;  %v3834_v41 = vld [vmem:[#allocation4 + $0x68] ss:$16 sps:$4 sm:$0xff]  }
  0xb8   :  { %v3835_v42 = vld [vmem:[#allocation4 + $0x268] ss:$16 sps:$4 sm:$0xff]   ;;  %v3836_v43 = vld [vmem:[#allocation4 + $0x4c] ss:$16 sps:$4 sm:$0xff]  }
  0xb9   :  { %v462_v53 = vadd.f32 %v4741_v36, %v437_v49  ;;  %v464_v54 = vadd.f32 %v4744_v37, %v439_v50  ;;  %v461_v55 = vadd.f32 %v4747_v38, %v436_v51  ;;  %v463_v56 = vadd.f32 %v4750_v39, %v438_v52  ;;  %v3840_v45 = vld [vmem:[#allocation4 + $0x48] ss:$16 sps:$4 sm:$0xff]   ;;  %v3842_v47 = vld [vmem:[#allocation4 + $0x2c] ss:$16 sps:$4 sm:$0xff]  }
  0xba   :  { %v3841_v46 = vld [vmem:[#allocation4 + $0x248] ss:$16 sps:$4 sm:$0xff]   ;;  %v3844_v48 = vld [vmem:[#allocation4 + $0x22c] ss:$16 sps:$4 sm:$0xff]  }
  0xbb   :  { %v466_v57 = vmax.f32 %v462_v53, 0.0  ;;  %v468_v58 = vmax.f32 %v464_v54, 0.0  ;;  %v465_v59 = vmax.f32 %v461_v55, 0.0  ;;  %v467_v60 = vmax.f32 %v463_v56, 0.0  ;;  %v3846_v49 = vld [vmem:[#allocation4 + $0x28] ss:$16 sps:$4 sm:$0xff]  }
  0xbc   :  { %v3847_v50 = vld [vmem:[#allocation4 + $0x228] ss:$16 sps:$4 sm:$0xff]   ;;  %v3848_v51 = vld [vmem:[#allocation4 + $0xc] ss:$16 sps:$4 sm:$0xff]  }
  0xbd   :  { %v470_v62 = vpack.c.bf16 %v466_v57, %v466_v57  ;;  %v472_v63 = vpack.c.bf16 %v468_v58, %v468_v58  ;;  %v4764_v1 = vpack.c.bf16 %v465_v59, %v465_v59  ;;  %v4766_v2 = vpack.c.bf16 %v467_v60, %v467_v60  ;;  %v3850_v52 = vld [vmem:[#allocation4 + $0x20c] ss:$16 sps:$4 sm:$0xff]   ;;  %v3852_v53 = vld [vmem:[#allocation4 + $0x8] ss:$16 sps:$4 sm:$0xff]  }
  0xbe   :  { %v3853_v54 = vld [vmem:[#allocation4 + $0x208] ss:$16 sps:$4 sm:$0xff]   ;;  %v3854_v55 = vld [vmem:[#allocation4 + $0x1ec] ss:$16 sps:$4 sm:$0xff]  }
  0xbf   :  { %1166 = vmatprep.mubr.bf16.mxu0 %v470_v62  ;;  %1207 = vmatprep.mubr.bf16.mxu1 %v472_v63  ;;  %v3856_v56 = vld [vmem:[#allocation4 + $0x3ec] ss:$16 sps:$4 sm:$0xff]   ;;  %v3858_v57 = vld [vmem:[#allocation4 + $0x1e8] ss:$16 sps:$4 sm:$0xff]  }
  0xc0   :  { %1167 = vmatmul.mubr.bf16.vlgmr.msra.gmra.mxu0 %v4764_v1  ;;  %1208 = vmatmul.mubr.bf16.vlgmr.msra.gmra.mxu1 %v4766_v2  ;;  %v3859_v58 = vld [vmem:[#allocation4 + $0x3e8] ss:$16 sps:$4 sm:$0xff]   ;;  %v3860_v59 = vld [vmem:[#allocation4 + $0x1cc] ss:$16 sps:$4 sm:$0xff]  }
  0xc1   :  { %1217 = vmatpush1.bf16.msra.mxu0 %v3810_v61  ;;  %1258 = vmatpush1.bf16.msra.mxu1 %v3811_v3  ;;  %v3862_v60 = vld [vmem:[#allocation4 + $0x3cc] ss:$16 sps:$4 sm:$0xff]   ;;  %v3864_v61 = vld [vmem:[#allocation4 + $0x1c8] ss:$16 sps:$4 sm:$0xff]  }
  0xc2   :  { %1248 = vmatprep.mubr.bf16.mxu0 %v470_v62  ;;  %1289 = vmatprep.mubr.bf16.mxu1 %v472_v63  ;;  %v3865_v62 = vld [vmem:[#allocation4 + $0x3c8] ss:$16 sps:$4 sm:$0xff]   ;;  %v3866_v63 = vld [vmem:[#allocation4 + $0x1ac] ss:$16 sps:$4 sm:$0xff]  }
  0xc3   :  { %1218 = vmatprep.subr.bf16.mxu0 %v3812_v4  ;;  %1259 = vmatprep.subr.bf16.mxu1 %v3814_v5  ;;  %v3868_v3 = vld [vmem:[#allocation4 + $0x3ac] ss:$16 sps:$4 sm:$0xff]   ;;  %v3870_v4 = vld [vmem:[#allocation4 + $0x1a8] ss:$16 sps:$4 sm:$0xff]  }
  0xc4   :  { %v3871_v5 = vld [vmem:[#allocation4 + $0x3a8] ss:$16 sps:$4 sm:$0xff]  }
  0xc5   :  { %1219 = vmatpush1.bf16.msra.mxu0 %v3816_v14  ;;  %1260 = vmatpush1.bf16.msra.mxu1 %v3817_v18  ;;  %v3872_v14 = vld [vmem:[#allocation4 + $0x18c] ss:$16 sps:$4 sm:$0xff]  }
  0xc6   :  { %1220 = vmatprep.subr.bf16.mxu0 %v3818_v19  ;;  %1261 = vmatprep.subr.bf16.mxu1 %v3820_v20  ;;  %v3874_v18 = vld [vmem:[#allocation4 + $0x38c] ss:$16 sps:$4 sm:$0xff]   ;;  %v3876_v19 = vld [vmem:[#allocation4 + $0x188] ss:$16 sps:$4 sm:$0xff]  }
  0xc7   :  { %v3877_v20 = vld [vmem:[#allocation4 + $0x388] ss:$16 sps:$4 sm:$0xff]  }
  0xc9   :  { %1221 = vmatpush1.bf16.msra.mxu0 %v3822_v21  ;;  %1262 = vmatpush1.bf16.msra.mxu1 %v3823_v22  ;;  %v3878_v21 = vld [vmem:[#allocation4 + $0x16c] ss:$16 sps:$4 sm:$0xff]  }
  0xca   :  { %1222 = vmatprep.subr.bf16.mxu0 %v3824_v23  ;;  %1263 = vmatprep.subr.bf16.mxu1 %v3826_v24  ;;  %v3880_v22 = vld [vmem:[#allocation4 + $0x36c] ss:$16 sps:$4 sm:$0xff]   ;;  %v3882_v23 = vld [vmem:[#allocation4 + $0x168] ss:$16 sps:$4 sm:$0xff]  }
  0xcb   :  { %v3883_v24 = vld [vmem:[#allocation4 + $0x368] ss:$16 sps:$4 sm:$0xff]  }
  0xcd   :  { %1223 = vmatpush1.bf16.msra.mxu0 %v3828_v25  ;;  %1264 = vmatpush1.bf16.msra.mxu1 %v3829_v26  ;;  %v3884_v25 = vld [vmem:[#allocation4 + $0x14c] ss:$16 sps:$4 sm:$0xff]  }
  0xce   :  { %1224 = vmatprep.subr.bf16.mxu0 %v3830_v27  ;;  %1265 = vmatprep.subr.bf16.mxu1 %v3832_v40  ;;  %v3886_v26 = vld [vmem:[#allocation4 + $0x34c] ss:$16 sps:$4 sm:$0xff]   ;;  %v3888_v27 = vld [vmem:[#allocation4 + $0x148] ss:$16 sps:$4 sm:$0xff]  }
  0xcf   :  { %v3889_v40 = vld [vmem:[#allocation4 + $0x348] ss:$16 sps:$4 sm:$0xff]  }
  0xd1   :  { %1225 = vmatpush1.bf16.msra.mxu0 %v3834_v41  ;;  %1266 = vmatpush1.bf16.msra.mxu1 %v3835_v42  ;;  %v3890_v41 = vld [vmem:[#allocation4 + $0x12c] ss:$16 sps:$4 sm:$0xff]  }
  0xd2   :  { %1226 = vmatprep.subr.bf16.mxu0 %v3836_v43  ;;  %1267 = vmatprep.subr.bf16.mxu1 %v3838_v44  ;;  %v3892_v42 = vld [vmem:[#allocation4 + $0x32c] ss:$16 sps:$4 sm:$0xff]   ;;  %v3894_v43 = vld [vmem:[#allocation4 + $0x128] ss:$16 sps:$4 sm:$0xff]  }
  0xd3   :  { %v3895_v44 = vld [vmem:[#allocation4 + $0x328] ss:$16 sps:$4 sm:$0xff]  }
  0xd5   :  { %1227 = vmatpush1.bf16.msra.mxu0 %v3840_v45  ;;  %1268 = vmatpush1.bf16.msra.mxu1 %v3841_v46  ;;  %v3896_v45 = vld [vmem:[#allocation4 + $0x10c] ss:$16 sps:$4 sm:$0xff]  }
  0xd6   :  { %1228 = vmatprep.subr.bf16.mxu0 %v3842_v47  ;;  %1269 = vmatprep.subr.bf16.mxu1 %v3844_v48  ;;  %v3898_v46 = vld [vmem:[#allocation4 + $0x30c] ss:$16 sps:$4 sm:$0xff]   ;;  %v3900_v47 = vld [vmem:[#allocation4 + $0x108] ss:$16 sps:$4 sm:$0xff]  }
  0xd7   :  { %v3901_v48 = vld [vmem:[#allocation4 + $0x308] ss:$16 sps:$4 sm:$0xff]  }
  0xd9   :  { %1229 = vmatpush1.bf16.msra.mxu0 %v3846_v49  ;;  %1270 = vmatpush1.bf16.msra.mxu1 %v3847_v50  ;;  %v3902_v49 = vld [vmem:[#allocation7 + $0xe4] ss:$16 sps:$4 sm:$0xff]   ;;  %v3904_v50 = vld [vmem:[#allocation7 + $0xe0] ss:$16 sps:$4 sm:$0xff]  }
  0xda   :  { %1230 = vmatprep.subr.bf16.mxu0 %v3848_v51  ;;  %1271 = vmatprep.subr.bf16.mxu1 %v3850_v52  ;;  %v3905_v51 = vld [vmem:[#allocation7 + $0xc4] ss:$16 sps:$4 sm:$0xff]   ;;  %v3907_v52 = vld [vmem:[#allocation7 + $0xc0] ss:$16 sps:$4 sm:$0xff]  }
  0xdd   :  { %1231 = vmatpush1.bf16.msra.mxu0 %v3852_v53  ;;  %1272 = vmatpush1.bf16.msra.mxu1 %v3853_v54  ;;  %v3908_v53 = vld [vmem:[#allocation7 + $0xa4] ss:$16 sps:$4 sm:$0xff]   ;;  %v3910_v54 = vld [vmem:[#allocation7 + $0xa0] ss:$16 sps:$4 sm:$0xff]  }
  0xde   :  { %1232 = vmatprep.subr.bf16.mxu0 %v3854_v55  ;;  %1273 = vmatprep.subr.bf16.mxu1 %v3856_v56  ;;  %v3911_v55 = vld [vmem:[#allocation7 + $0x84] ss:$16 sps:$4 sm:$0xff]   ;;  %v3913_v56 = vld [vmem:[#allocation7 + $0x80] ss:$16 sps:$4 sm:$0xff]  }
  0xe1   :  { %1233 = vmatpush2.bf16.msra.mxu0 %v3858_v57  ;;  %1274 = vmatpush2.bf16.msra.mxu1 %v3859_v58  ;;  %v3950_v57 = vld [vmem:[#allocation7 + $0x2e4] ss:$16 sps:$4 sm:$0xff]  }
  0xe2   :  { %1234 = vmatprep.subr.bf16.mxu0 %v3860_v59  ;;  %1275 = vmatprep.subr.bf16.mxu1 %v3862_v60  ;;  %v3914_v58 = vld [vmem:[#allocation7 + $0x64] ss:$16 sps:$4 sm:$0xff]   ;;  %v3952_v59 = vld [vmem:[#allocation7 + $0x2e0] ss:$16 sps:$4 sm:$0xff]  }
  0xe3   :  { %v3956_v60 = vld [vmem:[#allocation7 + $0x2c4] ss:$16 sps:$4 sm:$0xff]  }
  0xe5   :  { %1235 = vmatpush2.bf16.msra.mxu0 %v3864_v61  ;;  %1276 = vmatpush2.bf16.msra.mxu1 %v3865_v62  ;;  %v3917_v61 = vld [vmem:[#allocation7 + $0x44] ss:$16 sps:$4 sm:$0xff]   ;;  %v3919_v62 = vld [vmem:[#allocation7 + $0x40] ss:$16 sps:$4 sm:$0xff]  }
  0xe6   :  { %1236 = vmatprep.subr.bf16.mxu0 %v3866_v63  ;;  %1277 = vmatprep.subr.bf16.mxu1 %v3868_v3  ;;  %v3962_v63 = vld [vmem:[#allocation7 + $0x2a4] ss:$16 sps:$4 sm:$0xff]   ;;  %v3964_v3 = vld [vmem:[#allocation7 + $0x2a0] ss:$16 sps:$4 sm:$0xff]  }
  0xe9   :  { %1237 = vmatpush2.bf16.msra.mxu0 %v3870_v4  ;;  %1278 = vmatpush2.bf16.msra.mxu1 %v3871_v5  ;;  %v3920_v4 = vld [vmem:[#allocation7 + $0x24] ss:$16 sps:$4 sm:$0xff]   ;;  %v3922_v5 = vld [vmem:[#allocation7 + $0x20] ss:$16 sps:$4 sm:$0xff]  }
  0xea   :  { %1238 = vmatprep.subr.bf16.mxu0 %v3872_v14  ;;  %1279 = vmatprep.subr.bf16.mxu1 %v3874_v18  ;;  %v3968_v14 = vld [vmem:[#allocation7 + $0x284] ss:$16 sps:$4 sm:$0xff]   ;;  %v3970_v18 = vld [vmem:[#allocation7 + $0x280] ss:$16 sps:$4 sm:$0xff]  }
  0xed   :  { %1239 = vmatpush2.bf16.msra.mxu0 %v3876_v19  ;;  %1280 = vmatpush2.bf16.msra.mxu1 %v3877_v20  ;;  %v3923_v19 = vld [vmem:[#allocation7 + $0x4] ss:$16 sps:$4 sm:$0xff]   ;;  %v3925_v20 = vld [vmem:[#allocation7] ss:$16 sps:$4 sm:$0xff]  }
  0xee   :  { %1240 = vmatprep.subr.bf16.mxu0 %v3878_v21  ;;  %1281 = vmatprep.subr.bf16.mxu1 %v3880_v22  ;;  %v3974_v21 = vld [vmem:[#allocation7 + $0x264] ss:$16 sps:$4 sm:$0xff]   ;;  %v3976_v22 = vld [vmem:[#allocation7 + $0x260] ss:$16 sps:$4 sm:$0xff]  }
  0xf1   :  { %1241 = vmatpush2.bf16.msra.mxu0 %v3882_v23  ;;  %1282 = vmatpush2.bf16.msra.mxu1 %v3883_v24  ;;  %v3926_v23 = vld [vmem:[#allocation7 + $0x1e4] ss:$16 sps:$4 sm:$0xff]   ;;  %v3928_v24 = vld [vmem:[#allocation7 + $0x1e0] ss:$16 sps:$4 sm:$0xff]  }
  0xf2   :  { %1242 = vmatprep.subr.bf16.mxu0 %v3884_v25  ;;  %1283 = vmatprep.subr.bf16.mxu1 %v3886_v26  ;;  %v4772_v25 = vld [vmem:[#allocation7 + $0x244] ss:$16 sps:$4 sm:$0xff]   ;;  %v4774_v26 = vld [vmem:[#allocation7 + $0x240] ss:$16 sps:$4 sm:$0xff]  }
  0xf5   :  { %1243 = vmatpush2.bf16.msra.mxu0 %v3888_v27  ;;  %1284 = vmatpush2.bf16.msra.mxu1 %v3889_v40  ;;  %v3929_v27 = vld [vmem:[#allocation7 + $0x1c4] ss:$16 sps:$4 sm:$0xff]   ;;  %v3931_v40 = vld [vmem:[#allocation7 + $0x1c0] ss:$16 sps:$4 sm:$0xff]  }
  0xf6   :  { %1244 = vmatprep.subr.bf16.mxu0 %v3890_v41  ;;  %1285 = vmatprep.subr.bf16.mxu1 %v3892_v42  ;;  %v4778_v41 = vld [vmem:[#allocation7 + $0x224] ss:$16 sps:$4 sm:$0xff]   ;;  %v4780_v42 = vld [vmem:[#allocation7 + $0x220] ss:$16 sps:$4 sm:$0xff]  }
  0xf9   :  { %1245 = vmatpush2.bf16.msra.mxu0 %v3894_v43  ;;  %1286 = vmatpush2.bf16.msra.mxu1 %v3895_v44  ;;  %v3932_v43 = vld [vmem:[#allocation7 + $0x1a4] ss:$16 sps:$4 sm:$0xff]   ;;  %v3934_v44 = vld [vmem:[#allocation7 + $0x1a0] ss:$16 sps:$4 sm:$0xff]  }
  0xfa   :  { %1246 = vmatprep.subr.bf16.mxu0 %v3896_v45  ;;  %1287 = vmatprep.subr.bf16.mxu1 %v3898_v46  ;;  %v4784_v45 = vld [vmem:[#allocation7 + $0x204] ss:$16 sps:$4 sm:$0xff]   ;;  %v4786_v46 = vld [vmem:[#allocation7 + $0x200] ss:$16 sps:$4 sm:$0xff]  }
  0xfd   :  { %1247 = vmatpush2.bf16.msra.mxu0 %v3900_v47  ;;  %1288 = vmatpush2.bf16.msra.mxu1 %v3901_v48  ;;  %v3935_v47 = vld [vmem:[#allocation7 + $0x184] ss:$16 sps:$4 sm:$0xff]   ;;  %v4790_v48 = vld [vmem:[#allocation7 + $0x180] ss:$16 sps:$4 sm:$0xff]  }
  0xfe   :  { %1967 = vmatprep.subr.bf16.mxu0 %v3902_v49  ;;  %2008 = vmatprep.subr.bf16.mxu1 %v3950_v57  ;;  %v4792_v49 = vld [vmem:[#allocation7 + $0x3e4] ss:$16 sps:$4 sm:$0xff]  }
  0xff   :  { %v4815_v57 = vld [vmem:[#allocation7 + $0x3a4] ss:$16 sps:$4 sm:$0xff]  }
 0x100   :  { %1249 = vmatmul.mubr.bf16.vlgmr.msra.gmra.mxu0 %v4764_v1  ;;  %1290 = vmatmul.mubr.bf16.vlgmr.msra.gmra.mxu1 %v4766_v2  ;;  %v3916_v1 = vld [vmem:[#allocation7 + $0x60] ss:$16 sps:$4 sm:$0xff]  }
 0x101   :  { %1968 = vmatpush1.bf16.msra.mxu0 %v3904_v50  ;;  %2009 = vmatpush1.bf16.msra.mxu1 %v3952_v59  ;;  %v3958_v2 = vld [vmem:[#allocation7 + $0x2c0] ss:$16 sps:$4 sm:$0xff]   ;;  %v4820_v59 = vld [vmem:[#allocation7 + $0x124] ss:$16 sps:$4 sm:$0xff]  }
 0x102   :  { %1969 = vmatprep.subr.bf16.mxu0 %v3905_v51  ;;  %2010 = vmatprep.subr.bf16.mxu1 %v3956_v60  ;;  %v4794_v50 = vld [vmem:[#allocation7 + $0x3e0] ss:$16 sps:$4 sm:$0xff]   ;;  %v4796_v51 = vld [vmem:[#allocation7 + $0x164] ss:$16 sps:$4 sm:$0xff]  }
 0x103   :  { %v4827_v60 = vld [vmem:[#allocation7 + $0x384] ss:$16 sps:$4 sm:$0xff]  }
 0x105   :  { %1970 = vmatpush1.bf16.msra.mxu0 %v3907_v52  ;;  %2011 = vmatpush1.bf16.msra.mxu1 %v3958_v2  ;;  %v4801_v52 = vld [vmem:[#allocation7 + $0x160] ss:$16 sps:$4 sm:$0xff]  }
 0x106   :  { %1971 = vmatprep.subr.bf16.mxu0 %v3908_v53  ;;  %2012 = vmatprep.subr.bf16.mxu1 %v3962_v63  ;;  %v4803_v53 = vld [vmem:[#allocation7 + $0x3c4] ss:$16 sps:$4 sm:$0xff]   ;;  %v4829_v2 = vld [vmem:[#allocation7 + $0x380] ss:$16 sps:$4 sm:$0xff]  }
 0x107   :  { %v4839_v63 = vld [vmem:[#allocation7 + $0x364] ss:$16 sps:$4 sm:$0xff]  }
 0x109   :  { %1972 = vmatpush1.bf16.msra.mxu0 %v3910_v54  ;;  %2013 = vmatpush1.bf16.msra.mxu1 %v3964_v3  ;;  %v4805_v54 = vld [vmem:[#allocation7 + $0x3c0] ss:$16 sps:$4 sm:$0xff]  }
 0x10a   :  { %1973 = vmatprep.subr.bf16.mxu0 %v3911_v55  ;;  %2014 = vmatprep.subr.bf16.mxu1 %v3968_v14  ;;  %v4808_v55 = vld [vmem:[#allocation7 + $0x144] ss:$16 sps:$4 sm:$0xff]   ;;  %v4841_v3 = vld [vmem:[#allocation7 + $0x360] ss:$16 sps:$4 sm:$0xff]  }
 0x10b   :  { %v4852_v14 = vld [vmem:[#allocation7 + $0x340] ss:$16 sps:$4 sm:$0xff]  }
 0x10d   :  { %1974 = vmatpush1.bf16.msra.mxu0 %v3913_v56  ;;  %2015 = vmatpush1.bf16.msra.mxu1 %v3970_v18  ;;  %v4813_v56 = vld [vmem:[#allocation7 + $0x140] ss:$16 sps:$4 sm:$0xff]   ;;  %v4856_v18 = vld [vmem:[#allocation7 + $0x324] ss:$16 sps:$4 sm:$0xff]  }
 0x10e   :  { %1975 = vmatprep.subr.bf16.mxu0 %v3914_v58  ;;  %2016 = vmatprep.subr.bf16.mxu1 %v3974_v21  ;;  %v4817_v58 = vld [vmem:[#allocation7 + $0x3a0] ss:$16 sps:$4 sm:$0xff]   ;;  %6796 = vst [vmem:[#allocation23_spill] sm:$0xff] %v4856_v18 }
 0x10f   :  { %v4864_v21 = vld [vmem:[#allocation7 + $0x300] ss:$16 sps:$4 sm:$0xff]  }
 0x110   :  { %6799 = vst [vmem:[#allocation26_spill] sm:$0xff] %v4864_v21 }
 0x111   :  { %1976 = vmatpush1.bf16.msra.mxu0 %v3916_v1  ;;  %2017 = vmatpush1.bf16.msra.mxu1 %v3976_v22  ;;  %v4825_v1 = vld [vmem:[#allocation7 + $0x120] ss:$16 sps:$4 sm:$0xff]   ;;  %v4868_v22 = vld [vmem:[#allocation7 + $0x2ec] ss:$16 sps:$4 sm:$0xff]  }
 0x112   :  { %1977 = vmatprep.subr.bf16.mxu0 %v3917_v61  ;;  %2018 = vmatprep.subr.bf16.mxu1 %v4772_v25  ;;  %6792 = vst [vmem:[#allocation19_spill] sm:$0xff] %v4825_v1  ;;  %v4832_v61 = vld [vmem:[#allocation7 + $0x104] ss:$16 sps:$4 sm:$0xff]   ;;  %6800 = vst [vmem:[#allocation27_spill] sm:$0xff] %v4868_v22 }
 0x113   :  { %6793 = vst [vmem:[#allocation20_spill] sm:$0xff] %v4832_v61 }
 0x115   :  { %1978 = vmatpush1.bf16.msra.mxu0 %v3919_v62  ;;  %2019 = vmatpush1.bf16.msra.mxu1 %v4774_v26  ;;  %v4837_v62 = vld [vmem:[#allocation7 + $0x100] ss:$16 sps:$4 sm:$0xff]  }
 0x116   :  { %1979 = vmatprep.subr.bf16.mxu0 %v3920_v4  ;;  %2020 = vmatprep.subr.bf16.mxu1 %v4778_v41  ;;  %6794 = vst [vmem:[#allocation21_spill] sm:$0xff] %v4837_v62  ;;  %v4844_v4 = vld [vmem:[#allocation7 + $0xec] ss:$16 sps:$4 sm:$0xff]  }
 0x117   :  { %6795 = vst [vmem:[#allocation22_spill] sm:$0xff] %v4844_v4 }
 0x119   :  { %1980 = vmatpush1.bf16.msra.mxu0 %v3922_v5  ;;  %2021 = vmatpush1.bf16.msra.mxu1 %v4780_v42  ;;  %v4849_v5 = vld [vmem:[#allocation7 + $0x344] ss:$16 sps:$4 sm:$0xff]  }
 0x11a   :  { %1981 = vmatprep.subr.bf16.mxu0 %v3923_v19  ;;  %2022 = vmatprep.subr.bf16.mxu1 %v4784_v45  ;;  %v4858_v19 = vld [vmem:[#allocation7 + $0x320] ss:$16 sps:$4 sm:$0xff]  }
 0x11b   :  { %6797 = vst [vmem:[#allocation24_spill] sm:$0xff] %v4858_v19 }
 0x11d   :  { %1982 = vmatpush1.bf16.msra.mxu0 %v3925_v20  ;;  %2023 = vmatpush1.bf16.msra.mxu1 %v4786_v46  ;;  %v4862_v20 = vld [vmem:[#allocation7 + $0x304] ss:$16 sps:$4 sm:$0xff]  }
 0x11e   :  { %1983 = vmatprep.subr.bf16.mxu0 %v3926_v23  ;;  %2024 = vmatprep.subr.bf16.mxu1 %v4792_v49  ;;  %6798 = vst [vmem:[#allocation25_spill] sm:$0xff] %v4862_v20  ;;  %v4871_v23 = vld [vmem:[#allocation6] sm:$0xf] }
 0x121   :  { %1984 = vmatpush2.bf16.msra.mxu0 %v3928_v24  ;;  %2025 = vmatpush2.bf16.msra.mxu1 %v4794_v50  ;;  %v4875_v24 = vrot.slane %v4871_v23, %v4686_v9 }
 0x122   :  { %1985 = vmatprep.subr.bf16.mxu0 %v3929_v27  ;;  %2026 = vmatprep.subr.bf16.mxu1 %v4803_v53  ;;  %v4879_v27 = vrot.slane %v4871_v23, %v4694_v13 }
 0x123   :  { %6801 = vst [vmem:[#allocation28_spill] sm:$0xff] %v4875_v24 }
 0x124   :  { %6802 = vst [vmem:[#allocation29_spill] sm:$0xff] %v4879_v27 }
 0x125   :  { %1986 = vmatpush2.bf16.msra.mxu0 %v3931_v40  ;;  %2027 = vmatpush2.bf16.msra.mxu1 %v4805_v54 }
 0x126   :  { %1987 = vmatprep.subr.bf16.mxu0 %v3932_v43  ;;  %2028 = vmatprep.subr.bf16.mxu1 %v4815_v57 }
 0x129   :  { %1988 = vmatpush2.bf16.msra.mxu0 %v3934_v44  ;;  %2029 = vmatpush2.bf16.msra.mxu1 %v4817_v58 }
 0x12a   :  { %1989 = vmatprep.subr.bf16.mxu0 %v3935_v47  ;;  %2030 = vmatprep.subr.bf16.mxu1 %v4827_v60 }
 0x12d   :  { %1990 = vmatpush2.bf16.msra.mxu0 %v4790_v48  ;;  %2031 = vmatpush2.bf16.msra.mxu1 %v4829_v2 }
 0x12e   :  { %1991 = vmatprep.subr.bf16.mxu0 %v4796_v51  ;;  %2032 = vmatprep.subr.bf16.mxu1 %v4839_v63 }
 0x131   :  { %1992 = vmatpush2.bf16.msra.mxu0 %v4801_v52  ;;  %2033 = vmatpush2.bf16.msra.mxu1 %v4841_v3 }
 0x132   :  { %1993 = vmatprep.subr.bf16.mxu0 %v4808_v55  ;;  %2034 = vmatprep.subr.bf16.mxu1 %v4849_v5 }
 0x135   :  { %1994 = vmatpush2.bf16.msra.mxu0 %v4813_v56  ;;  %2035 = vmatpush2.bf16.msra.mxu1 %v4852_v14 }
 0x136   :  { %1995 = vmatprep.subr.bf16.mxu0 %v4820_v59  ;;  %2036 = vmatprep.subr.bf16.mxu1 %v4856_v18 }
 0x139   :  { %1996 = vmatpush2.bf16.msra.mxu0 %v4825_v1  ;;  %2037 = vmatpush2.bf16.msra.mxu1 %v4858_v19  ;;  %v4887_v19 = vld [vmem:[#allocation7 + $0xcc] ss:$16 sps:$4 sm:$0xff]  }
 0x13a   :  { %1997 = vmatprep.subr.bf16.mxu0 %v4832_v61  ;;  %2038 = vmatprep.subr.bf16.mxu1 %v4862_v20  ;;  %v4883_v20 = vld [vmem:[#allocation7 + $0xe8] ss:$16 sps:$4 sm:$0xff]   ;;  %6804 = vst [vmem:[#allocation31_spill] sm:$0xff] %v4887_v19 }
 0x13b   :  { %6803 = vst [vmem:[#allocation30_spill] sm:$0xff] %v4883_v20 }
 0x13d   :  { %1998 = vmatpush2.bf16.msra.mxu0 %v4837_v62  ;;  %2039 = vmatpush2.bf16.msra.mxu1 %v4864_v21 }
 0x13e   :  { %2049 = vmatprep.subr.bf16.mxu0 %v4844_v4  ;;  %2090 = vmatprep.subr.bf16.mxu1 %v4868_v22 }
 0x180   :  { %v1168_v40 = vpop.f32.mrf.mxu0  ;;  %v1209_v43 = vpop.f32.mrf.mxu1 }
 0x181   :  { %v1169_v44 = vadd.f32 %v1168_v40, %v4875_v24  ;;  %v4924_v40 = vld [vmem:[#allocation7 + $0xc] ss:$16 sps:$4 sm:$0xff]  }
 0x182   :  { %v1170_v47 = vpop.f32.mrf.mxu0  ;;  %v1211_v8 = vpop.f32.mrf.mxu1  ;;  %6816 = vst [vmem:[#allocation43_spill] sm:$0xff] %v4924_v40 }
 0x183   :  { %v1210_v0 = vadd.f32 %v1209_v43, %v1169_v44  ;;  %v1171_v6 = vadd.f32 %v1170_v47, %v4879_v27  ;;  %v4927_v43 = vld [vmem:[#allocation7 + $0x8] ss:$16 sps:$4 sm:$0xff]   ;;  %v4930_v44 = vld [vmem:[#allocation7 + $0x1ec] ss:$16 sps:$4 sm:$0xff]  }
 0x184   :  { %v1172_v17 = vpop.f32.mrf.mxu0  ;;  %v1213_v12 = vpop.f32.mrf.mxu1  ;;  %6817 = vst [vmem:[#allocation44_spill] sm:$0xff] %v4927_v43  ;;  %6818 = vst [vmem:[#allocation45_spill] sm:$0xff] %v4930_v44  ;;  %v4933_v47 = vld [vmem:[#allocation7 + $0x1e8] ss:$16 sps:$4 sm:$0xff]  }
 0x185   :  { %v1212_v16 = vadd.f32 %v1211_v8, %v1171_v6  ;;  %v1298_v11 = vmax.f32 %v1210_v0, 0.0  ;;  %v4891_v17 = vld [vmem:[#allocation7 + $0xc8] ss:$16 sps:$4 sm:$0xff]   ;;  %v4894_v0 = vld [vmem:[#allocation7 + $0xac] ss:$16 sps:$4 sm:$0xff]   ;;  %6819 = vst [vmem:[#allocation46_spill] sm:$0xff] %v4933_v47 }
 0x186   :  { %v1173_v22 = vpop.f32.mrf.mxu0  ;;  %v1214_v4 = vpop.f32.mrf.mxu1  ;;  %6805 = vst [vmem:[#allocation32_spill] sm:$0xff] %v4891_v17  ;;  %6806 = vst [vmem:[#allocation33_spill] sm:$0xff] %v4894_v0  ;;  %v4897_v8 = vld [vmem:[#allocation7 + $0xa8] ss:$16 sps:$4 sm:$0xff]   ;;  %v4900_v6 = vld [vmem:[#allocation7 + $0x8c] ss:$16 sps:$4 sm:$0xff]  }
 0x187   :  { %v1299_v21 = vmax.f32 %v1212_v16, 0.0  ;;  %v4885_v61 = vpack.c.bf16 %v1298_v11, %v1298_v11  ;;  %6807 = vst [vmem:[#allocation34_spill] sm:$0xff] %v4897_v8  ;;  %6808 = vst [vmem:[#allocation35_spill] sm:$0xff] %v4900_v6  ;;  %v4903_v11 = vld [vmem:[#allocation7 + $0x88] ss:$16 sps:$4 sm:$0xff]  }
 0x188   :  { %6809 = vst [vmem:[#allocation36_spill] sm:$0xff] %v4903_v11  ;;  %v4906_v12 = vld [vmem:[#allocation7 + $0x6c] ss:$16 sps:$4 sm:$0xff]   ;;  %v4909_v16 = vld [vmem:[#allocation7 + $0x68] ss:$16 sps:$4 sm:$0xff]  }
 0x189   :  { %v1303_v62 = vpack.c.bf16 %v1299_v21, %v1299_v21  ;;  %6810 = vst [vmem:[#allocation37_spill] sm:$0xff] %v4906_v12  ;;  %6811 = vst [vmem:[#allocation38_spill] sm:$0xff] %v4909_v16  ;;  %v4915_v4 = vld [vmem:[#allocation7 + $0x48] ss:$16 sps:$4 sm:$0xff]   ;;  %v4918_v21 = vld [vmem:[#allocation7 + $0x2c] ss:$16 sps:$4 sm:$0xff]  }
 0x18a   :  { %6813 = vst [vmem:[#allocation40_spill] sm:$0xff] %v4915_v4  ;;  %6814 = vst [vmem:[#allocation41_spill] sm:$0xff] %v4918_v21  ;;  %v4921_v22 = vld [vmem:[#allocation7 + $0x28] ss:$16 sps:$4 sm:$0xff]  }
 0x18b   :  { %1999 = vmatprep.mubr.bf16.mxu0 %v1303_v62  ;;  %6815 = vst [vmem:[#allocation42_spill] sm:$0xff] %v4921_v22 }
 0x18c   :  { %2000 = vmatmul.mubr.bf16.vlgmr.msra.gmra.mxu0 %v4885_v61 }
 0x18d   :  { %2050 = vmatpush1.bf16.msra.mxu0 %v4883_v20  ;;  %2081 = vmatprep.mubr.bf16.mxu0 %v1303_v62  ;;  %v4912_v62 = vld [vmem:[#allocation7 + $0x4c] ss:$16 sps:$4 sm:$0xff]  }
 0x18e   :  { %2051 = vmatprep.subr.bf16.mxu0 %v4887_v19  ;;  %6812 = vst [vmem:[#allocation39_spill] sm:$0xff] %v4912_v62  ;;  %v4985_v19 = vld [vmem:[#allocation7 + $0x108] ss:$16 sps:$4 sm:$0xff]  }
 0x18f   :  { %6835 = vst [vmem:[#allocation62_spill] sm:$0xff] %v4985_v19 }
 0x191   :  { %2052 = vmatpush1.bf16.msra.mxu0 %v4891_v17 }
 0x192   :  { %2053 = vmatprep.subr.bf16.mxu0 %v4894_v0 }
 0x195   :  { %2054 = vmatpush1.bf16.msra.mxu0 %v4897_v8 }
 0x196   :  { %2055 = vmatprep.subr.bf16.mxu0 %v4900_v6  ;;  %v4981_v6 = vld [vmem:[#allocation7 + $0x10c] ss:$16 sps:$4 sm:$0xff]  }
 0x197   :  { %6834 = vst [vmem:[#allocation61_spill] sm:$0xff] %v4981_v6 }
 0x199   :  { %2056 = vmatpush1.bf16.msra.mxu0 %v4903_v11 }
 0x19a   :  { %2057 = vmatprep.subr.bf16.mxu0 %v4906_v12 }
 0x19d   :  { %2058 = vmatpush1.bf16.msra.mxu0 %v4909_v16 }
 0x19e   :  { %2059 = vmatprep.subr.bf16.mxu0 %v4912_v62 }
 0x1a1   :  { %2060 = vmatpush1.bf16.msra.mxu0 %v4915_v4  ;;  %v4936_v4 = vld [vmem:[#allocation7 + $0x1cc] ss:$16 sps:$4 sm:$0xff]  }
 0x1a2   :  { %2061 = vmatprep.subr.bf16.mxu0 %v4918_v21  ;;  %6820 = vst [vmem:[#allocation47_spill] sm:$0xff] %v4936_v4  ;;  %v4939_v21 = vld [vmem:[#allocation7 + $0x1c8] ss:$16 sps:$4 sm:$0xff]  }
 0x1a3   :  { %6821 = vst [vmem:[#allocation48_spill] sm:$0xff] %v4939_v21 }
 0x1a5   :  { %2062 = vmatpush1.bf16.msra.mxu0 %v4921_v22  ;;  %v4942_v22 = vld [vmem:[#allocation7 + $0x1ac] ss:$16 sps:$4 sm:$0xff]  }
 0x1a6   :  { %2063 = vmatprep.subr.bf16.mxu0 %v4924_v40  ;;  %6822 = vst [vmem:[#allocation49_spill] sm:$0xff] %v4942_v22  ;;  %v4945_v40 = vld [vmem:[#allocation7 + $0x1a8] ss:$16 sps:$4 sm:$0xff]  }
 0x1a7   :  { %6823 = vst [vmem:[#allocation50_spill] sm:$0xff] %v4945_v40 }
 0x1a9   :  { %2064 = vmatpush1.bf16.msra.mxu0 %v4927_v43  ;;  %v4948_v43 = vld [vmem:[#allocation7 + $0x18c] ss:$16 sps:$4 sm:$0xff]  }
 0x1aa   :  { %2065 = vmatprep.subr.bf16.mxu0 %v4930_v44  ;;  %6824 = vst [vmem:[#allocation51_spill] sm:$0xff] %v4948_v43  ;;  %v4951_v44 = vld [vmem:[#allocation7 + $0x188] ss:$16 sps:$4 sm:$0xff]  }
 0x1ab   :  { %6825 = vst [vmem:[#allocation52_spill] sm:$0xff] %v4951_v44 }
 0x1ad   :  { %2066 = vmatpush2.bf16.msra.mxu0 %v4933_v47  ;;  %v4954_v47 = vld [vmem:[#allocation7 + $0x16c] ss:$16 sps:$4 sm:$0xff]  }
 0x1ae   :  { %2067 = vmatprep.subr.bf16.mxu0 %v4936_v4  ;;  %6826 = vst [vmem:[#allocation53_spill] sm:$0xff] %v4954_v47  ;;  %v4957_v4 = vld [vmem:[#allocation7 + $0x168] ss:$16 sps:$4 sm:$0xff]  }
 0x1af   :  { %6827 = vst [vmem:[#allocation54_spill] sm:$0xff] %v4957_v4 }
 0x1b1   :  { %2068 = vmatpush2.bf16.msra.mxu0 %v4939_v21  ;;  %v4960_v21 = vld [vmem:[#allocation7 + $0x14c] ss:$16 sps:$4 sm:$0xff]  }
 0x1b2   :  { %2069 = vmatprep.subr.bf16.mxu0 %v4942_v22  ;;  %6828 = vst [vmem:[#allocation55_spill] sm:$0xff] %v4960_v21  ;;  %v4965_v22 = vrot.slane %v4871_v23, %v4689_v10 }
 0x1b4   :  { %6829 = vst [vmem:[#allocation56_spill] sm:$0xff] %v4965_v22 }
 0x1b5   :  { %2070 = vmatpush2.bf16.msra.mxu0 %v4945_v40  ;;  %v4967_v40 = vld [vmem:[#allocation7 + $0x148] ss:$16 sps:$4 sm:$0xff]  }
 0x1b6   :  { %2071 = vmatprep.subr.bf16.mxu0 %v4948_v43  ;;  %6830 = vst [vmem:[#allocation57_spill] sm:$0xff] %v4967_v40  ;;  %v4970_v43 = vld [vmem:[#allocation7 + $0x12c] ss:$16 sps:$4 sm:$0xff]  }
 0x1b7   :  { %6831 = vst [vmem:[#allocation58_spill] sm:$0xff] %v4970_v43 }
 0x1b9   :  { %2072 = vmatpush2.bf16.msra.mxu0 %v4951_v44  ;;  %v4974_v44 = vrot.slane %v4871_v23, %v4700_v15 }
 0x1ba   :  { %2073 = vmatprep.subr.bf16.mxu0 %v4954_v47 }
 0x1bb   :  { %6832 = vst [vmem:[#allocation59_spill] sm:$0xff] %v4974_v44 }
 0x1bd   :  { %2074 = vmatpush2.bf16.msra.mxu0 %v4957_v4  ;;  %v4978_v4 = vld [vmem:[#allocation7 + $0x128] ss:$16 sps:$4 sm:$0xff]  }
 0x1be   :  { %2075 = vmatprep.subr.bf16.mxu0 %v4960_v21  ;;  %6833 = vst [vmem:[#allocation60_spill] sm:$0xff] %v4978_v4 }
 0x1c0   :  { %v1250_v62 = vpop.f32.mrf.mxu0  ;;  %v1291_v47 = vpop.f32.mrf.mxu1 }
 0x1c1   :  { %v1251_v16 = vadd.f32 %v1250_v62, %v4965_v22  ;;  %2076 = vmatpush2.bf16.msra.mxu0 %v4967_v40 }
 0x1c2   :  { %v1252_v12 = vpop.f32.mrf.mxu0  ;;  %v1293_v11 = vpop.f32.mrf.mxu1  ;;  %2077 = vmatprep.subr.bf16.mxu0 %v4970_v43  ;;  %v4989_v43 = vld [vmem:[#allocation7 + $0x2e8] ss:$16 sps:$4 sm:$0xff]  }
 0x1c3   :  { %v1292_v21 = vadd.f32 %v1291_v47, %v1251_v16  ;;  %v1253_v8 = vadd.f32 %v1252_v12, %v4974_v44  ;;  %6836 = vst [vmem:[#allocation63_spill] sm:$0xff] %v4989_v43  ;;  %v5009_v12 = vld [vmem:[#allocation4 + $0xc4] ss:$16 sps:$4 sm:$0xff]   ;;  %v5028_v47 = vld [vmem:[#allocation7 + $0x26c] ss:$16 sps:$4 sm:$0xff]  }
 0x1c4   :  { %v1254_v0 = vpop.f32.mrf.mxu0  ;;  %v1295_v23 = vpop.f32.mrf.mxu1  ;;  %6842 = vst [vmem:[#allocation69_spill] sm:$0xff] %v5009_v12  ;;  %6848 = vst [vmem:[#allocation75_spill] sm:$0xff] %v5028_v47 }
 0x1c5   :  { %v1294_v17 = vadd.f32 %v1293_v11, %v1253_v8  ;;  %2078 = vmatpush2.bf16.msra.mxu0 %v4978_v4  ;;  %v1300_v62 = vmax.f32 %v1292_v21, 0.0  ;;  %v4993_v0 = vld [vmem:[#allocation7 + $0x2cc] ss:$16 sps:$4 sm:$0xff]   ;;  %v4995_v8 = vld [vmem:[#allocation4 + $0xe4] ss:$16 sps:$4 sm:$0xff]  }
 0x1c6   :  { %v1255_v40 = vpop.f32.mrf.mxu0  ;;  %v1296_v22 = vpop.f32.mrf.mxu1  ;;  %2079 = vmatprep.subr.bf16.mxu0 %v4981_v6  ;;  %6837 = vst [vmem:[#allocation64_spill] sm:$0xff] %v4993_v0  ;;  %6838 = vst [vmem:[#allocation65_spill] sm:$0xff] %v4995_v8  ;;  %v5006_v11 = vld [vmem:[#allocation4 + $0xe0] ss:$16 sps:$4 sm:$0xff]  }
 0x1c7   :  { %v1301_v20 = vmax.f32 %v1294_v17, 0.0  ;;  %v4991_v16 = vpack.c.bf16 %v1300_v62, %v1300_v62  ;;  %v5004_v17 = vld [vmem:[#allocation7 + $0x2ac] ss:$16 sps:$4 sm:$0xff]   ;;  %6841 = vst [vmem:[#allocation68_spill] sm:$0xff] %v5006_v11  ;;  %v5021_v22 = vld [vmem:[#allocation4 + $0xa4] ss:$16 sps:$4 sm:$0xff]  }
 0x1c8   :  { %6840 = vst [vmem:[#allocation67_spill] sm:$0xff] %v5004_v17  ;;  %v5018_v21 = vld [vmem:[#allocation4 + $0xc0] ss:$16 sps:$4 sm:$0xff]   ;;  %6846 = vst [vmem:[#allocation73_spill] sm:$0xff] %v5021_v22  ;;  %v5025_v40 = vld [vmem:[#allocation7 + $0x288] ss:$16 sps:$4 sm:$0xff]  }
 0x1c9   :  { %v1305_v27 = vpack.c.bf16 %v1301_v20, %v1301_v20  ;;  %2080 = vmatpush2.bf16.msra.mxu0 %v4985_v19  ;;  %v5001_v20 = vld [vmem:[#allocation7 + $0x2c8] ss:$16 sps:$4 sm:$0xff]   ;;  %6845 = vst [vmem:[#allocation72_spill] sm:$0xff] %v5018_v21  ;;  %6847 = vst [vmem:[#allocation74_spill] sm:$0xff] %v5025_v40  ;;  %v5030_v23 = vld [vmem:[#allocation4 + $0xa0] ss:$16 sps:$4 sm:$0xff]  }
 0x1ca   :  { %2274 = vmatprep.subr.bf16.mxu0 %v4995_v8  ;;  %6839 = vst [vmem:[#allocation66_spill] sm:$0xff] %v5001_v20  ;;  %6849 = vst [vmem:[#allocation76_spill] sm:$0xff] %v5030_v23  ;;  %v5033_v62 = vld [vmem:[#allocation4 + $0x84] ss:$16 sps:$4 sm:$0xff]  }
 0x1cb   :  { %2040 = vmatprep.mubr.bf16.mxu1 %v1305_v27  ;;  %6850 = vst [vmem:[#allocation77_spill] sm:$0xff] %v5033_v62 }
 0x1cc   :  { %2041 = vmatmul.mubr.bf16.vlgmr.msra.gmra.mxu1 %v4991_v16  ;;  %2082 = vmatmul.mubr.bf16.vlgmr.msra.gmra.mxu0 %v4885_v61  ;;  %v5013_v61 = vld [vmem:[#allocation7 + $0x2a8] ss:$16 sps:$4 sm:$0xff]  }
 0x1cd   :  { %2091 = vmatpush1.bf16.msra.mxu1 %v4989_v43  ;;  %2122 = vmatprep.mubr.bf16.mxu1 %v1305_v27  ;;  %6843 = vst [vmem:[#allocation70_spill] sm:$0xff] %v5013_v61  ;;  %v5016_v27 = vld [vmem:[#allocation7 + $0x28c] ss:$16 sps:$4 sm:$0xff]  }
 0x1ce   :  { %2092 = vmatprep.subr.bf16.mxu1 %v4993_v0  ;;  %2275 = vmatpush1.bf16.msra.mxu0 %v5006_v11  ;;  %6844 = vst [vmem:[#allocation71_spill] sm:$0xff] %v5016_v27 }
 0x1cf   :  { %2276 = vmatprep.subr.bf16.mxu0 %v5009_v12 }
 0x1d1   :  { %2093 = vmatpush1.bf16.msra.mxu1 %v5001_v20 }
 0x1d2   :  { %2094 = vmatprep.subr.bf16.mxu1 %v5004_v17  ;;  %2277 = vmatpush1.bf16.msra.mxu0 %v5018_v21  ;;  %v5037_v21 = vld [vmem:[#allocation7 + $0x268] ss:$16 sps:$4 sm:$0xff]  }
 0x1d3   :  { %2278 = vmatprep.subr.bf16.mxu0 %v5021_v22  ;;  %6851 = vst [vmem:[#allocation78_spill] sm:$0xff] %v5037_v21  ;;  %v5042_v22 = vld [vmem:[#allocation4 + $0x80] ss:$16 sps:$4 sm:$0xff]  }
 0x1d4   :  { %6853 = vst [vmem:[#allocation80_spill] sm:$0xff] %v5042_v22 }
 0x1d5   :  { %2095 = vmatpush1.bf16.msra.mxu1 %v5013_v61  ;;  %v5040_v61 = vld [vmem:[#allocation7 + $0x24c] ss:$16 sps:$4 sm:$0xff]  }
 0x1d6   :  { %2096 = vmatprep.subr.bf16.mxu1 %v5016_v27  ;;  %2279 = vmatpush1.bf16.msra.mxu0 %v5030_v23  ;;  %6852 = vst [vmem:[#allocation79_spill] sm:$0xff] %v5040_v61  ;;  %v5045_v27 = vld [vmem:[#allocation4 + $0x64] ss:$16 sps:$4 sm:$0xff]   ;;  %v5049_v23 = vld [vmem:[#allocation7 + $0x248] ss:$16 sps:$4 sm:$0xff]  }
 0x1d7   :  { %2280 = vmatprep.subr.bf16.mxu0 %v5033_v62  ;;  %6854 = vst [vmem:[#allocation81_spill] sm:$0xff] %v5045_v27  ;;  %6855 = vst [vmem:[#allocation82_spill] sm:$0xff] %v5049_v23  ;;  %v5054_v62 = vld [vmem:[#allocation4 + $0x60] ss:$16 sps:$4 sm:$0xff]  }
 0x1d8   :  { %6857 = vst [vmem:[#allocation84_spill] sm:$0xff] %v5054_v62 }
 0x1d9   :  { %2097 = vmatpush1.bf16.msra.mxu1 %v5025_v40  ;;  %v5052_v40 = vld [vmem:[#allocation7 + $0x22c] ss:$16 sps:$4 sm:$0xff]  }
 0x1da   :  { %2098 = vmatprep.subr.bf16.mxu1 %v5028_v47  ;;  %2281 = vmatpush1.bf16.msra.mxu0 %v5042_v22  ;;  %6856 = vst [vmem:[#allocation83_spill] sm:$0xff] %v5052_v40  ;;  %v5057_v47 = vld [vmem:[#allocation4 + $0x44] ss:$16 sps:$4 sm:$0xff]   ;;  %v5061_v22 = vld [vmem:[#allocation7 + $0x228] ss:$16 sps:$4 sm:$0xff]  }
 0x1db   :  { %2282 = vmatprep.subr.bf16.mxu0 %v5045_v27  ;;  %6858 = vst [vmem:[#allocation85_spill] sm:$0xff] %v5057_v47  ;;  %6859 = vst [vmem:[#allocation86_spill] sm:$0xff] %v5061_v22  ;;  %v5066_v27 = vld [vmem:[#allocation4 + $0x40] ss:$16 sps:$4 sm:$0xff]  }
 0x1dc   :  { %6861 = vst [vmem:[#allocation88_spill] sm:$0xff] %v5066_v27 }
 0x1dd   :  { %2099 = vmatpush1.bf16.msra.mxu1 %v5037_v21  ;;  %v5064_v21 = vld [vmem:[#allocation7 + $0x20c] ss:$16 sps:$4 sm:$0xff]  }
 0x1de   :  { %2100 = vmatprep.subr.bf16.mxu1 %v5040_v61  ;;  %2283 = vmatpush1.bf16.msra.mxu0 %v5054_v62  ;;  %6860 = vst [vmem:[#allocation87_spill] sm:$0xff] %v5064_v21  ;;  %v5069_v61 = vld [vmem:[#allocation4 + $0x24] ss:$16 sps:$4 sm:$0xff]   ;;  %v5073_v62 = vld [vmem:[#allocation7 + $0x208] ss:$16 sps:$4 sm:$0xff]  }
 0x1df   :  { %2284 = vmatprep.subr.bf16.mxu0 %v5057_v47  ;;  %6862 = vst [vmem:[#allocation89_spill] sm:$0xff] %v5069_v61  ;;  %6863 = vst [vmem:[#allocation90_spill] sm:$0xff] %v5073_v62  ;;  %v5078_v47 = vld [vmem:[#allocation4 + $0x20] ss:$16 sps:$4 sm:$0xff]  }
 0x1e0   :  { %6865 = vst [vmem:[#allocation92_spill] sm:$0xff] %v5078_v47 }
 0x1e1   :  { %2101 = vmatpush1.bf16.msra.mxu1 %v5049_v23  ;;  %v5076_v23 = vld [vmem:[#allocation7 + $0x3ec] ss:$16 sps:$4 sm:$0xff]  }
 0x1e2   :  { %2102 = vmatprep.subr.bf16.mxu1 %v5052_v40  ;;  %2285 = vmatpush1.bf16.msra.mxu0 %v5066_v27  ;;  %6864 = vst [vmem:[#allocation91_spill] sm:$0xff] %v5076_v23  ;;  %v5081_v40 = vld [vmem:[#allocation4 + $0x4] ss:$16 sps:$4 sm:$0xff]   ;;  %v5085_v27 = vld [vmem:[#allocation7 + $0x3e8] ss:$16 sps:$4 sm:$0xff]  }
 0x1e3   :  { %2286 = vmatprep.subr.bf16.mxu0 %v5069_v61  ;;  %6866 = vst [vmem:[#allocation93_spill] sm:$0xff] %v5081_v40  ;;  %6867 = vst [vmem:[#allocation94_spill] sm:$0xff] %v5085_v27  ;;  %v5090_v61 = vld [vmem:[#allocation4] ss:$16 sps:$4 sm:$0xff]  }
 0x1e4   :  { %6869 = vst [vmem:[#allocation96_spill] sm:$0xff] %v5090_v61 }
 0x1e5   :  { %2103 = vmatpush1.bf16.msra.mxu1 %v5061_v22  ;;  %v5088_v22 = vld [vmem:[#allocation7 + $0x3cc] ss:$16 sps:$4 sm:$0xff]  }
 0x1e6   :  { %2104 = vmatprep.subr.bf16.mxu1 %v5064_v21  ;;  %2287 = vmatpush1.bf16.msra.mxu0 %v5078_v47  ;;  %6868 = vst [vmem:[#allocation95_spill] sm:$0xff] %v5088_v22  ;;  %v5093_v21 = vld [vmem:[#allocation4 + $0x1e4] ss:$16 sps:$4 sm:$0xff]   ;;  %v5097_v47 = vld [vmem:[#allocation7 + $0x3c8] ss:$16 sps:$4 sm:$0xff]  }
 0x1e7   :  { %2288 = vmatprep.subr.bf16.mxu0 %v5081_v40  ;;  %6870 = vst [vmem:[#allocation97_spill] sm:$0xff] %v5093_v21  ;;  %6871 = vst [vmem:[#allocation98_spill] sm:$0xff] %v5097_v47  ;;  %v5102_v40 = vld [vmem:[#allocation4 + $0x1e0] ss:$16 sps:$4 sm:$0xff]  }
 0x1e8   :  { %6873 = vst [vmem:[#allocation100_spill] sm:$0xff] %v5102_v40 }
 0x1e9   :  { %2105 = vmatpush1.bf16.msra.mxu1 %v5073_v62  ;;  %v5100_v62 = vld [vmem:[#allocation7 + $0x3ac] ss:$16 sps:$4 sm:$0xff]  }
 0x1ea   :  { %2106 = vmatprep.subr.bf16.mxu1 %v5076_v23  ;;  %2289 = vmatpush1.bf16.msra.mxu0 %v5090_v61  ;;  %6872 = vst [vmem:[#allocation99_spill] sm:$0xff] %v5100_v62  ;;  %v5105_v23 = vld [vmem:[#allocation4 + $0x1c4] ss:$16 sps:$4 sm:$0xff]   ;;  %v5109_v61 = vld [vmem:[#allocation7 + $0x3a8] ss:$16 sps:$4 sm:$0xff]  }
 0x1eb   :  { %2290 = vmatprep.subr.bf16.mxu0 %v5093_v21  ;;  %6874 = vst [vmem:[#allocation101_spill] sm:$0xff] %v5105_v23  ;;  %6875 = vst [vmem:[#allocation102_spill] sm:$0xff] %v5109_v61  ;;  %v5114_v21 = vld [vmem:[#allocation4 + $0x1c0] ss:$16 sps:$4 sm:$0xff]  }
 0x1ec   :  { %6877 = vst [vmem:[#allocation104_spill] sm:$0xff] %v5114_v21 }
 0x1ed   :  { %2107 = vmatpush2.bf16.msra.mxu1 %v5085_v27  ;;  %v5112_v27 = vld [vmem:[#allocation7 + $0x38c] ss:$16 sps:$4 sm:$0xff]  }
 0x1ee   :  { %2108 = vmatprep.subr.bf16.mxu1 %v5088_v22  ;;  %2291 = vmatpush2.bf16.msra.mxu0 %v5102_v40  ;;  %6876 = vst [vmem:[#allocation103_spill] sm:$0xff] %v5112_v27  ;;  %v5117_v22 = vld [vmem:[#allocation4 + $0x1a4] ss:$16 sps:$4 sm:$0xff]   ;;  %v5121_v40 = vld [vmem:[#allocation7 + $0x388] ss:$16 sps:$4 sm:$0xff]  }
 0x1ef   :  { %2292 = vmatprep.subr.bf16.mxu0 %v5105_v23  ;;  %6878 = vst [vmem:[#allocation105_spill] sm:$0xff] %v5117_v22  ;;  %6879 = vst [vmem:[#allocation106_spill] sm:$0xff] %v5121_v40  ;;  %v5126_v23 = vld [vmem:[#allocation4 + $0x1a0] ss:$16 sps:$4 sm:$0xff]  }
 0x1f0   :  { %6881 = vst [vmem:[#allocation108_spill] sm:$0xff] %v5126_v23 }
 0x1f1   :  { %2109 = vmatpush2.bf16.msra.mxu1 %v5097_v47  ;;  %v5124_v47 = vld [vmem:[#allocation7 + $0x36c] ss:$16 sps:$4 sm:$0xff]  }
 0x1f2   :  { %2110 = vmatprep.subr.bf16.mxu1 %v5100_v62  ;;  %2293 = vmatpush2.bf16.msra.mxu0 %v5114_v21  ;;  %6880 = vst [vmem:[#allocation107_spill] sm:$0xff] %v5124_v47  ;;  %v5129_v62 = vld [vmem:[#allocation4 + $0x184] ss:$16 sps:$4 sm:$0xff]   ;;  %v5133_v21 = vld [vmem:[#allocation7 + $0x368] ss:$16 sps:$4 sm:$0xff]  }
 0x1f3   :  { %2294 = vmatprep.subr.bf16.mxu0 %v5117_v22  ;;  %6882 = vst [vmem:[#allocation109_spill] sm:$0xff] %v5129_v62  ;;  %6883 = vst [vmem:[#allocation110_spill] sm:$0xff] %v5133_v21  ;;  %v5138_v22 = vld [vmem:[#allocation4 + $0x180] ss:$16 sps:$4 sm:$0xff]  }
 0x1f4   :  { %6885 = vst [vmem:[#allocation112_spill] sm:$0xff] %v5138_v22 }
 0x1f5   :  { %2111 = vmatpush2.bf16.msra.mxu1 %v5109_v61  ;;  %v5136_v61 = vld [vmem:[#allocation7 + $0x34c] ss:$16 sps:$4 sm:$0xff]  }
 0x1f6   :  { %2112 = vmatprep.subr.bf16.mxu1 %v5112_v27  ;;  %2295 = vmatpush2.bf16.msra.mxu0 %v5126_v23  ;;  %6884 = vst [vmem:[#allocation111_spill] sm:$0xff] %v5136_v61  ;;  %v5141_v27 = vld [vmem:[#allocation4 + $0x164] ss:$16 sps:$4 sm:$0xff]   ;;  %v5145_v23 = vld [vmem:[#allocation7 + $0x348] ss:$16 sps:$4 sm:$0xff]  }
 0x1f7   :  { %2296 = vmatprep.subr.bf16.mxu0 %v5129_v62  ;;  %6886 = vst [vmem:[#allocation113_spill] sm:$0xff] %v5141_v27  ;;  %6887 = vst [vmem:[#allocation114_spill] sm:$0xff] %v5145_v23  ;;  %v5150_v62 = vld [vmem:[#allocation4 + $0x160] ss:$16 sps:$4 sm:$0xff]  }
 0x1f8   :  { %6889 = vst [vmem:[#allocation116_spill] sm:$0xff] %v5150_v62 }
 0x1f9   :  { %2113 = vmatpush2.bf16.msra.mxu1 %v5121_v40  ;;  %v5148_v40 = vld [vmem:[#allocation7 + $0x32c] ss:$16 sps:$4 sm:$0xff]  }
 0x1fa   :  { %2114 = vmatprep.subr.bf16.mxu1 %v5124_v47  ;;  %2297 = vmatpush2.bf16.msra.mxu0 %v5138_v22  ;;  %6888 = vst [vmem:[#allocation115_spill] sm:$0xff] %v5148_v40  ;;  %v5153_v47 = vld [vmem:[#allocation4 + $0x144] ss:$16 sps:$4 sm:$0xff]   ;;  %v5157_v22 = vld [vmem:[#allocation7 + $0x328] ss:$16 sps:$4 sm:$0xff]  }
 0x1fb   :  { %2298 = vmatprep.subr.bf16.mxu0 %v5141_v27  ;;  %6890 = vst [vmem:[#allocation117_spill] sm:$0xff] %v5153_v47  ;;  %6891 = vst [vmem:[#allocation118_spill] sm:$0xff] %v5157_v22  ;;  %v5162_v27 = vld [vmem:[#allocation4 + $0x140] ss:$16 sps:$4 sm:$0xff]  }
 0x1fc   :  { %6893 = vst [vmem:[#allocation120_spill] sm:$0xff] %v5162_v27 }
 0x1fd   :  { %2115 = vmatpush2.bf16.msra.mxu1 %v5133_v21  ;;  %v5160_v21 = vld [vmem:[#allocation7 + $0x30c] ss:$16 sps:$4 sm:$0xff]  }
 0x1fe   :  { %2116 = vmatprep.subr.bf16.mxu1 %v5136_v61  ;;  %2299 = vmatpush2.bf16.msra.mxu0 %v5150_v62  ;;  %6892 = vst [vmem:[#allocation119_spill] sm:$0xff] %v5160_v21  ;;  %v5165_v61 = vld [vmem:[#allocation4 + $0x124] ss:$16 sps:$4 sm:$0xff]   ;;  %v5169_v62 = vld [vmem:[#allocation7 + $0x308] ss:$16 sps:$4 sm:$0xff]  }
 0x1ff   :  { %2300 = vmatprep.subr.bf16.mxu0 %v5153_v47  ;;  %6894 = vst [vmem:[#allocation121_spill] sm:$0xff] %v5165_v61  ;;  %6895 = vst [vmem:[#allocation122_spill] sm:$0xff] %v5169_v62 }
 0x201   :  { %2117 = vmatpush2.bf16.msra.mxu1 %v5145_v23  ;;  %v5172_v23 = vld [vmem:[#allocation4 + $0x120] ss:$16 sps:$4 sm:$0xff]  }
 0x202   :  { %2118 = vmatprep.subr.bf16.mxu1 %v5148_v40  ;;  %2301 = vmatpush2.bf16.msra.mxu0 %v5162_v27  ;;  %6896 = vst [vmem:[#allocation123_spill] sm:$0xff] %v5172_v23  ;;  %v5175_v40 = vld [vmem:[#allocation4 + $0x104] ss:$16 sps:$4 sm:$0xff]  }
 0x203   :  { %2302 = vmatprep.subr.bf16.mxu0 %v5165_v61  ;;  %6897 = vst [vmem:[#allocation124_spill] sm:$0xff] %v5175_v40  ;;  %v5179_v27 = vld [vmem:[#allocation4 + $0x2e4] ss:$16 sps:$4 sm:$0xff]   ;;  %v5182_v61 = vld [vmem:[#allocation4 + $0x100] ss:$16 sps:$4 sm:$0xff]  }
 0x204   :  { %6898 = vst [vmem:[#allocation125_spill] sm:$0xff] %v5179_v27  ;;  %6899 = vst [vmem:[#allocation126_spill] sm:$0xff] %v5182_v61 }
 0x205   :  { %2119 = vmatpush2.bf16.msra.mxu1 %v5157_v22  ;;  %v5185_v22 = vld [vmem:[#allocation4 + $0xec] ss:$16 sps:$4 sm:$0xff]  }
 0x206   :  { %2120 = vmatprep.subr.bf16.mxu1 %v5160_v21  ;;  %2303 = vmatpush2.bf16.msra.mxu0 %v5172_v23  ;;  %6900 = vst [vmem:[#allocation127_spill] sm:$0xff] %v5185_v22  ;;  %v5189_v23 = vld [vmem:[#allocation4 + $0x2e0] ss:$16 sps:$4 sm:$0xff]  }
 0x207   :  { %2304 = vmatprep.subr.bf16.mxu0 %v5175_v40  ;;  %6901 = vst [vmem:[#allocation128_spill] sm:$0xff] %v5189_v23  ;;  %v5192_v40 = vld [vmem:[#allocation4 + $0x2c4] ss:$16 sps:$4 sm:$0xff]  }
 0x208   :  { %6902 = vst [vmem:[#allocation129_spill] sm:$0xff] %v5192_v40 }
 0x209   :  { %2121 = vmatpush2.bf16.msra.mxu1 %v5169_v62  ;;  %v5195_v62 = vld [vmem:[#allocation4 + $0x2c0] ss:$16 sps:$4 sm:$0xff]  }
 0x20a   :  { %2315 = vmatprep.subr.bf16.mxu1 %v5179_v27  ;;  %2305 = vmatpush2.bf16.msra.mxu0 %v5182_v61  ;;  %6903 = vst [vmem:[#allocation130_spill] sm:$0xff] %v5195_v62  ;;  %v5198_v27 = vld [vmem:[#allocation4 + $0x2a4] ss:$16 sps:$4 sm:$0xff]   ;;  %v5201_v61 = vld [vmem:[#allocation4 + $0x2a0] ss:$16 sps:$4 sm:$0xff]  }
 0x20b   :  { %2356 = vmatprep.subr.bf16.mxu0 %v5185_v22  ;;  %6904 = vst [vmem:[#allocation131_spill] sm:$0xff] %v5198_v27  ;;  %6905 = vst [vmem:[#allocation132_spill] sm:$0xff] %v5201_v61 }
 0x20c   :  { %2123 = vmatmul.mubr.bf16.vlgmr.msra.gmra.mxu1 %v4991_v16  ;;  %v5204_v16 = vld [vmem:[#allocation4 + $0x284] ss:$16 sps:$4 sm:$0xff]  }
 0x20d   :  { %2316 = vmatpush1.bf16.msra.mxu1 %v5189_v23  ;;  %6906 = vst [vmem:[#allocation133_spill] sm:$0xff] %v5204_v16  ;;  %v5207_v23 = vld [vmem:[#allocation4 + $0x280] ss:$16 sps:$4 sm:$0xff]  }
 0x20e   :  { %2317 = vmatprep.subr.bf16.mxu1 %v5192_v40  ;;  %6907 = vst [vmem:[#allocation134_spill] sm:$0xff] %v5207_v23  ;;  %v5210_v40 = vld [vmem:[#allocation4 + $0x264] ss:$16 sps:$4 sm:$0xff]  }
 0x20f   :  { %6908 = vst [vmem:[#allocation135_spill] sm:$0xff] %v5210_v40 }
 0x211   :  { %2318 = vmatpush1.bf16.msra.mxu1 %v5195_v62  ;;  %v5213_v62 = vld [vmem:[#allocation4 + $0x260] ss:$16 sps:$4 sm:$0xff]  }
 0x212   :  { %2319 = vmatprep.subr.bf16.mxu1 %v5198_v27  ;;  %6909 = vst [vmem:[#allocation136_spill] sm:$0xff] %v5213_v62  ;;  %v5216_v27 = vld [vmem:[#allocation4 + $0x244] ss:$16 sps:$4 sm:$0xff]  }
 0x213   :  { %6910 = vst [vmem:[#allocation137_spill] sm:$0xff] %v5216_v27 }
 0x215   :  { %2320 = vmatpush1.bf16.msra.mxu1 %v5201_v61  ;;  %v5219_v61 = vld [vmem:[#allocation4 + $0x240] ss:$16 sps:$4 sm:$0xff]  }
 0x216   :  { %2321 = vmatprep.subr.bf16.mxu1 %v5204_v16  ;;  %6911 = vst [vmem:[#allocation138_spill] sm:$0xff] %v5219_v61  ;;  %v5222_v16 = vld [vmem:[#allocation4 + $0x224] ss:$16 sps:$4 sm:$0xff]  }
 0x217   :  { %6912 = vst [vmem:[#allocation139_spill] sm:$0xff] %v5222_v16 }
 0x219   :  { %2322 = vmatpush1.bf16.msra.mxu1 %v5207_v23  ;;  %v5225_v23 = vld [vmem:[#allocation4 + $0x220] ss:$16 sps:$4 sm:$0xff]  }
 0x21a   :  { %2323 = vmatprep.subr.bf16.mxu1 %v5210_v40  ;;  %6913 = vst [vmem:[#allocation140_spill] sm:$0xff] %v5225_v23  ;;  %v5228_v40 = vld [vmem:[#allocation4 + $0x204] ss:$16 sps:$4 sm:$0xff]  }
 0x21b   :  { %6914 = vst [vmem:[#allocation141_spill] sm:$0xff] %v5228_v40 }
 0x21d   :  { %2324 = vmatpush1.bf16.msra.mxu1 %v5213_v62  ;;  %v5231_v62 = vld [vmem:[#allocation4 + $0x200] ss:$16 sps:$4 sm:$0xff]  }
 0x21e   :  { %2325 = vmatprep.subr.bf16.mxu1 %v5216_v27  ;;  %6915 = vst [vmem:[#allocation142_spill] sm:$0xff] %v5231_v62  ;;  %v5234_v27 = vld [vmem:[#allocation4 + $0x3e4] ss:$16 sps:$4 sm:$0xff]  }
 0x21f   :  { %6916 = vst [vmem:[#allocation143_spill] sm:$0xff] %v5234_v27 }
 0x221   :  { %2326 = vmatpush1.bf16.msra.mxu1 %v5219_v61  ;;  %v5237_v61 = vld [vmem:[#allocation4 + $0x3e0] ss:$16 sps:$4 sm:$0xff]  }
 0x222   :  { %2327 = vmatprep.subr.bf16.mxu1 %v5222_v16  ;;  %6917 = vst [vmem:[#allocation144_spill] sm:$0xff] %v5237_v61  ;;  %v5240_v16 = vld [vmem:[#allocation4 + $0x3c4] ss:$16 sps:$4 sm:$0xff]  }
 0x223   :  { %6918 = vst [vmem:[#allocation145_spill] sm:$0xff] %v5240_v16 }
 0x225   :  { %2328 = vmatpush1.bf16.msra.mxu1 %v5225_v23  ;;  %v5243_v23 = vld [vmem:[#allocation4 + $0x3c0] ss:$16 sps:$4 sm:$0xff]  }
 0x226   :  { %2329 = vmatprep.subr.bf16.mxu1 %v5228_v40  ;;  %6919 = vst [vmem:[#allocation146_spill] sm:$0xff] %v5243_v23  ;;  %v5246_v40 = vld [vmem:[#allocation4 + $0x3a4] ss:$16 sps:$4 sm:$0xff]  }
 0x227   :  { %6920 = vst [vmem:[#allocation147_spill] sm:$0xff] %v5246_v40 }
 0x229   :  { %2330 = vmatpush1.bf16.msra.mxu1 %v5231_v62  ;;  %v5249_v62 = vld [vmem:[#allocation4 + $0x3a0] ss:$16 sps:$4 sm:$0xff]  }
 0x22a   :  { %2331 = vmatprep.subr.bf16.mxu1 %v5234_v27  ;;  %6921 = vst [vmem:[#allocation148_spill] sm:$0xff] %v5249_v62  ;;  %v5252_v27 = vld [vmem:[#allocation4 + $0x384] ss:$16 sps:$4 sm:$0xff]  }
 0x22b   :  { %6922 = vst [vmem:[#allocation149_spill] sm:$0xff] %v5252_v27 }
 0x22d   :  { %2332 = vmatpush2.bf16.msra.mxu1 %v5237_v61  ;;  %v5255_v61 = vld [vmem:[#allocation4 + $0x380] ss:$16 sps:$4 sm:$0xff]  }
 0x22e   :  { %2333 = vmatprep.subr.bf16.mxu1 %v5240_v16  ;;  %6923 = vst [vmem:[#allocation150_spill] sm:$0xff] %v5255_v61  ;;  %v5258_v16 = vld [vmem:[#allocation4 + $0x364] ss:$16 sps:$4 sm:$0xff]  }
 0x22f   :  { %6924 = vst [vmem:[#allocation151_spill] sm:$0xff] %v5258_v16 }
 0x231   :  { %2334 = vmatpush2.bf16.msra.mxu1 %v5243_v23  ;;  %v5261_v23 = vld [vmem:[#allocation4 + $0x360] ss:$16 sps:$4 sm:$0xff]  }
 0x232   :  { %2335 = vmatprep.subr.bf16.mxu1 %v5246_v40  ;;  %6925 = vst [vmem:[#allocation152_spill] sm:$0xff] %v5261_v23  ;;  %v5264_v40 = vld [vmem:[#allocation4 + $0x344] ss:$16 sps:$4 sm:$0xff]  }
 0x233   :  { %6926 = vst [vmem:[#allocation153_spill] sm:$0xff] %v5264_v40 }
 0x235   :  { %2336 = vmatpush2.bf16.msra.mxu1 %v5249_v62  ;;  %v5267_v62 = vld [vmem:[#allocation4 + $0x340] ss:$16 sps:$4 sm:$0xff]  }
 0x236   :  { %2337 = vmatprep.subr.bf16.mxu1 %v5252_v27  ;;  %6927 = vst [vmem:[#allocation154_spill] sm:$0xff] %v5267_v62  ;;  %v5270_v27 = vld [vmem:[#allocation4 + $0x324] ss:$16 sps:$4 sm:$0xff]  }
 0x237   :  { %6928 = vst [vmem:[#allocation155_spill] sm:$0xff] %v5270_v27 }
 0x239   :  { %2338 = vmatpush2.bf16.msra.mxu1 %v5255_v61  ;;  %v5273_v61 = vld [vmem:[#allocation4 + $0x320] ss:$16 sps:$4 sm:$0xff]  }
 0x23a   :  { %2339 = vmatprep.subr.bf16.mxu1 %v5258_v16  ;;  %6929 = vst [vmem:[#allocation156_spill] sm:$0xff] %v5273_v61  ;;  %v5276_v16 = vld [vmem:[#allocation4 + $0x304] ss:$16 sps:$4 sm:$0xff]  }
 0x23b   :  { %6930 = vst [vmem:[#allocation157_spill] sm:$0xff] %v5276_v16 }
 0x23d   :  { %2340 = vmatpush2.bf16.msra.mxu1 %v5261_v23  ;;  %v5279_v23 = vld [vmem:[#allocation4 + $0x300] ss:$16 sps:$4 sm:$0xff]  }
 0x23e   :  { %2341 = vmatprep.subr.bf16.mxu1 %v5264_v40  ;;  %6931 = vst [vmem:[#allocation158_spill] sm:$0xff] %v5279_v23  ;;  %v5282_v40 = vld [vmem:[#allocation4 + $0x2ec] ss:$16 sps:$4 sm:$0xff]  }
 0x23f   :  { %6932 = vst [vmem:[#allocation159_spill] sm:$0xff] %v5282_v40 }
 0x241   :  { %2342 = vmatpush2.bf16.msra.mxu1 %v5267_v62 }
 0x242   :  { %2343 = vmatprep.subr.bf16.mxu1 %v5270_v27 }
 0x245   :  { %2344 = vmatpush2.bf16.msra.mxu1 %v5273_v61  ;;  %v343_v61 = vld [vmem:[%s6457_s6] sm:$0xf] }
 0x246   :  { %2345 = vmatprep.subr.bf16.mxu1 %v5276_v16  ;;  %v5289_v47 = vrot.slane %v343_v61, %v4686_v9  ;;  %v344_v16 = vld [vmem:[%s6458_s7] sm:$0xff] }
 0x247   :  { %v2184_v17 = vrot.slane %v344_v16, %v4694_v13  ;;  %v2188_v20 = vrot.slane %v344_v16, %v4700_v15 }
 0x248   :  { %6933 = vst [vmem:[#allocation160_spill] sm:$0xff] %v5289_v47 }
 0x249   :  { %2346 = vmatpush2.bf16.msra.mxu1 %v5279_v23  ;;  %v5295_v23 = vrot.slane %v343_v61, %v4694_v13  ;;  %v5307_v19 = vrot.slane %v2184_v17, %v4694_v13 }
 0x24a   :  { %2397 = vmatprep.subr.bf16.mxu1 %v5282_v40  ;;  %v2139_v40 = vrot.slane %v344_v16, %v4686_v9 }
 0x24b   :  { %6934 = vst [vmem:[#allocation161_spill] sm:$0xff] %v5295_v23 }
 0x24c   :  { %v2001_v62 = vpop.f32.mrf.mxu0  ;;  %v5304_v8 = vrot.slane %v2139_v40, %v4686_v9 }
 0x24e   :  { %v2003_v22 = vpop.f32.mrf.mxu0 }
 0x24f   :  { %v2004_v0 = vadd.f32 %v2003_v22, %v5295_v23 }
 0x250   :  { %v2005_v21 = vpop.f32.mrf.mxu0 }
 0x251   :  { %v2143_v21 = vrot.slane %v344_v16, %v4689_v10 }
 0x252   :  { %v2006_v27 = vpop.f32.mrf.mxu0 }
 0x253   :  { %v2002_v27 = vadd.f32 %v2001_v62, %v5289_v47  ;;  %v5310_v62 = vrot.slane %v2143_v21, %v4686_v9  ;;  %v5313_v47 = vrot.slane %v2188_v20, %v4694_v13  ;;  %v5320_v21 = vrot.slane %v343_v61, %v4689_v10 }
 0x254   :  { %v6938_v20 = vsub.s32 4, %v4683_v7 }
 0x255   :  { %6935 = vst [vmem:[#allocation162_spill] sm:$0xff] %v5310_v62  ;;  %6936 = vst [vmem:[#allocation163_spill] sm:$0xff] %v5313_v47 }
 0x256   :  { %6937 = vst [vmem:[#allocation164_spill] sm:$0xff] %v5320_v21 }
 0x28c   :  { %v2042_v12 = vpop.f32.mrf.mxu1  ;;  %v2083_v11 = vpop.f32.mrf.mxu0 }
 0x28d   :  { %v2043_v43 = vadd.f32 %v2042_v12, %v2002_v27 }
 0x28e   :  { %v2044_v6 = vpop.f32.mrf.mxu1  ;;  %v2085_v4 = vpop.f32.mrf.mxu0 }
 0x28f   :  { %v2131_v44 = vmax.f32 %v2043_v43, 0.0  ;;  %v2045_v24 = vadd.f32 %v2044_v6, %v2004_v0 }
 0x290   :  { %v2046_v1 = vpop.f32.mrf.mxu1  ;;  %v2087_v18 = vpop.f32.mrf.mxu0 }
 0x291   :  { %v2132_v22 = vmax.f32 %v2045_v24, 0.0  ;;  %v2172_v40 = vmul.f32 %v5304_v8, %v2131_v44  ;;  %v2217_v17 = vmul.f32 %v5307_v19, %v2131_v44  ;;  %v2147_v1 = vrot.slane %v344_v16, %v6938_v20 }
 0x292   :  { %v2047_v12 = vpop.f32.mrf.mxu1  ;;  %v2088_v27 = vpop.f32.mrf.mxu0  ;;  %v5325_v18 = vrot.slane %v343_v61, %v4700_v15  ;;  %v6939_v24 = vsub.s32 5, %v4683_v7  ;;  %v2084_v44 = vadd.f32 %v2083_v11, %v5320_v21  ;;  %v6941_v15 = vsub.s32 7, %v4683_v7 }
 0x293   :  { %v2173_v23 = vmul.f32 %v5310_v62, %v2132_v22  ;;  %v2218_v43 = vmul.f32 %v5313_v47, %v2132_v22  ;;  %v6940_v27 = vsub.s32 6, %v4683_v7 }
 0x294   :  { %v2192_v12 = vrot.slane %v344_v16, %v6939_v24  ;;  %v2086_v10 = vadd.f32 %v2085_v4, %v5325_v18  ;;  %v2196_v61 = vrot.slane %v344_v16, %v6941_v15 }
 0x295   :  { %v2221_v6 = vadd.f32 %v2218_v43, %v2217_v17  ;;  %v2176_v0 = vadd.f32 %v2173_v23, %v2172_v40  ;;  %v2151_v62 = vrot.slane %v344_v16, %v6940_v27  ;;  %v5333_v23 = vrot.slane %v2147_v1, %v4686_v9 }
 0x296   :  { %v5337_v17 = vrot.slane %v2192_v12, %v4694_v13  ;;  %v5347_v4 = vrot.slane %v2196_v61, %v4694_v13  ;;  %v5358_v13 = vld [vmem:[%s6459_s8] ss:$0 sm:$0xff] }
 0x297   :  { %v5342_v11 = vrot.slane %v2151_v62, %v4686_v9  ;;  %v6944_v62 = vlaneseq }
 0x298   :  { %6943 = vst [vmem:[#allocation166_spill] sm:$0xff] %v5347_v4 }
 0x299   :  { %6942 = vst [vmem:[#allocation165_spill] sm:$0xff] %v5342_v11 }
 0x2cc   :  { %v2124_v22 = vpop.f32.mrf.mxu1 }
 0x2cd   :  { %v2125_v40 = vadd.f32 %v2124_v22, %v2084_v44 }
 0x2ce   :  { %v2126_v43 = vpop.f32.mrf.mxu1 }
 0x2cf   :  { %v2133_v20 = vmax.f32 %v2125_v40, 0.0  ;;  %v2127_v24 = vadd.f32 %v2126_v43, %v2086_v10  ;;  %v5352_v40 = vand.u32 127, %v6944_v62 }
 0x2d0   :  { %v2128_v27 = vpop.f32.mrf.mxu1 }
 0x2d1   :  { %v2174_v21 = vmul.f32 %v5333_v23, %v2133_v20  ;;  %v2219_v1 = vmul.f32 %v5337_v17, %v2133_v20  ;;  %v2134_v47 = vmax.f32 %v2127_v24, 0.0  ;;  %6945 = vst [vmem:[#allocation167_spill] sm:$0xff] %v5352_v40  ;;  %vm2228_vm0 = vcmp.eq.s32.totalorder %v5352_v40, 0 }
 0x2d2   :  { %v2129_v12 = vpop.f32.mrf.mxu1  ;;  %v6947_v20 = vmov 0   ;;  %v6948_v24 = vmov 1  }
 0x2d3   :  { %v2175_v44 = vmul.f32 %v5342_v11, %v2134_v47  ;;  %v2177_v7 = vadd.f32 %v2176_v0, %v2174_v21  ;;  %v2220_v16 = vmul.f32 %v5347_v4, %v2134_v47  ;;  %v2222_v10 = vadd.f32 %v2221_v6, %v2219_v1  ;;  %v5369_v21 = vld [vmem:[%s6451_s0] sm:$0xff] }
 0x2d5   :  { %v2178_v22 = vadd.f32 %v2177_v7, %v2175_v44  ;;  %v2223_v9 = vadd.f32 %v2222_v10, %v2220_v16 }
 0x2d7   :  { %2179 = vadd.xlane.f32.xlu1 %v2178_v22 }
 0x2db   :  { %2224 = vadd.xlane.f32.xlu1 %v2223_v9 }
 0x360   :  { %v2180_v15 = vpop.xlane.xlu1 %2179 }
 0x364   :  { %v2225_v61 = vpop.xlane.xlu1 %2224 }
 0x365   :  { %v2231_v47 = vsel %vm2228_vm0, %v2180_v15, %v2225_v61 }
 0x366   :  { %v5363_v6 = vadd.f32 %v5358_v13, %v2231_v47 }
 0x368   :  { %6946 = vst [vmem:[#allocation168_spill] sm:$0xff] %v5363_v6  ;;  %v2239_v0 = vmul.f32 0.5, %v5363_v6 }
 0x36a   :  { %v2240_v43 = vadd.f32 %v5369_v21, %v2239_v0 }
 0x36c   :  { %2251 = vperm.xlu0 %3704, %v2240_v43   ;;  %2243 = vperm.xlu1 %3705, %v2240_v43  }
 0x370   :  { %3706 = vset.pattern.permute.xlu0 %v6947_v20  ;;  %3707 = vset.pattern.permute.xlu1 %v6948_v24 }
 0x3e7   :  { %v2252_v27 = vpop.permute.xlu0 %2251  ;;  %v2244_v1 = vpop.permute.xlu1 %2243 }
 0x3e8   :  { %v2254_v12 = vmul.f32 %v2252_v27, %v4729_v32  ;;  %v2255_v44 = vmul.f32 %v2252_v27, %v4732_v33  ;;  %v2256_v7 = vmul.f32 %v2252_v27, %v4735_v34  ;;  %v2257_v16 = vmul.f32 %v2252_v27, %v4738_v35 }
 0x3e9   :  { %v2246_v22 = vmul.f32 %v2244_v1, %v4717_v28  ;;  %v2247_v10 = vmul.f32 %v2244_v1, %v4720_v29  ;;  %v2248_v9 = vmul.f32 %v2244_v1, %v4723_v30  ;;  %v2249_v62 = vmul.f32 %v2244_v1, %v4726_v31 }
 0x3eb   :  { %v2258_v15 = vadd.f32 %v2254_v12, %v2246_v22  ;;  %v2260_v61 = vadd.f32 %v2256_v7, %v2248_v9  ;;  %v2259_v47 = vadd.f32 %v2255_v44, %v2247_v10  ;;  %v2261_v0 = vadd.f32 %v2257_v16, %v2249_v62  ;;  %v5392_v12 = vld [vmem:[#allocation4 + $0xe8] ss:$16 sps:$4 sm:$0xff]   ;;  %v5422_v7 = vld [vmem:[#allocation4 + $0x8c] ss:$16 sps:$4 sm:$0xff]  }
 0x3ec   :  { %v5395_v44 = vld [vmem:[#allocation4 + $0x2e8] ss:$16 sps:$4 sm:$0xff]   ;;  %v5425_v16 = vld [vmem:[#allocation4 + $0x28c] ss:$16 sps:$4 sm:$0xff]  }
 0x3ed   :  { %v2263_v43 = vadd.f32 %v2259_v47, %v4741_v36  ;;  %v2265_v6 = vadd.f32 %v2261_v0, %v4744_v37  ;;  %v2262_v34 = vadd.f32 %v2258_v15, %v4747_v38  ;;  %v2264_v27 = vadd.f32 %v2260_v61, %v4750_v39  ;;  %v5428_v22 = vld [vmem:[#allocation4 + $0x88] ss:$16 sps:$4 sm:$0xff]   ;;  %v5434_v9 = vld [vmem:[#allocation4 + $0x6c] ss:$16 sps:$4 sm:$0xff]  }
 0x3ee   :  { %v5431_v10 = vld [vmem:[#allocation4 + $0x288] ss:$16 sps:$4 sm:$0xff]   ;;  %v5437_v62 = vld [vmem:[#allocation4 + $0x26c] ss:$16 sps:$4 sm:$0xff]  }
 0x3ef   :  { %v2267_v35 = vmax.f32 %v2263_v43, 0.0  ;;  %v2269_v28 = vmax.f32 %v2265_v6, 0.0  ;;  %v2266_v33 = vmax.f32 %v2262_v34, 0.0  ;;  %v2268_v29 = vmax.f32 %v2264_v27, 0.0  ;;  %v5407_v34 = vld [vmem:[#allocation4 + $0x2c8] ss:$16 sps:$4 sm:$0xff]  }
 0x3f0   :  { %v5419_v6 = vld [vmem:[#allocation4 + $0x2a8] ss:$16 sps:$4 sm:$0xff]   ;;  %v5446_v47 = vld [vmem:[#allocation4 + $0x4c] ss:$16 sps:$4 sm:$0xff]  }
 0x3f1   :  { %v2271_v32 = vpack.c.bf16 %v2267_v35, %v2267_v35  ;;  %v2273_v30 = vpack.c.bf16 %v2269_v28, %v2269_v28  ;;  %v5386_v24 = vpack.c.bf16 %v2266_v33, %v2266_v33  ;;  %v5388_v1 = vpack.c.bf16 %v2268_v29, %v2268_v29  ;;  %v5398_v28 = vld [vmem:[#allocation4 + $0xcc] ss:$16 sps:$4 sm:$0xff]   ;;  %v5404_v33 = vld [vmem:[#allocation4 + $0xc8] ss:$16 sps:$4 sm:$0xff]   ;;  %6951 = vst [vmem:[#allocation171_spill] sm:$0xff] %v5446_v47 }
 0x3f2   :  { %v5401_v29 = vld [vmem:[#allocation4 + $0x2cc] ss:$16 sps:$4 sm:$0xff]   ;;  %v5440_v15 = vld [vmem:[#allocation4 + $0x68] ss:$16 sps:$4 sm:$0xff]  }
 0x3f3   :  { %2306 = vmatprep.mubr.bf16.mxu0 %v2271_v32  ;;  %2347 = vmatprep.mubr.bf16.mxu1 %v2273_v30  ;;  %v5410_v35 = vld [vmem:[#allocation4 + $0xac] ss:$16 sps:$4 sm:$0xff]   ;;  %6949 = vst [vmem:[#allocation169_spill] sm:$0xff] %v5440_v15  ;;  %v5443_v61 = vld [vmem:[#allocation4 + $0x268] ss:$16 sps:$4 sm:$0xff]  }
 0x3f4   :  { %2307 = vmatmul.mubr.bf16.vlgmr.msra.gmra.mxu0 %v5386_v24  ;;  %2348 = vmatmul.mubr.bf16.vlgmr.msra.gmra.mxu1 %v5388_v1  ;;  %6950 = vst [vmem:[#allocation170_spill] sm:$0xff] %v5443_v61  ;;  %v5449_v0 = vld [vmem:[#allocation4 + $0x24c] ss:$16 sps:$4 sm:$0xff]   ;;  %v5452_v43 = vld [vmem:[#allocation4 + $0x48] ss:$16 sps:$4 sm:$0xff]  }
 0x3f5   :  { %2357 = vmatpush1.bf16.msra.mxu0 %v5392_v12  ;;  %2398 = vmatpush1.bf16.msra.mxu1 %v5395_v44  ;;  %6952 = vst [vmem:[#allocation172_spill] sm:$0xff] %v5449_v0  ;;  %6953 = vst [vmem:[#allocation173_spill] sm:$0xff] %v5452_v43  ;;  %v5455_v27 = vld [vmem:[#allocation4 + $0x248] ss:$16 sps:$4 sm:$0xff]  }
 0x3f6   :  { %2388 = vmatprep.mubr.bf16.mxu0 %v2271_v32  ;;  %2429 = vmatprep.mubr.bf16.mxu1 %v2273_v30  ;;  %v5413_v30 = vld [vmem:[#allocation4 + $0x2ac] ss:$16 sps:$4 sm:$0xff]   ;;  %v5416_v32 = vld [vmem:[#allocation4 + $0xa8] ss:$16 sps:$4 sm:$0xff]   ;;  %6954 = vst [vmem:[#allocation174_spill] sm:$0xff] %v5455_v27 }
 0x3f7   :  { %2358 = vmatprep.subr.bf16.mxu0 %v5398_v28  ;;  %2399 = vmatprep.subr.bf16.mxu1 %v5401_v29 }
 0x3f9   :  { %2359 = vmatpush1.bf16.msra.mxu0 %v5404_v33  ;;  %2400 = vmatpush1.bf16.msra.mxu1 %v5407_v34 }
 0x3fa   :  { %2360 = vmatprep.subr.bf16.mxu0 %v5410_v35  ;;  %2401 = vmatprep.subr.bf16.mxu1 %v5413_v30 }
 0x3fd   :  { %2361 = vmatpush1.bf16.msra.mxu0 %v5416_v32  ;;  %2402 = vmatpush1.bf16.msra.mxu1 %v5419_v6 }
 0x3fe   :  { %2362 = vmatprep.subr.bf16.mxu0 %v5422_v7  ;;  %2403 = vmatprep.subr.bf16.mxu1 %v5425_v16 }
 0x401   :  { %2363 = vmatpush1.bf16.msra.mxu0 %v5428_v22  ;;  %2404 = vmatpush1.bf16.msra.mxu1 %v5431_v10 }
 0x402   :  { %2364 = vmatprep.subr.bf16.mxu0 %v5434_v9  ;;  %2405 = vmatprep.subr.bf16.mxu1 %v5437_v62 }
 0x405   :  { %2365 = vmatpush1.bf16.msra.mxu0 %v5440_v15  ;;  %2406 = vmatpush1.bf16.msra.mxu1 %v5443_v61  ;;  %v5458_v15 = vld [vmem:[#allocation4 + $0x2c] ss:$16 sps:$4 sm:$0xff]  }
 0x406   :  { %2366 = vmatprep.subr.bf16.mxu0 %v5446_v47  ;;  %2407 = vmatprep.subr.bf16.mxu1 %v5449_v0  ;;  %6955 = vst [vmem:[#allocation175_spill] sm:$0xff] %v5458_v15  ;;  %v5461_v61 = vld [vmem:[#allocation4 + $0x22c] ss:$16 sps:$4 sm:$0xff]   ;;  %v5464_v47 = vld [vmem:[#allocation4 + $0x28] ss:$16 sps:$4 sm:$0xff]  }
 0x407   :  { %6956 = vst [vmem:[#allocation176_spill] sm:$0xff] %v5461_v61  ;;  %6957 = vst [vmem:[#allocation177_spill] sm:$0xff] %v5464_v47  ;;  %v5467_v0 = vld [vmem:[#allocation4 + $0x228] ss:$16 sps:$4 sm:$0xff]  }
 0x408   :  { %6958 = vst [vmem:[#allocation178_spill] sm:$0xff] %v5467_v0 }
 0x409   :  { %2367 = vmatpush1.bf16.msra.mxu0 %v5452_v43  ;;  %2408 = vmatpush1.bf16.msra.mxu1 %v5455_v27  ;;  %v5470_v43 = vld [vmem:[#allocation4 + $0xc] ss:$16 sps:$4 sm:$0xff]  }
 0x40a   :  { %2368 = vmatprep.subr.bf16.mxu0 %v5458_v15  ;;  %2409 = vmatprep.subr.bf16.mxu1 %v5461_v61  ;;  %6959 = vst [vmem:[#allocation179_spill] sm:$0xff] %v5470_v43  ;;  %v5473_v27 = vld [vmem:[#allocation4 + $0x20c] ss:$16 sps:$4 sm:$0xff]   ;;  %v5476_v15 = vld [vmem:[#allocation4 + $0x8] ss:$16 sps:$4 sm:$0xff]  }
 0x40b   :  { %6960 = vst [vmem:[#allocation180_spill] sm:$0xff] %v5473_v27  ;;  %6961 = vst [vmem:[#allocation181_spill] sm:$0xff] %v5476_v15  ;;  %v5479_v61 = vld [vmem:[#allocation4 + $0x208] ss:$16 sps:$4 sm:$0xff]  }
 0x40c   :  { %6962 = vst [vmem:[#allocation182_spill] sm:$0xff] %v5479_v61 }
 0x40d   :  { %2369 = vmatpush1.bf16.msra.mxu0 %v5464_v47  ;;  %2410 = vmatpush1.bf16.msra.mxu1 %v5467_v0  ;;  %v5482_v47 = vld [vmem:[#allocation4 + $0x1ec] ss:$16 sps:$4 sm:$0xff]  }
 0x40e   :  { %2370 = vmatprep.subr.bf16.mxu0 %v5470_v43  ;;  %2411 = vmatprep.subr.bf16.mxu1 %v5473_v27  ;;  %6963 = vst [vmem:[#allocation183_spill] sm:$0xff] %v5482_v47  ;;  %v5485_v0 = vld [vmem:[#allocation4 + $0x3ec] ss:$16 sps:$4 sm:$0xff]   ;;  %v5488_v43 = vld [vmem:[#allocation4 + $0x1e8] ss:$16 sps:$4 sm:$0xff]  }
 0x40f   :  { %6964 = vst [vmem:[#allocation184_spill] sm:$0xff] %v5485_v0  ;;  %6965 = vst [vmem:[#allocation185_spill] sm:$0xff] %v5488_v43  ;;  %v5491_v27 = vld [vmem:[#allocation4 + $0x3e8] ss:$16 sps:$4 sm:$0xff]  }
 0x410   :  { %6966 = vst [vmem:[#allocation186_spill] sm:$0xff] %v5491_v27 }
 0x411   :  { %2371 = vmatpush1.bf16.msra.mxu0 %v5476_v15  ;;  %2412 = vmatpush1.bf16.msra.mxu1 %v5479_v61  ;;  %v5494_v15 = vld [vmem:[#allocation4 + $0x1cc] ss:$16 sps:$4 sm:$0xff]  }
 0x412   :  { %2372 = vmatprep.subr.bf16.mxu0 %v5482_v47  ;;  %2413 = vmatprep.subr.bf16.mxu1 %v5485_v0  ;;  %6967 = vst [vmem:[#allocation187_spill] sm:$0xff] %v5494_v15  ;;  %v5497_v61 = vld [vmem:[#allocation4 + $0x3cc] ss:$16 sps:$4 sm:$0xff]   ;;  %v5500_v47 = vld [vmem:[#allocation4 + $0x1c8] ss:$16 sps:$4 sm:$0xff]  }
 0x413   :  { %6968 = vst [vmem:[#allocation188_spill] sm:$0xff] %v5497_v61  ;;  %6969 = vst [vmem:[#allocation189_spill] sm:$0xff] %v5500_v47  ;;  %v5503_v0 = vld [vmem:[#allocation4 + $0x3c8] ss:$16 sps:$4 sm:$0xff]  }
 0x414   :  { %6970 = vst [vmem:[#allocation190_spill] sm:$0xff] %v5503_v0 }
 0x415   :  { %2373 = vmatpush2.bf16.msra.mxu0 %v5488_v43  ;;  %2414 = vmatpush2.bf16.msra.mxu1 %v5491_v27  ;;  %v5506_v43 = vld [vmem:[#allocation4 + $0x1ac] ss:$16 sps:$4 sm:$0xff]  }
 0x416   :  { %2374 = vmatprep.subr.bf16.mxu0 %v5494_v15  ;;  %2415 = vmatprep.subr.bf16.mxu1 %v5497_v61  ;;  %6971 = vst [vmem:[#allocation191_spill] sm:$0xff] %v5506_v43  ;;  %v5509_v27 = vld [vmem:[#allocation4 + $0x3ac] ss:$16 sps:$4 sm:$0xff]   ;;  %v5512_v15 = vld [vmem:[#allocation4 + $0x1a8] ss:$16 sps:$4 sm:$0xff]  }
 0x417   :  { %6972 = vst [vmem:[#allocation192_spill] sm:$0xff] %v5509_v27  ;;  %6973 = vst [vmem:[#allocation193_spill] sm:$0xff] %v5512_v15  ;;  %v5515_v61 = vld [vmem:[#allocation4 + $0x3a8] ss:$16 sps:$4 sm:$0xff]  }
 0x418   :  { %6974 = vst [vmem:[#allocation194_spill] sm:$0xff] %v5515_v61 }
 0x419   :  { %2375 = vmatpush2.bf16.msra.mxu0 %v5500_v47  ;;  %2416 = vmatpush2.bf16.msra.mxu1 %v5503_v0  ;;  %v5518_v47 = vld [vmem:[#allocation4 + $0x18c] ss:$16 sps:$4 sm:$0xff]  }
 0x41a   :  { %2376 = vmatprep.subr.bf16.mxu0 %v5506_v43  ;;  %2417 = vmatprep.subr.bf16.mxu1 %v5509_v27  ;;  %6975 = vst [vmem:[#allocation195_spill] sm:$0xff] %v5518_v47  ;;  %v5521_v0 = vld [vmem:[#allocation4 + $0x38c] ss:$16 sps:$4 sm:$0xff]   ;;  %v5524_v43 = vld [vmem:[#allocation4 + $0x188] ss:$16 sps:$4 sm:$0xff]  }
 0x41b   :  { %6976 = vst [vmem:[#allocation196_spill] sm:$0xff] %v5521_v0  ;;  %6977 = vst [vmem:[#allocation197_spill] sm:$0xff] %v5524_v43  ;;  %v5527_v27 = vld [vmem:[#allocation4 + $0x388] ss:$16 sps:$4 sm:$0xff]  }
 0x41c   :  { %6978 = vst [vmem:[#allocation198_spill] sm:$0xff] %v5527_v27 }
 0x41d   :  { %2377 = vmatpush2.bf16.msra.mxu0 %v5512_v15  ;;  %2418 = vmatpush2.bf16.msra.mxu1 %v5515_v61  ;;  %v5530_v15 = vld [vmem:[#allocation4 + $0x16c] ss:$16 sps:$4 sm:$0xff]  }
 0x41e   :  { %2378 = vmatprep.subr.bf16.mxu0 %v5518_v47  ;;  %2419 = vmatprep.subr.bf16.mxu1 %v5521_v0  ;;  %6979 = vst [vmem:[#allocation199_spill] sm:$0xff] %v5530_v15  ;;  %v5533_v61 = vld [vmem:[#allocation4 + $0x36c] ss:$16 sps:$4 sm:$0xff]   ;;  %v5536_v47 = vld [vmem:[#allocation4 + $0x168] ss:$16 sps:$4 sm:$0xff]  }
 0x41f   :  { %6980 = vst [vmem:[#allocation200_spill] sm:$0xff] %v5533_v61  ;;  %6981 = vst [vmem:[#allocation201_spill] sm:$0xff] %v5536_v47  ;;  %v5539_v0 = vld [vmem:[#allocation4 + $0x368] ss:$16 sps:$4 sm:$0xff]  }
 0x420   :  { %6982 = vst [vmem:[#allocation202_spill] sm:$0xff] %v5539_v0 }
 0x421   :  { %2379 = vmatpush2.bf16.msra.mxu0 %v5524_v43  ;;  %2420 = vmatpush2.bf16.msra.mxu1 %v5527_v27  ;;  %v5542_v43 = vld [vmem:[#allocation4 + $0x14c] ss:$16 sps:$4 sm:$0xff]  }
 0x422   :  { %2380 = vmatprep.subr.bf16.mxu0 %v5530_v15  ;;  %2421 = vmatprep.subr.bf16.mxu1 %v5533_v61  ;;  %6983 = vst [vmem:[#allocation203_spill] sm:$0xff] %v5542_v43  ;;  %v5545_v27 = vld [vmem:[#allocation4 + $0x34c] ss:$16 sps:$4 sm:$0xff]   ;;  %v5548_v15 = vld [vmem:[#allocation4 + $0x148] ss:$16 sps:$4 sm:$0xff]  }
 0x423   :  { %6984 = vst [vmem:[#allocation204_spill] sm:$0xff] %v5545_v27  ;;  %6985 = vst [vmem:[#allocation205_spill] sm:$0xff] %v5548_v15  ;;  %v5551_v61 = vld [vmem:[#allocation4 + $0x348] ss:$16 sps:$4 sm:$0xff]  }
 0x424   :  { %6986 = vst [vmem:[#allocation206_spill] sm:$0xff] %v5551_v61 }
 0x425   :  { %2381 = vmatpush2.bf16.msra.mxu0 %v5536_v47  ;;  %2422 = vmatpush2.bf16.msra.mxu1 %v5539_v0  ;;  %v5554_v47 = vld [vmem:[#allocation4 + $0x12c] ss:$16 sps:$4 sm:$0xff]  }
 0x426   :  { %2382 = vmatprep.subr.bf16.mxu0 %v5542_v43  ;;  %2423 = vmatprep.subr.bf16.mxu1 %v5545_v27  ;;  %6987 = vst [vmem:[#allocation207_spill] sm:$0xff] %v5554_v47  ;;  %v5557_v0 = vld [vmem:[#allocation4 + $0x32c] ss:$16 sps:$4 sm:$0xff]   ;;  %v5560_v43 = vld [vmem:[#allocation4 + $0x128] ss:$16 sps:$4 sm:$0xff]  }
 0x427   :  { %6988 = vst [vmem:[#allocation208_spill] sm:$0xff] %v5557_v0  ;;  %6989 = vst [vmem:[#allocation209_spill] sm:$0xff] %v5560_v43  ;;  %v5563_v27 = vld [vmem:[#allocation4 + $0x328] ss:$16 sps:$4 sm:$0xff]  }
 0x428   :  { %6990 = vst [vmem:[#allocation210_spill] sm:$0xff] %v5563_v27 }
 0x429   :  { %2383 = vmatpush2.bf16.msra.mxu0 %v5548_v15  ;;  %2424 = vmatpush2.bf16.msra.mxu1 %v5551_v61  ;;  %v5566_v15 = vld [vmem:[#allocation4 + $0x10c] ss:$16 sps:$4 sm:$0xff]  }
 0x42a   :  { %2384 = vmatprep.subr.bf16.mxu0 %v5554_v47  ;;  %2425 = vmatprep.subr.bf16.mxu1 %v5557_v0  ;;  %v5569_v61 = vld [vmem:[#allocation4 + $0x30c] ss:$16 sps:$4 sm:$0xff]   ;;  %v5572_v47 = vld [vmem:[#allocation4 + $0x108] ss:$16 sps:$4 sm:$0xff]  }
 0x42b   :  { %6991 = vst [vmem:[#allocation211_spill] sm:$0xff] %v5569_v61  ;;  %6992 = vst [vmem:[#allocation212_spill] sm:$0xff] %v5572_v47  ;;  %v5575_v0 = vld [vmem:[#allocation4 + $0x308] ss:$16 sps:$4 sm:$0xff]  }
 0x42c   :  { %6993 = vst [vmem:[#allocation213_spill] sm:$0xff] %v5575_v0 }
 0x42d   :  { %2385 = vmatpush2.bf16.msra.mxu0 %v5560_v43  ;;  %2426 = vmatpush2.bf16.msra.mxu1 %v5563_v27  ;;  %v5578_v43 = vld [vmem:[#allocation7 + $0xe4] ss:$16 sps:$4 sm:$0xff]  }
 0x42e   :  { %2386 = vmatprep.subr.bf16.mxu0 %v5566_v15  ;;  %2427 = vmatprep.subr.bf16.mxu1 %v5569_v61  ;;  %6994 = vst [vmem:[#allocation214_spill] sm:$0xff] %v5578_v43  ;;  %v5581_v27 = vld [vmem:[#allocation7 + $0x2e4] ss:$16 sps:$4 sm:$0xff]   ;;  %v5586_v61 = vld [vmem:[#allocation7 + $0xe0] ss:$16 sps:$4 sm:$0xff]  }
 0x42f   :  { %6995 = vst [vmem:[#allocation215_spill] sm:$0xff] %v5581_v27 }
 0x431   :  { %2387 = vmatpush2.bf16.msra.mxu0 %v5572_v47  ;;  %2428 = vmatpush2.bf16.msra.mxu1 %v5575_v0  ;;  %v5589_v47 = vld [vmem:[#allocation7 + $0x2e0] ss:$16 sps:$4 sm:$0xff]   ;;  %v5592_v0 = vld [vmem:[#allocation7 + $0xc4] ss:$16 sps:$4 sm:$0xff]  }
 0x432   :  { %2446 = vmatprep.subr.bf16.mxu0 %v5578_v43  ;;  %2487 = vmatprep.subr.bf16.mxu1 %v5581_v27  ;;  %6996 = vst [vmem:[#allocation216_spill] sm:$0xff] %v5589_v47  ;;  %6997 = vst [vmem:[#allocation217_spill] sm:$0xff] %v5592_v0  ;;  %v5595_v43 = vld [vmem:[#allocation7 + $0x2c4] ss:$16 sps:$4 sm:$0xff]   ;;  %v5598_v27 = vld [vmem:[#allocation7 + $0xc0] ss:$16 sps:$4 sm:$0xff]  }
 0x433   :  { %6998 = vst [vmem:[#allocation218_spill] sm:$0xff] %v5595_v43  ;;  %6999 = vst [vmem:[#allocation219_spill] sm:$0xff] %v5598_v27 }
 0x434   :  { %2389 = vmatmul.mubr.bf16.vlgmr.msra.gmra.mxu0 %v5386_v24  ;;  %2430 = vmatmul.mubr.bf16.vlgmr.msra.gmra.mxu1 %v5388_v1  ;;  %v5601_v24 = vld [vmem:[#allocation7 + $0x2c0] ss:$16 sps:$4 sm:$0xff]   ;;  %v5604_v1 = vld [vmem:[#allocation7 + $0xa4] ss:$16 sps:$4 sm:$0xff]  }
 0x435   :  { %2447 = vmatpush1.bf16.msra.mxu0 %v5586_v61  ;;  %2488 = vmatpush1.bf16.msra.mxu1 %v5589_v47  ;;  %7000 = vst [vmem:[#allocation220_spill] sm:$0xff] %v5601_v24  ;;  %7001 = vst [vmem:[#allocation221_spill] sm:$0xff] %v5604_v1  ;;  %v5607_v47 = vld [vmem:[#allocation7 + $0x2a4] ss:$16 sps:$4 sm:$0xff]  }
 0x436   :  { %2448 = vmatprep.subr.bf16.mxu0 %v5592_v0  ;;  %2489 = vmatprep.subr.bf16.mxu1 %v5595_v43  ;;  %7002 = vst [vmem:[#allocation222_spill] sm:$0xff] %v5607_v47  ;;  %v5610_v0 = vld [vmem:[#allocation7 + $0xa0] ss:$16 sps:$4 sm:$0xff]  }
 0x437   :  { %7003 = vst [vmem:[#allocation223_spill] sm:$0xff] %v5610_v0  ;;  %v5613_v43 = vld [vmem:[#allocation7 + $0x2a0] ss:$16 sps:$4 sm:$0xff]  }
 0x438   :  { %7004 = vst [vmem:[#allocation224_spill] sm:$0xff] %v5613_v43 }
 0x439   :  { %2449 = vmatpush1.bf16.msra.mxu0 %v5598_v27  ;;  %2490 = vmatpush1.bf16.msra.mxu1 %v5601_v24  ;;  %v5616_v27 = vld [vmem:[#allocation7 + $0x84] ss:$16 sps:$4 sm:$0xff]  }
 0x43a   :  { %2450 = vmatprep.subr.bf16.mxu0 %v5604_v1  ;;  %2491 = vmatprep.subr.bf16.mxu1 %v5607_v47  ;;  %7005 = vst [vmem:[#allocation225_spill] sm:$0xff] %v5616_v27  ;;  %v5619_v24 = vld [vmem:[#allocation7 + $0x284] ss:$16 sps:$4 sm:$0xff]   ;;  %v5622_v1 = vld [vmem:[#allocation7 + $0x80] ss:$16 sps:$4 sm:$0xff]  }
 0x43b   :  { %7006 = vst [vmem:[#allocation226_spill] sm:$0xff] %v5619_v24  ;;  %7007 = vst [vmem:[#allocation227_spill] sm:$0xff] %v5622_v1  ;;  %v5625_v47 = vld [vmem:[#allocation7 + $0x280] ss:$16 sps:$4 sm:$0xff]  }
 0x43c   :  { %7008 = vst [vmem:[#allocation228_spill] sm:$0xff] %v5625_v47 }
 0x43d   :  { %2451 = vmatpush1.bf16.msra.mxu0 %v5610_v0  ;;  %2492 = vmatpush1.bf16.msra.mxu1 %v5613_v43  ;;  %v5628_v0 = vld [vmem:[#allocation7 + $0x64] ss:$16 sps:$4 sm:$0xff]  }
 0x43e   :  { %2452 = vmatprep.subr.bf16.mxu0 %v5616_v27  ;;  %2493 = vmatprep.subr.bf16.mxu1 %v5619_v24  ;;  %v5631_v43 = vld [vmem:[#allocation7 + $0x264] ss:$16 sps:$4 sm:$0xff]   ;;  %v5634_v27 = vld [vmem:[#allocation7 + $0x60] ss:$16 sps:$4 sm:$0xff]  }
 0x43f   :  { %7009 = vst [vmem:[#allocation229_spill] sm:$0xff] %v5631_v43  ;;  %7010 = vst [vmem:[#allocation230_spill] sm:$0xff] %v5634_v27  ;;  %v5637_v24 = vld [vmem:[#allocation7 + $0x260] ss:$16 sps:$4 sm:$0xff]  }
 0x441   :  { %2453 = vmatpush1.bf16.msra.mxu0 %v5622_v1  ;;  %2494 = vmatpush1.bf16.msra.mxu1 %v5625_v47  ;;  %v5640_v1 = vld [vmem:[#allocation7 + $0x44] ss:$16 sps:$4 sm:$0xff]   ;;  %v5644_v47 = vld [vmem:[#allocation7 + $0x40] ss:$16 sps:$4 sm:$0xff]  }
 0x442   :  { %2454 = vmatprep.subr.bf16.mxu0 %v5628_v0  ;;  %2495 = vmatprep.subr.bf16.mxu1 %v5631_v43  ;;  %7011 = vst [vmem:[#allocation231_spill] sm:$0xff] %v5640_v1  ;;  %v5648_v43 = vld [vmem:[#allocation7 + $0x24] ss:$16 sps:$4 sm:$0xff]  }
 0x445   :  { %2455 = vmatpush1.bf16.msra.mxu0 %v5634_v27  ;;  %2496 = vmatpush1.bf16.msra.mxu1 %v5637_v24  ;;  %v5652_v27 = vld [vmem:[#allocation7 + $0x20] ss:$16 sps:$4 sm:$0xff]  }
 0x446   :  { %2456 = vmatprep.subr.bf16.mxu0 %v5640_v1  ;;  %2497 = vmatprep.subr.bf16.mxu1 %v4772_v25  ;;  %v5656_v1 = vld [vmem:[#allocation7 + $0x4] ss:$16 sps:$4 sm:$0xff]   ;;  %v5660_v25 = vld [vmem:[#allocation7] ss:$16 sps:$4 sm:$0xff]  }
 0x449   :  { %2457 = vmatpush1.bf16.msra.mxu0 %v5644_v47  ;;  %2498 = vmatpush1.bf16.msra.mxu1 %v4774_v26  ;;  %v5664_v26 = vld [vmem:[#allocation7 + $0x1e4] ss:$16 sps:$4 sm:$0xff]  }
 0x44a   :  { %2458 = vmatprep.subr.bf16.mxu0 %v5648_v43  ;;  %2499 = vmatprep.subr.bf16.mxu1 %v4778_v41  ;;  %7012 = vst [vmem:[#allocation232_spill] sm:$0xff] %v5664_v26  ;;  %v5668_v41 = vld [vmem:[#allocation7 + $0x1e0] ss:$16 sps:$4 sm:$0xff]  }
 0x44b   :  { %7013 = vst [vmem:[#allocation233_spill] sm:$0xff] %v5668_v41 }
 0x44d   :  { %2459 = vmatpush1.bf16.msra.mxu0 %v5652_v27  ;;  %2500 = vmatpush1.bf16.msra.mxu1 %v4780_v42  ;;  %v5672_v42 = vld [vmem:[#allocation7 + $0x1c4] ss:$16 sps:$4 sm:$0xff]  }
 0x44e   :  { %2460 = vmatprep.subr.bf16.mxu0 %v5656_v1  ;;  %2501 = vmatprep.subr.bf16.mxu1 %v4784_v45  ;;  %7014 = vst [vmem:[#allocation234_spill] sm:$0xff] %v5672_v42  ;;  %v5676_v45 = vld [vmem:[#allocation7 + $0x1c0] ss:$16 sps:$4 sm:$0xff]  }
 0x44f   :  { %7015 = vst [vmem:[#allocation235_spill] sm:$0xff] %v5676_v45 }
 0x451   :  { %2461 = vmatpush1.bf16.msra.mxu0 %v5660_v25  ;;  %2502 = vmatpush1.bf16.msra.mxu1 %v4786_v46  ;;  %v5680_v46 = vld [vmem:[#allocation7 + $0x1a4] ss:$16 sps:$4 sm:$0xff]  }
 0x452   :  { %2462 = vmatprep.subr.bf16.mxu0 %v5664_v26  ;;  %2503 = vmatprep.subr.bf16.mxu1 %v4792_v49  ;;  %7016 = vst [vmem:[#allocation236_spill] sm:$0xff] %v5680_v46  ;;  %v5684_v49 = vld [vmem:[#allocation7 + $0x1a0] ss:$16 sps:$4 sm:$0xff]  }
 0x453   :  { %7017 = vst [vmem:[#allocation237_spill] sm:$0xff] %v5684_v49 }
 0x455   :  { %2463 = vmatpush2.bf16.msra.mxu0 %v5668_v41  ;;  %2504 = vmatpush2.bf16.msra.mxu1 %v4794_v50  ;;  %v5688_v50 = vld [vmem:[#allocation7 + $0x184] ss:$16 sps:$4 sm:$0xff]  }
 0x456   :  { %2464 = vmatprep.subr.bf16.mxu0 %v5672_v42  ;;  %2505 = vmatprep.subr.bf16.mxu1 %v4803_v53  ;;  %7018 = vst [vmem:[#allocation238_spill] sm:$0xff] %v5688_v50  ;;  %v7020_v53 = vld [vmem:[#allocation19_spill] sm:$0xff] }
 0x459   :  { %2465 = vmatpush2.bf16.msra.mxu0 %v5676_v45  ;;  %2506 = vmatpush2.bf16.msra.mxu1 %v4805_v54  ;;  %v7022_v54 = vld [vmem:[#allocation20_spill] sm:$0xff]  ;;  %v7061_v45 = vld [vmem:[#allocation61_spill] sm:$0xff] }
 0x45a   :  { %2466 = vmatprep.subr.bf16.mxu0 %v5680_v46  ;;  %2507 = vmatprep.subr.bf16.mxu1 %v4815_v57  ;;  %v7024_v57 = vld [vmem:[#allocation21_spill] sm:$0xff] }
 0x45d   :  { %2467 = vmatpush2.bf16.msra.mxu0 %v5684_v49  ;;  %2508 = vmatpush2.bf16.msra.mxu1 %v4817_v58  ;;  %v7026_v58 = vld [vmem:[#allocation22_spill] sm:$0xff] }
 0x45e   :  { %2468 = vmatprep.subr.bf16.mxu0 %v5688_v50  ;;  %2509 = vmatprep.subr.bf16.mxu1 %v4827_v60 }
 0x461   :  { %2469 = vmatpush2.bf16.msra.mxu0 %v4790_v48  ;;  %2510 = vmatpush2.bf16.msra.mxu1 %v4829_v2  ;;  %v7019_v48 = vld [vmem:[#allocation23_spill] sm:$0xff]  ;;  %v7028_v2 = vld [vmem:[#allocation28_spill] sm:$0xff] }
 0x462   :  { %2470 = vmatprep.subr.bf16.mxu0 %v4796_v51  ;;  %2511 = vmatprep.subr.bf16.mxu1 %v4839_v63  ;;  %v7021_v51 = vld [vmem:[#allocation24_spill] sm:$0xff] }
 0x465   :  { %2471 = vmatpush2.bf16.msra.mxu0 %v4801_v52  ;;  %2512 = vmatpush2.bf16.msra.mxu1 %v4841_v3  ;;  %v7023_v52 = vld [vmem:[#allocation25_spill] sm:$0xff] }
 0x466   :  { %2472 = vmatprep.subr.bf16.mxu0 %v4808_v55  ;;  %2513 = vmatprep.subr.bf16.mxu1 %v4849_v5  ;;  %v7025_v55 = vld [vmem:[#allocation26_spill] sm:$0xff] }
 0x469   :  { %2473 = vmatpush2.bf16.msra.mxu0 %v4813_v56  ;;  %2514 = vmatpush2.bf16.msra.mxu1 %v4852_v14  ;;  %v7027_v56 = vld [vmem:[#allocation27_spill] sm:$0xff] }
 0x46a   :  { %2474 = vmatprep.subr.bf16.mxu0 %v4820_v59  ;;  %2515 = vmatprep.subr.bf16.mxu1 %v7019_v48  ;;  %v7029_v48 = vld [vmem:[#allocation29_spill] sm:$0xff] }
 0x46d   :  { %2475 = vmatpush2.bf16.msra.mxu0 %v7020_v53  ;;  %2516 = vmatpush2.bf16.msra.mxu1 %v7021_v51 }
 0x46e   :  { %2476 = vmatprep.subr.bf16.mxu0 %v7022_v54  ;;  %2517 = vmatprep.subr.bf16.mxu1 %v7023_v52 }
 0x471   :  { %2477 = vmatpush2.bf16.msra.mxu0 %v7024_v57  ;;  %2518 = vmatpush2.bf16.msra.mxu1 %v7025_v55 }
 0x472   :  { %2528 = vmatprep.subr.bf16.mxu0 %v7026_v58  ;;  %2569 = vmatprep.subr.bf16.mxu1 %v7027_v56  ;;  %v7030_v56 = vld [vmem:[#allocation30_spill] sm:$0xff] }
 0x4b4   :  { %v2308_v60 = vpop.f32.mrf.mxu0  ;;  %v2349_v59 = vpop.f32.mrf.mxu1 }
 0x4b5   :  { %v2309_v63 = vadd.f32 %v2308_v60, %v7028_v2  ;;  %v7031_v60 = vld [vmem:[#allocation31_spill] sm:$0xff]  ;;  %v7032_v2 = vld [vmem:[#allocation32_spill] sm:$0xff] }
 0x4b6   :  { %v2310_v3 = vpop.f32.mrf.mxu0  ;;  %v2351_v5 = vpop.f32.mrf.mxu1 }
 0x4b7   :  { %v2350_v14 = vadd.f32 %v2349_v59, %v2309_v63  ;;  %v2311_v53 = vadd.f32 %v2310_v3, %v7029_v48  ;;  %v7033_v59 = vld [vmem:[#allocation33_spill] sm:$0xff]  ;;  %v7034_v63 = vld [vmem:[#allocation34_spill] sm:$0xff]  ;;  %v7035_v3 = vld [vmem:[#allocation35_spill] sm:$0xff] }
 0x4b8   :  { %v2312_v51 = vpop.f32.mrf.mxu0  ;;  %v2353_v54 = vpop.f32.mrf.mxu1 }
 0x4b9   :  { %v2352_v52 = vadd.f32 %v2351_v5, %v2311_v53  ;;  %v2438_v50 = vmax.f32 %v2350_v14, 0.0  ;;  %v7036_v5 = vld [vmem:[#allocation36_spill] sm:$0xff]  ;;  %v7039_v14 = vld [vmem:[#allocation39_spill] sm:$0xff]  ;;  %v7042_v51 = vld [vmem:[#allocation42_spill] sm:$0xff] }
 0x4ba   :  { %v2313_v57 = vpop.f32.mrf.mxu0  ;;  %v2354_v49 = vpop.f32.mrf.mxu1  ;;  %v7040_v53 = vld [vmem:[#allocation40_spill] sm:$0xff] }
 0x4bb   :  { %v2439_v55 = vmax.f32 %v2352_v52, 0.0  ;;  %v2442_v58 = vpack.c.bf16 %v2438_v50, %v2438_v50  ;;  %v7037_v49 = vld [vmem:[#allocation37_spill] sm:$0xff]  ;;  %v7038_v50 = vld [vmem:[#allocation38_spill] sm:$0xff]  ;;  %v7044_v54 = vld [vmem:[#allocation44_spill] sm:$0xff] }
 0x4bc   :  { %v7045_v52 = vld [vmem:[#allocation45_spill] sm:$0xff]  ;;  %v7046_v57 = vld [vmem:[#allocation46_spill] sm:$0xff] }
 0x4bd   :  { %v2443_v46 = vpack.c.bf16 %v2439_v55, %v2439_v55  ;;  %v7047_v55 = vld [vmem:[#allocation47_spill] sm:$0xff] }
 0x4bf   :  { %2478 = vmatprep.mubr.bf16.mxu0 %v2443_v46 }
 0x4c0   :  { %2479 = vmatmul.mubr.bf16.vlgmr.msra.gmra.mxu0 %v2442_v58 }
 0x4c1   :  { %2529 = vmatpush1.bf16.msra.mxu0 %v7030_v56  ;;  %2560 = vmatprep.mubr.bf16.mxu0 %v2443_v46  ;;  %v7041_v46 = vld [vmem:[#allocation41_spill] sm:$0xff]  ;;  %v7048_v56 = vld [vmem:[#allocation48_spill] sm:$0xff] }
 0x4c2   :  { %2530 = vmatprep.subr.bf16.mxu0 %v7031_v60  ;;  %v7049_v60 = vld [vmem:[#allocation49_spill] sm:$0xff] }
 0x4c5   :  { %2531 = vmatpush1.bf16.msra.mxu0 %v7032_v2  ;;  %v7043_v2 = vld [vmem:[#allocation43_spill] sm:$0xff] }
 0x4c6   :  { %2532 = vmatprep.subr.bf16.mxu0 %v7033_v59  ;;  %v7050_v59 = vld [vmem:[#allocation50_spill] sm:$0xff] }
 0x4c9   :  { %2533 = vmatpush1.bf16.msra.mxu0 %v7034_v63  ;;  %v7051_v63 = vld [vmem:[#allocation51_spill] sm:$0xff] }
 0x4ca   :  { %2534 = vmatprep.subr.bf16.mxu0 %v7035_v3  ;;  %v7052_v3 = vld [vmem:[#allocation52_spill] sm:$0xff] }
 0x4cd   :  { %2535 = vmatpush1.bf16.msra.mxu0 %v7036_v5  ;;  %v7053_v5 = vld [vmem:[#allocation53_spill] sm:$0xff] }
 0x4ce   :  { %2536 = vmatprep.subr.bf16.mxu0 %v7037_v49  ;;  %v7054_v49 = vld [vmem:[#allocation54_spill] sm:$0xff] }
 0x4d1   :  { %2537 = vmatpush1.bf16.msra.mxu0 %v7038_v50  ;;  %v7055_v50 = vld [vmem:[#allocation55_spill] sm:$0xff] }
 0x4d2   :  { %2538 = vmatprep.subr.bf16.mxu0 %v7039_v14 }
 0x4d5   :  { %2539 = vmatpush1.bf16.msra.mxu0 %v7040_v53 }
 0x4d6   :  { %2540 = vmatprep.subr.bf16.mxu0 %v7041_v46  ;;  %v7056_v46 = vld [vmem:[#allocation56_spill] sm:$0xff] }
 0x4d9   :  { %2541 = vmatpush1.bf16.msra.mxu0 %v7042_v51 }
 0x4da   :  { %2542 = vmatprep.subr.bf16.mxu0 %v7043_v2  ;;  %v7057_v2 = vld [vmem:[#allocation57_spill] sm:$0xff] }
 0x4dd   :  { %2543 = vmatpush1.bf16.msra.mxu0 %v7044_v54 }
 0x4de   :  { %2544 = vmatprep.subr.bf16.mxu0 %v7045_v52 }
 0x4e1   :  { %2545 = vmatpush2.bf16.msra.mxu0 %v7046_v57  ;;  %v7058_v57 = vld [vmem:[#allocation58_spill] sm:$0xff] }
 0x4e2   :  { %2546 = vmatprep.subr.bf16.mxu0 %v7047_v55 }
 0x4e5   :  { %2547 = vmatpush2.bf16.msra.mxu0 %v7048_v56  ;;  %v7059_v56 = vld [vmem:[#allocation59_spill] sm:$0xff] }
 0x4e6   :  { %2548 = vmatprep.subr.bf16.mxu0 %v7049_v60 }
 0x4e9   :  { %2549 = vmatpush2.bf16.msra.mxu0 %v7050_v59 }
 0x4ea   :  { %2550 = vmatprep.subr.bf16.mxu0 %v7051_v63 }
 0x4ed   :  { %2551 = vmatpush2.bf16.msra.mxu0 %v7052_v3 }
 0x4ee   :  { %2552 = vmatprep.subr.bf16.mxu0 %v7053_v5  ;;  %v7060_v5 = vld [vmem:[#allocation60_spill] sm:$0xff] }
 0x4f1   :  { %2553 = vmatpush2.bf16.msra.mxu0 %v7054_v49 }
 0x4f2   :  { %2554 = vmatprep.subr.bf16.mxu0 %v7055_v50 }
 0x4f4   :  { %v2390_v14 = vpop.f32.mrf.mxu0  ;;  %v2431_v53 = vpop.f32.mrf.mxu1 }
 0x4f5   :  { %v2391_v51 = vadd.f32 %v2390_v14, %v7056_v46  ;;  %2555 = vmatpush2.bf16.msra.mxu0 %v7057_v2  ;;  %v7062_v2 = vld [vmem:[#allocation62_spill] sm:$0xff] }
 0x4f6   :  { %v2392_v54 = vpop.f32.mrf.mxu0  ;;  %v2433_v52 = vpop.f32.mrf.mxu1  ;;  %2556 = vmatprep.subr.bf16.mxu0 %v7058_v57  ;;  %v7063_v57 = vld [vmem:[#allocation65_spill] sm:$0xff] }
 0x4f7   :  { %v2432_v55 = vadd.f32 %v2431_v53, %v2391_v51  ;;  %v2393_v60 = vadd.f32 %v2392_v54, %v7059_v56  ;;  %v7064_v53 = vld [vmem:[#allocation63_spill] sm:$0xff]  ;;  %v7065_v51 = vld [vmem:[#allocation64_spill] sm:$0xff]  ;;  %v7068_v54 = vld [vmem:[#allocation66_spill] sm:$0xff] }
 0x4f8   :  { %v2394_v59 = vpop.f32.mrf.mxu0  ;;  %v2435_v63 = vpop.f32.mrf.mxu1 }
 0x4f9   :  { %v2434_v3 = vadd.f32 %v2433_v52, %v2393_v60  ;;  %2557 = vmatpush2.bf16.msra.mxu0 %v7060_v5  ;;  %v2440_v49 = vmax.f32 %v2432_v55, 0.0  ;;  %v7069_v52 = vld [vmem:[#allocation67_spill] sm:$0xff]  ;;  %v7070_v55 = vld [vmem:[#allocation72_spill] sm:$0xff]  ;;  %v7071_v60 = vld [vmem:[#allocation73_spill] sm:$0xff] }
 0x4fa   :  { %v2395_v50 = vpop.f32.mrf.mxu0  ;;  %v2436_v48 = vpop.f32.mrf.mxu1  ;;  %2558 = vmatprep.subr.bf16.mxu0 %v7061_v45  ;;  %v7067_v45 = vld [vmem:[#allocation69_spill] sm:$0xff]  ;;  %v7072_v59 = vld [vmem:[#allocation70_spill] sm:$0xff]  ;;  %v7074_v63 = vld [vmem:[#allocation76_spill] sm:$0xff] }
 0x4fb   :  { %v2441_v14 = vmax.f32 %v2434_v3, 0.0  ;;  %v5747_v42 = vpack.c.bf16 %v2440_v49, %v2440_v49  ;;  %v7066_v48 = vld [vmem:[#allocation68_spill] sm:$0xff]  ;;  %v7076_v3 = vld [vmem:[#allocation74_spill] sm:$0xff]  ;;  %v7077_v5 = vld [vmem:[#allocation75_spill] sm:$0xff] }
 0x4fc   :  { %v7078_v49 = vld [vmem:[#allocation80_spill] sm:$0xff]  ;;  %v7079_v50 = vld [vmem:[#allocation81_spill] sm:$0xff] }
 0x4fd   :  { %v2445_v46 = vpack.c.bf16 %v2441_v14, %v2441_v14  ;;  %2559 = vmatpush2.bf16.msra.mxu0 %v7062_v2  ;;  %v7080_v14 = vld [vmem:[#allocation78_spill] sm:$0xff]  ;;  %v7081_v2 = vld [vmem:[#allocation79_spill] sm:$0xff] }
 0x4fe   :  { %2669 = vmatprep.subr.bf16.mxu0 %v7063_v57  ;;  %v7082_v57 = vld [vmem:[#allocation84_spill] sm:$0xff] }
 0x4ff   :  { %2519 = vmatprep.mubr.bf16.mxu1 %v2445_v46 }
 0x500   :  { %2520 = vmatmul.mubr.bf16.vlgmr.msra.gmra.mxu1 %v5747_v42  ;;  %2561 = vmatmul.mubr.bf16.vlgmr.msra.gmra.mxu0 %v2442_v58  ;;  %v7073_v58 = vld [vmem:[#allocation71_spill] sm:$0xff] }
 0x501   :  { %2570 = vmatpush1.bf16.msra.mxu1 %v7064_v53  ;;  %2601 = vmatprep.mubr.bf16.mxu1 %v2445_v46  ;;  %v7075_v46 = vld [vmem:[#allocation77_spill] sm:$0xff] }
 0x502   :  { %2571 = vmatprep.subr.bf16.mxu1 %v7065_v51  ;;  %2670 = vmatpush1.bf16.msra.mxu0 %v7066_v48  ;;  %v7083_v53 = vld [vmem:[#allocation85_spill] sm:$0xff]  ;;  %v7084_v51 = vld [vmem:[#allocation82_spill] sm:$0xff]  ;;  %v7085_v48 = vld [vmem:[#allocation83_spill] sm:$0xff] }
 0x503   :  { %2671 = vmatprep.subr.bf16.mxu0 %v7067_v45  ;;  %v7086_v45 = vld [vmem:[#allocation88_spill] sm:$0xff] }
 0x505   :  { %2572 = vmatpush1.bf16.msra.mxu1 %v7068_v54  ;;  %v7087_v54 = vld [vmem:[#allocation89_spill] sm:$0xff] }
 0x506   :  { %2573 = vmatprep.subr.bf16.mxu1 %v7069_v52  ;;  %2672 = vmatpush1.bf16.msra.mxu0 %v7070_v55  ;;  %v7088_v52 = vld [vmem:[#allocation86_spill] sm:$0xff]  ;;  %v7089_v55 = vld [vmem:[#allocation87_spill] sm:$0xff] }
 0x507   :  { %2673 = vmatprep.subr.bf16.mxu0 %v7071_v60  ;;  %v7090_v60 = vld [vmem:[#allocation92_spill] sm:$0xff] }
 0x509   :  { %2574 = vmatpush1.bf16.msra.mxu1 %v7072_v59  ;;  %v7091_v59 = vld [vmem:[#allocation93_spill] sm:$0xff] }
 0x50a   :  { %2575 = vmatprep.subr.bf16.mxu1 %v7073_v58  ;;  %2674 = vmatpush1.bf16.msra.mxu0 %v7074_v63  ;;  %v7092_v58 = vld [vmem:[#allocation90_spill] sm:$0xff]  ;;  %v7093_v63 = vld [vmem:[#allocation91_spill] sm:$0xff] }
 0x50b   :  { %2675 = vmatprep.subr.bf16.mxu0 %v7075_v46  ;;  %v7094_v46 = vld [vmem:[#allocation96_spill] sm:$0xff] }
 0x50d   :  { %2576 = vmatpush1.bf16.msra.mxu1 %v7076_v3  ;;  %v7095_v3 = vld [vmem:[#allocation97_spill] sm:$0xff] }
 0x50e   :  { %2577 = vmatprep.subr.bf16.mxu1 %v7077_v5  ;;  %2676 = vmatpush1.bf16.msra.mxu0 %v7078_v49  ;;  %v7096_v5 = vld [vmem:[#allocation94_spill] sm:$0xff]  ;;  %v7097_v49 = vld [vmem:[#allocation95_spill] sm:$0xff] }
 0x50f   :  { %2677 = vmatprep.subr.bf16.mxu0 %v7079_v50  ;;  %v7098_v50 = vld [vmem:[#allocation100_spill] sm:$0xff] }
 0x511   :  { %2578 = vmatpush1.bf16.msra.mxu1 %v7080_v14  ;;  %v7099_v14 = vld [vmem:[#allocation101_spill] sm:$0xff] }
 0x512   :  { %2579 = vmatprep.subr.bf16.mxu1 %v7081_v2  ;;  %2678 = vmatpush1.bf16.msra.mxu0 %v7082_v57  ;;  %v7100_v2 = vld [vmem:[#allocation98_spill] sm:$0xff]  ;;  %v7101_v57 = vld [vmem:[#allocation99_spill] sm:$0xff] }
 0x513   :  { %2679 = vmatprep.subr.bf16.mxu0 %v7083_v53  ;;  %v7102_v53 = vld [vmem:[#allocation104_spill] sm:$0xff] }
 0x515   :  { %2580 = vmatpush1.bf16.msra.mxu1 %v7084_v51  ;;  %v7103_v51 = vld [vmem:[#allocation105_spill] sm:$0xff] }
 0x516   :  { %2581 = vmatprep.subr.bf16.mxu1 %v7085_v48  ;;  %2680 = vmatpush1.bf16.msra.mxu0 %v7086_v45  ;;  %v7104_v48 = vld [vmem:[#allocation102_spill] sm:$0xff]  ;;  %v7105_v45 = vld [vmem:[#allocation103_spill] sm:$0xff] }
 0x517   :  { %2681 = vmatprep.subr.bf16.mxu0 %v7087_v54  ;;  %v7106_v54 = vld [vmem:[#allocation108_spill] sm:$0xff] }
 0x519   :  { %2582 = vmatpush1.bf16.msra.mxu1 %v7088_v52  ;;  %v7107_v52 = vld [vmem:[#allocation109_spill] sm:$0xff] }
 0x51a   :  { %2583 = vmatprep.subr.bf16.mxu1 %v7089_v55  ;;  %2682 = vmatpush1.bf16.msra.mxu0 %v7090_v60  ;;  %v7108_v55 = vld [vmem:[#allocation106_spill] sm:$0xff]  ;;  %v7109_v60 = vld [vmem:[#allocation107_spill] sm:$0xff] }
 0x51b   :  { %2683 = vmatprep.subr.bf16.mxu0 %v7091_v59  ;;  %v7110_v59 = vld [vmem:[#allocation112_spill] sm:$0xff] }
 0x51d   :  { %2584 = vmatpush1.bf16.msra.mxu1 %v7092_v58  ;;  %v7111_v58 = vld [vmem:[#allocation113_spill] sm:$0xff] }
 0x51e   :  { %2585 = vmatprep.subr.bf16.mxu1 %v7093_v63  ;;  %2684 = vmatpush1.bf16.msra.mxu0 %v7094_v46  ;;  %v7112_v63 = vld [vmem:[#allocation110_spill] sm:$0xff]  ;;  %v7113_v46 = vld [vmem:[#allocation111_spill] sm:$0xff] }
 0x51f   :  { %2685 = vmatprep.subr.bf16.mxu0 %v7095_v3  ;;  %v7114_v3 = vld [vmem:[#allocation116_spill] sm:$0xff] }
 0x521   :  { %2586 = vmatpush2.bf16.msra.mxu1 %v7096_v5  ;;  %v7115_v5 = vld [vmem:[#allocation117_spill] sm:$0xff] }
 0x522   :  { %2587 = vmatprep.subr.bf16.mxu1 %v7097_v49  ;;  %2686 = vmatpush2.bf16.msra.mxu0 %v7098_v50  ;;  %v7116_v49 = vld [vmem:[#allocation114_spill] sm:$0xff]  ;;  %v7117_v50 = vld [vmem:[#allocation115_spill] sm:$0xff] }
 0x523   :  { %2687 = vmatprep.subr.bf16.mxu0 %v7099_v14  ;;  %v7118_v14 = vld [vmem:[#allocation120_spill] sm:$0xff] }
 0x525   :  { %2588 = vmatpush2.bf16.msra.mxu1 %v7100_v2  ;;  %v7119_v2 = vld [vmem:[#allocation121_spill] sm:$0xff] }
 0x526   :  { %2589 = vmatprep.subr.bf16.mxu1 %v7101_v57  ;;  %2688 = vmatpush2.bf16.msra.mxu0 %v7102_v53  ;;  %v7120_v57 = vld [vmem:[#allocation118_spill] sm:$0xff]  ;;  %v7121_v53 = vld [vmem:[#allocation119_spill] sm:$0xff] }
 0x527   :  { %2689 = vmatprep.subr.bf16.mxu0 %v7103_v51  ;;  %v7122_v51 = vld [vmem:[#allocation123_spill] sm:$0xff] }
 0x529   :  { %2590 = vmatpush2.bf16.msra.mxu1 %v7104_v48  ;;  %v7123_v48 = vld [vmem:[#allocation124_spill] sm:$0xff] }
 0x52a   :  { %2591 = vmatprep.subr.bf16.mxu1 %v7105_v45  ;;  %2690 = vmatpush2.bf16.msra.mxu0 %v7106_v54  ;;  %v7124_v45 = vld [vmem:[#allocation122_spill] sm:$0xff]  ;;  %v7125_v54 = vld [vmem:[#allocation125_spill] sm:$0xff] }
 0x52b   :  { %2691 = vmatprep.subr.bf16.mxu0 %v7107_v52  ;;  %v7126_v52 = vld [vmem:[#allocation126_spill] sm:$0xff] }
 0x52d   :  { %2592 = vmatpush2.bf16.msra.mxu1 %v7108_v55  ;;  %v7127_v55 = vld [vmem:[#allocation127_spill] sm:$0xff] }
 0x52e   :  { %2593 = vmatprep.subr.bf16.mxu1 %v7109_v60  ;;  %2692 = vmatpush2.bf16.msra.mxu0 %v7110_v59  ;;  %v7128_v60 = vld [vmem:[#allocation128_spill] sm:$0xff]  ;;  %v7129_v59 = vld [vmem:[#allocation129_spill] sm:$0xff] }
 0x52f   :  { %2693 = vmatprep.subr.bf16.mxu0 %v7111_v58  ;;  %v7130_v58 = vld [vmem:[#allocation130_spill] sm:$0xff] }
 0x531   :  { %2594 = vmatpush2.bf16.msra.mxu1 %v7112_v63  ;;  %v7131_v63 = vld [vmem:[#allocation131_spill] sm:$0xff] }
 0x532   :  { %2595 = vmatprep.subr.bf16.mxu1 %v7113_v46  ;;  %2694 = vmatpush2.bf16.msra.mxu0 %v7114_v3  ;;  %v7132_v46 = vld [vmem:[#allocation132_spill] sm:$0xff]  ;;  %v7133_v3 = vld [vmem:[#allocation133_spill] sm:$0xff] }
 0x533   :  { %2695 = vmatprep.subr.bf16.mxu0 %v7115_v5  ;;  %v7134_v5 = vld [vmem:[#allocation134_spill] sm:$0xff] }
 0x535   :  { %2596 = vmatpush2.bf16.msra.mxu1 %v7116_v49  ;;  %v7135_v49 = vld [vmem:[#allocation135_spill] sm:$0xff] }
 0x536   :  { %2597 = vmatprep.subr.bf16.mxu1 %v7117_v50  ;;  %2696 = vmatpush2.bf16.msra.mxu0 %v7118_v14  ;;  %v7136_v50 = vld [vmem:[#allocation136_spill] sm:$0xff]  ;;  %v7137_v14 = vld [vmem:[#allocation137_spill] sm:$0xff] }
 0x537   :  { %2697 = vmatprep.subr.bf16.mxu0 %v7119_v2  ;;  %v7139_v2 = vld [vmem:[#allocation139_spill] sm:$0xff] }
 0x539   :  { %2598 = vmatpush2.bf16.msra.mxu1 %v7120_v57  ;;  %v7140_v57 = vld [vmem:[#allocation140_spill] sm:$0xff] }
 0x53a   :  { %2599 = vmatprep.subr.bf16.mxu1 %v7121_v53  ;;  %2698 = vmatpush2.bf16.msra.mxu0 %v7122_v51  ;;  %v7141_v53 = vld [vmem:[#allocation141_spill] sm:$0xff]  ;;  %v7142_v51 = vld [vmem:[#allocation142_spill] sm:$0xff] }
 0x53b   :  { %2699 = vmatprep.subr.bf16.mxu0 %v7123_v48  ;;  %v7143_v48 = vld [vmem:[#allocation143_spill] sm:$0xff] }
 0x53d   :  { %2600 = vmatpush2.bf16.msra.mxu1 %v7124_v45  ;;  %v7144_v45 = vld [vmem:[#allocation144_spill] sm:$0xff] }
 0x53e   :  { %2710 = vmatprep.subr.bf16.mxu1 %v7125_v54  ;;  %2700 = vmatpush2.bf16.msra.mxu0 %v7126_v52  ;;  %v7145_v54 = vld [vmem:[#allocation145_spill] sm:$0xff]  ;;  %v7146_v52 = vld [vmem:[#allocation146_spill] sm:$0xff] }
 0x53f   :  { %2751 = vmatprep.subr.bf16.mxu0 %v7127_v55  ;;  %v7147_v55 = vld [vmem:[#allocation147_spill] sm:$0xff] }
 0x540   :  { %2602 = vmatmul.mubr.bf16.vlgmr.msra.gmra.mxu1 %v5747_v42  ;;  %v7138_v42 = vld [vmem:[#allocation138_spill] sm:$0xff] }
 0x541   :  { %2711 = vmatpush1.bf16.msra.mxu1 %v7128_v60  ;;  %v7148_v60 = vld [vmem:[#allocation148_spill] sm:$0xff] }
 0x542   :  { %2712 = vmatprep.subr.bf16.mxu1 %v7129_v59  ;;  %v7149_v59 = vld [vmem:[#allocation149_spill] sm:$0xff] }
 0x545   :  { %2713 = vmatpush1.bf16.msra.mxu1 %v7130_v58  ;;  %v7150_v58 = vld [vmem:[#allocation150_spill] sm:$0xff] }
 0x546   :  { %2714 = vmatprep.subr.bf16.mxu1 %v7131_v63  ;;  %v7151_v63 = vld [vmem:[#allocation151_spill] sm:$0xff] }
 0x549   :  { %2715 = vmatpush1.bf16.msra.mxu1 %v7132_v46  ;;  %v7152_v46 = vld [vmem:[#allocation152_spill] sm:$0xff] }
 0x54a   :  { %2716 = vmatprep.subr.bf16.mxu1 %v7133_v3  ;;  %v7153_v3 = vld [vmem:[#allocation153_spill] sm:$0xff] }
 0x54d   :  { %2717 = vmatpush1.bf16.msra.mxu1 %v7134_v5  ;;  %v7154_v5 = vld [vmem:[#allocation154_spill] sm:$0xff] }
 0x54e   :  { %2718 = vmatprep.subr.bf16.mxu1 %v7135_v49  ;;  %v7155_v49 = vld [vmem:[#allocation155_spill] sm:$0xff] }
 0x551   :  { %2719 = vmatpush1.bf16.msra.mxu1 %v7136_v50  ;;  %v7156_v50 = vld [vmem:[#allocation156_spill] sm:$0xff] }
 0x552   :  { %2720 = vmatprep.subr.bf16.mxu1 %v7137_v14  ;;  %v7157_v14 = vld [vmem:[#allocation157_spill] sm:$0xff] }
 0x555   :  { %2721 = vmatpush1.bf16.msra.mxu1 %v7138_v42  ;;  %v7158_v42 = vld [vmem:[#allocation158_spill] sm:$0xff] }
 0x556   :  { %2722 = vmatprep.subr.bf16.mxu1 %v7139_v2  ;;  %v7159_v2 = vld [vmem:[#allocation159_spill] sm:$0xff] }
 0x559   :  { %2723 = vmatpush1.bf16.msra.mxu1 %v7140_v57 }
 0x55a   :  { %2724 = vmatprep.subr.bf16.mxu1 %v7141_v53 }
 0x55d   :  { %2725 = vmatpush1.bf16.msra.mxu1 %v7142_v51 }
 0x55e   :  { %2726 = vmatprep.subr.bf16.mxu1 %v7143_v48 }
 0x561   :  { %2727 = vmatpush2.bf16.msra.mxu1 %v7144_v45  ;;  %v7160_v45 = vld [vmem:[#allocation160_spill] sm:$0xff] }
 0x562   :  { %2728 = vmatprep.subr.bf16.mxu1 %v7145_v54 }
 0x565   :  { %2729 = vmatpush2.bf16.msra.mxu1 %v7146_v52 }
 0x566   :  { %2730 = vmatprep.subr.bf16.mxu1 %v7147_v55 }
 0x569   :  { %2731 = vmatpush2.bf16.msra.mxu1 %v7148_v60  ;;  %v7161_v60 = vld [vmem:[#allocation161_spill] sm:$0xff] }
 0x56a   :  { %2732 = vmatprep.subr.bf16.mxu1 %v7149_v59 }
 0x56d   :  { %2733 = vmatpush2.bf16.msra.mxu1 %v7150_v58 }
 0x56e   :  { %2734 = vmatprep.subr.bf16.mxu1 %v7151_v63 }
 0x571   :  { %2735 = vmatpush2.bf16.msra.mxu1 %v7152_v46 }
 0x572   :  { %2736 = vmatprep.subr.bf16.mxu1 %v7153_v3 }
 0x575   :  { %2737 = vmatpush2.bf16.msra.mxu1 %v7154_v5 }
 0x576   :  { %2738 = vmatprep.subr.bf16.mxu1 %v7155_v49 }
 0x579   :  { %2739 = vmatpush2.bf16.msra.mxu1 %v7156_v50 }
 0x57a   :  { %2740 = vmatprep.subr.bf16.mxu1 %v7157_v14 }
 0x57d   :  { %2741 = vmatpush2.bf16.msra.mxu1 %v7158_v42 }
 0x57e   :  { %2792 = vmatprep.subr.bf16.mxu1 %v7159_v2 }
 0x580   :  { %v2480_v57 = vpop.f32.mrf.mxu0 }
 0x581   :  { %v2481_v54 = vadd.f32 %v2480_v57, %v7160_v45  ;;  %v7163_v45 = vld [vmem:[#allocation163_spill] sm:$0xff] }
 0x582   :  { %v2482_v53 = vpop.f32.mrf.mxu0 }
 0x583   :  { %v2483_v59 = vadd.f32 %v2482_v53, %v7161_v60 }
 0x584   :  { %v2484_v51 = vpop.f32.mrf.mxu0 }
 0x586   :  { %v2485_v48 = vpop.f32.mrf.mxu0 }
 0x587   :  { %v7162_v48 = vld [vmem:[#allocation162_spill] sm:$0xff] }
 0x5c0   :  { %v2521_v52 = vpop.f32.mrf.mxu1  ;;  %v2562_v55 = vpop.f32.mrf.mxu0 }
 0x5c1   :  { %v2522_v58 = vadd.f32 %v2521_v52, %v2481_v54  ;;  %v7164_v54 = vld [vmem:[#allocation164_spill] sm:$0xff] }
 0x5c2   :  { %v2523_v63 = vpop.f32.mrf.mxu1  ;;  %v2564_v46 = vpop.f32.mrf.mxu0  ;;  %v2563_v52 = vadd.f32 %v2562_v55, %v7164_v54 }
 0x5c3   :  { %v2610_v3 = vmax.f32 %v2522_v58, 0.0  ;;  %v2524_v5 = vadd.f32 %v2523_v63, %v2483_v59  ;;  %v2565_v59 = vadd.f32 %v2564_v46, %v5325_v18 }
 0x5c4   :  { %v2525_v49 = vpop.f32.mrf.mxu1  ;;  %v2566_v50 = vpop.f32.mrf.mxu0 }
 0x5c5   :  { %v2611_v14 = vmax.f32 %v2524_v5, 0.0  ;;  %v2614_v56 = vmul.f32 %v2610_v3, %v5304_v8  ;;  %v2623_v51 = vmul.f32 %v2610_v3, %v5307_v19 }
 0x5c6   :  { %v2526_v42 = vpop.f32.mrf.mxu1  ;;  %v2567_v2 = vpop.f32.mrf.mxu0 }
 0x5c7   :  { %v2615_v57 = vmul.f32 %v2611_v14, %v7162_v48  ;;  %v2624_v41 = vmul.f32 %v2611_v14, %v7163_v45 }
 0x5c9   :  { %v2618_v26 = vadd.f32 %v2615_v57, %v2614_v56  ;;  %v2627_v53 = vadd.f32 %v2624_v41, %v2623_v51 }
 0x600   :  { %v2603_v60 = vpop.f32.mrf.mxu1 }
 0x601   :  { %v2604_v58 = vadd.f32 %v2603_v60, %v2563_v52 }
 0x602   :  { %v2605_v63 = vpop.f32.mrf.mxu1 }
 0x603   :  { %v2612_v5 = vmax.f32 %v2604_v58, 0.0  ;;  %v2606_v49 = vadd.f32 %v2605_v63, %v2565_v59 }
 0x604   :  { %v2607_v50 = vpop.f32.mrf.mxu1 }
 0x605   :  { %v2616_v42 = vmul.f32 %v2612_v5, %v5333_v23  ;;  %v2625_v3 = vmul.f32 %v2612_v5, %v5337_v17  ;;  %v2613_v2 = vmax.f32 %v2606_v49, 0.0  ;;  %v7167_v5 = vld [vmem:[#allocation15_spill] sm:$0xff]  ;;  %v7168_v50 = vld [vmem:[#allocation16_spill] sm:$0xff] }
 0x606   :  { %v2608_v48 = vpop.f32.mrf.mxu1 }
 0x607   :  { %v2617_v14 = vmul.f32 %v2613_v2, %v5342_v11  ;;  %v2626_v41 = vmul.f32 %v2613_v2, %v5347_v4  ;;  %v2628_v56 = vadd.f32 %v2627_v53, %v2625_v3  ;;  %v2619_v55 = vadd.f32 %v2618_v26, %v2616_v42  ;;  %v7169_v3 = vld [vmem:[#allocation17_spill] sm:$0xff] }
 0x608   :  { %v7166_v26 = vmov 1  }
 0x609   :  { %v2629_v51 = vadd.f32 %v2628_v56, %v2626_v41  ;;  %v2620_v57 = vadd.f32 %v2619_v55, %v2617_v14  ;;  %v7171_v41 = vld [vmem:[#allocation12_spill] sm:$0xff]  ;;  %v7172_v55 = vld [vmem:[#allocation13_spill] sm:$0xff] }
 0x60b   :  { %2630 = vadd.xlane.f32.xlu1 %v2629_v51  ;;  %2621 = vadd.xlane.f32.xlu0 %v2620_v57  ;;  %v7173_v51 = vld [vmem:[#allocation14_spill] sm:$0xff] }
 0x694   :  { %v2631_v60 = vpop.xlane.xlu1 %2630  ;;  %v2622_v46 = vpop.xlane.xlu0 %2621 }
 0x695   :  { %v2632_v52 = vsel %vm2228_vm0, %v2622_v46, %v2631_v60 }
 0x696   :  { %v5863_v59 = vadd.f32 %v5358_v13, %v2632_v52  ;;  %v7170_v13 = vld [vmem:[#allocation18_spill] sm:$0xff] }
 0x698   :  { %7165 = vst [vmem:[#allocation23_spill] sm:$0xff] %v5863_v59  ;;  %v2634_v48 = vmul.f32 0.5, %v5863_v59 }
 0x69a   :  { %v2635_v58 = vadd.f32 %v5369_v21, %v2634_v48 }
 0x69c   :  { %2646 = vperm.xlu1 %3707, %v2635_v58   ;;  %2638 = vperm.xlu0 %3706, %v2635_v58  }
 0x6a0   :  { %3708 = vset.pattern.permute.xlu1 %v6947_v20  ;;  %3709 = vset.pattern.permute.xlu0 %v7166_v26 }
 0x717   :  { %v2647_v53 = vpop.permute.xlu1 %2646  ;;  %v2639_v63 = vpop.permute.xlu0 %2638 }
 0x718   :  { %v2649_v49 = vmul.f32 %v2647_v53, %v7167_v5  ;;  %v2650_v42 = vmul.f32 %v2647_v53, %v7168_v50  ;;  %v2651_v2 = vmul.f32 %v2647_v53, %v7169_v3  ;;  %v2652_v14 = vmul.f32 %v2647_v53, %v7170_v13 }
 0x719   :  { %v2641_v56 = vmul.f32 %v2639_v63, %v7171_v41  ;;  %v2642_v21 = vmul.f32 %v2639_v63, %v7172_v55  ;;  %v2643_v57 = vmul.f32 %v2639_v63, %v7173_v51  ;;  %v2644_v20 = vmul.f32 %v2639_v63, %v4726_v31 }
 0x71b   :  { %v2653_v60 = vadd.f32 %v2649_v49, %v2641_v56  ;;  %v2655_v46 = vadd.f32 %v2651_v2, %v2643_v57  ;;  %v2654_v52 = vadd.f32 %v2650_v42, %v2642_v21  ;;  %v2656_v48 = vadd.f32 %v2652_v14, %v2644_v20  ;;  %v7191_v49 = vld [vmem:[#allocation186_spill] sm:$0xff]  ;;  %v7193_v42 = vld [vmem:[#allocation188_spill] sm:$0xff]  ;;  %v7204_v20 = vld [vmem:[#allocation199_spill] sm:$0xff] }
 0x71c   :  { %v7195_v2 = vld [vmem:[#allocation190_spill] sm:$0xff]  ;;  %v7197_v14 = vld [vmem:[#allocation192_spill] sm:$0xff] }
 0x71d   :  { %v2658_v58 = vadd.f32 %v2654_v52, %v4741_v36  ;;  %v2660_v26 = vadd.f32 %v2656_v48, %v4744_v37  ;;  %v2657_v59 = vadd.f32 %v2653_v60, %v4747_v38  ;;  %v2659_v53 = vadd.f32 %v2655_v46, %v4750_v39  ;;  %v7199_v56 = vld [vmem:[#allocation194_spill] sm:$0xff]  ;;  %v7201_v21 = vld [vmem:[#allocation196_spill] sm:$0xff]  ;;  %v7206_v46 = vld [vmem:[#allocation201_spill] sm:$0xff] }
 0x71e   :  { %v7203_v57 = vld [vmem:[#allocation198_spill] sm:$0xff]  ;;  %v7205_v60 = vld [vmem:[#allocation200_spill] sm:$0xff]  ;;  %v7208_v48 = vld [vmem:[#allocation203_spill] sm:$0xff] }
 0x71f   :  { %v2662_v13 = vmax.f32 %v2658_v58, 0.0  ;;  %v2664_v41 = vmax.f32 %v2660_v26, 0.0  ;;  %v2661_v3 = vmax.f32 %v2657_v59, 0.0  ;;  %v2663_v55 = vmax.f32 %v2659_v53, 0.0  ;;  %v7190_v59 = vld [vmem:[#allocation185_spill] sm:$0xff]  ;;  %v7207_v52 = vld [vmem:[#allocation202_spill] sm:$0xff] }
 0x720   :  { %v7209_v58 = vld [vmem:[#allocation204_spill] sm:$0xff]  ;;  %v7210_v26 = vld [vmem:[#allocation205_spill] sm:$0xff]  ;;  %v7211_v53 = vld [vmem:[#allocation206_spill] sm:$0xff] }
 0x721   :  { %v2666_v50 = vpack.c.bf16 %v2662_v13, %v2662_v13  ;;  %v2668_v51 = vpack.c.bf16 %v2664_v41, %v2664_v41  ;;  %v5881_v5 = vpack.c.bf16 %v2661_v3, %v2661_v3  ;;  %v5883_v63 = vpack.c.bf16 %v2663_v55, %v2663_v55  ;;  %v7194_v3 = vld [vmem:[#allocation189_spill] sm:$0xff]  ;;  %v7196_v13 = vld [vmem:[#allocation191_spill] sm:$0xff] }
 0x722   :  { %v7198_v41 = vld [vmem:[#allocation193_spill] sm:$0xff]  ;;  %v7200_v55 = vld [vmem:[#allocation195_spill] sm:$0xff] }
 0x723   :  { %2701 = vmatprep.mubr.bf16.mxu0 %v2666_v50  ;;  %2742 = vmatprep.mubr.bf16.mxu1 %v2668_v51 }
 0x724   :  { %2702 = vmatmul.mubr.bf16.vlgmr.msra.gmra.mxu0 %v5881_v5  ;;  %2743 = vmatmul.mubr.bf16.vlgmr.msra.gmra.mxu1 %v5883_v63 }
 0x725   :  { %2752 = vmatpush1.bf16.msra.mxu0 %v5392_v12  ;;  %2793 = vmatpush1.bf16.msra.mxu1 %v5395_v44  ;;  %v7174_v12 = vld [vmem:[#allocation169_spill] sm:$0xff]  ;;  %v7175_v44 = vld [vmem:[#allocation170_spill] sm:$0xff] }
 0x726   :  { %2783 = vmatprep.mubr.bf16.mxu0 %v2666_v50  ;;  %2824 = vmatprep.mubr.bf16.mxu1 %v2668_v51  ;;  %v7192_v50 = vld [vmem:[#allocation187_spill] sm:$0xff]  ;;  %v7202_v51 = vld [vmem:[#allocation197_spill] sm:$0xff] }
 0x727   :  { %2753 = vmatprep.subr.bf16.mxu0 %v5398_v28  ;;  %2794 = vmatprep.subr.bf16.mxu1 %v5401_v29  ;;  %v7176_v28 = vld [vmem:[#allocation171_spill] sm:$0xff]  ;;  %v7177_v29 = vld [vmem:[#allocation172_spill] sm:$0xff] }
 0x729   :  { %2754 = vmatpush1.bf16.msra.mxu0 %v5404_v33  ;;  %2795 = vmatpush1.bf16.msra.mxu1 %v5407_v34  ;;  %v7178_v33 = vld [vmem:[#allocation173_spill] sm:$0xff]  ;;  %v7179_v34 = vld [vmem:[#allocation174_spill] sm:$0xff] }
 0x72a   :  { %2755 = vmatprep.subr.bf16.mxu0 %v5410_v35  ;;  %2796 = vmatprep.subr.bf16.mxu1 %v5413_v30  ;;  %v7180_v35 = vld [vmem:[#allocation175_spill] sm:$0xff]  ;;  %v7181_v30 = vld [vmem:[#allocation176_spill] sm:$0xff] }
 0x72d   :  { %2756 = vmatpush1.bf16.msra.mxu0 %v5416_v32  ;;  %2797 = vmatpush1.bf16.msra.mxu1 %v5419_v6  ;;  %v7182_v32 = vld [vmem:[#allocation177_spill] sm:$0xff]  ;;  %v7183_v6 = vld [vmem:[#allocation178_spill] sm:$0xff] }
 0x72e   :  { %2757 = vmatprep.subr.bf16.mxu0 %v5422_v7  ;;  %2798 = vmatprep.subr.bf16.mxu1 %v5425_v16  ;;  %v7184_v7 = vld [vmem:[#allocation179_spill] sm:$0xff]  ;;  %v7185_v16 = vld [vmem:[#allocation180_spill] sm:$0xff] }
 0x731   :  { %2758 = vmatpush1.bf16.msra.mxu0 %v5428_v22  ;;  %2799 = vmatpush1.bf16.msra.mxu1 %v5431_v10  ;;  %v7186_v22 = vld [vmem:[#allocation181_spill] sm:$0xff]  ;;  %v7187_v10 = vld [vmem:[#allocation182_spill] sm:$0xff] }
 0x732   :  { %2759 = vmatprep.subr.bf16.mxu0 %v5434_v9  ;;  %2800 = vmatprep.subr.bf16.mxu1 %v5437_v62  ;;  %v7188_v9 = vld [vmem:[#allocation183_spill] sm:$0xff]  ;;  %v7189_v62 = vld [vmem:[#allocation184_spill] sm:$0xff] }
 0x735   :  { %2760 = vmatpush1.bf16.msra.mxu0 %v7174_v12  ;;  %2801 = vmatpush1.bf16.msra.mxu1 %v7175_v44  ;;  %v7212_v12 = vld [vmem:[#allocation207_spill] sm:$0xff]  ;;  %v7213_v44 = vld [vmem:[#allocation208_spill] sm:$0xff] }
 0x736   :  { %2761 = vmatprep.subr.bf16.mxu0 %v7176_v28  ;;  %2802 = vmatprep.subr.bf16.mxu1 %v7177_v29  ;;  %v7214_v28 = vld [vmem:[#allocation209_spill] sm:$0xff]  ;;  %v7215_v29 = vld [vmem:[#allocation210_spill] sm:$0xff] }
 0x739   :  { %2762 = vmatpush1.bf16.msra.mxu0 %v7178_v33  ;;  %2803 = vmatpush1.bf16.msra.mxu1 %v7179_v34  ;;  %v7216_v33 = vld [vmem:[#allocation211_spill] sm:$0xff]  ;;  %v7217_v34 = vld [vmem:[#allocation212_spill] sm:$0xff] }
 0x73a   :  { %2763 = vmatprep.subr.bf16.mxu0 %v7180_v35  ;;  %2804 = vmatprep.subr.bf16.mxu1 %v7181_v30  ;;  %v7218_v35 = vld [vmem:[#allocation213_spill] sm:$0xff]  ;;  %v7219_v30 = vld [vmem:[#allocation214_spill] sm:$0xff] }
 0x73d   :  { %2764 = vmatpush1.bf16.msra.mxu0 %v7182_v32  ;;  %2805 = vmatpush1.bf16.msra.mxu1 %v7183_v6  ;;  %v7220_v32 = vld [vmem:[#allocation215_spill] sm:$0xff]  ;;  %v7221_v6 = vld [vmem:[#allocation216_spill] sm:$0xff] }
 0x73e   :  { %2765 = vmatprep.subr.bf16.mxu0 %v7184_v7  ;;  %2806 = vmatprep.subr.bf16.mxu1 %v7185_v16  ;;  %v7222_v7 = vld [vmem:[#allocation217_spill] sm:$0xff]  ;;  %v7224_v16 = vld [vmem:[#allocation219_spill] sm:$0xff] }
 0x741   :  { %2766 = vmatpush1.bf16.msra.mxu0 %v7186_v22  ;;  %2807 = vmatpush1.bf16.msra.mxu1 %v7187_v10  ;;  %v7225_v22 = vld [vmem:[#allocation220_spill] sm:$0xff]  ;;  %v7226_v10 = vld [vmem:[#allocation221_spill] sm:$0xff] }
 0x742   :  { %2767 = vmatprep.subr.bf16.mxu0 %v7188_v9  ;;  %2808 = vmatprep.subr.bf16.mxu1 %v7189_v62  ;;  %v7227_v9 = vld [vmem:[#allocation222_spill] sm:$0xff]  ;;  %v7228_v62 = vld [vmem:[#allocation223_spill] sm:$0xff] }
 0x745   :  { %2768 = vmatpush2.bf16.msra.mxu0 %v7190_v59  ;;  %2809 = vmatpush2.bf16.msra.mxu1 %v7191_v49  ;;  %v7232_v59 = vld [vmem:[#allocation227_spill] sm:$0xff]  ;;  %v7233_v49 = vld [vmem:[#allocation228_spill] sm:$0xff] }
 0x746   :  { %2769 = vmatprep.subr.bf16.mxu0 %v7192_v50  ;;  %2810 = vmatprep.subr.bf16.mxu1 %v7193_v42  ;;  %v7234_v50 = vld [vmem:[#allocation229_spill] sm:$0xff]  ;;  %v7235_v42 = vld [vmem:[#allocation230_spill] sm:$0xff] }
 0x749   :  { %2770 = vmatpush2.bf16.msra.mxu0 %v7194_v3  ;;  %2811 = vmatpush2.bf16.msra.mxu1 %v7195_v2  ;;  %v7236_v3 = vld [vmem:[#allocation231_spill] sm:$0xff]  ;;  %v5972_v2 = vld [vmem:[#allocation7 + $0x244] ss:$16 sps:$4 sm:$0xff]  }
 0x74a   :  { %2771 = vmatprep.subr.bf16.mxu0 %v7196_v13  ;;  %2812 = vmatprep.subr.bf16.mxu1 %v7197_v14  ;;  %v5976_v13 = vld [vmem:[#allocation7 + $0x240] ss:$16 sps:$4 sm:$0xff]   ;;  %v5988_v14 = vld [vmem:[#allocation7 + $0x204] ss:$16 sps:$4 sm:$0xff]  }
 0x74d   :  { %2772 = vmatpush2.bf16.msra.mxu0 %v7198_v41  ;;  %2813 = vmatpush2.bf16.msra.mxu1 %v7199_v56  ;;  %v5996_v41 = vld [vmem:[#allocation7 + $0x3e4] ss:$16 sps:$4 sm:$0xff]   ;;  %v6000_v56 = vld [vmem:[#allocation7 + $0x3e0] ss:$16 sps:$4 sm:$0xff]  }
 0x74e   :  { %2773 = vmatprep.subr.bf16.mxu0 %v7200_v55  ;;  %2814 = vmatprep.subr.bf16.mxu1 %v7201_v21  ;;  %v6004_v55 = vld [vmem:[#allocation7 + $0x3c4] ss:$16 sps:$4 sm:$0xff]   ;;  %v6008_v21 = vld [vmem:[#allocation7 + $0x3c0] ss:$16 sps:$4 sm:$0xff]  }
 0x751   :  { %2774 = vmatpush2.bf16.msra.mxu0 %v7202_v51  ;;  %2815 = vmatpush2.bf16.msra.mxu1 %v7203_v57  ;;  %v7241_v51 = vld [vmem:[#allocation236_spill] sm:$0xff] }
 0x752   :  { %2775 = vmatprep.subr.bf16.mxu0 %v7204_v20  ;;  %2816 = vmatprep.subr.bf16.mxu1 %v7205_v60  ;;  %v6012_v57 = vld [vmem:[#allocation7 + $0x3a4] ss:$16 sps:$4 sm:$0xff]   ;;  %v7242_v20 = vld [vmem:[#allocation237_spill] sm:$0xff]  ;;  %v6016_v60 = vld [vmem:[#allocation7 + $0x3a0] ss:$16 sps:$4 sm:$0xff]  }
 0x755   :  { %2776 = vmatpush2.bf16.msra.mxu0 %v7206_v46  ;;  %2817 = vmatpush2.bf16.msra.mxu1 %v7207_v52  ;;  %v7243_v46 = vld [vmem:[#allocation238_spill] sm:$0xff] }
 0x756   :  { %2777 = vmatprep.subr.bf16.mxu0 %v7208_v48  ;;  %2818 = vmatprep.subr.bf16.mxu1 %v7209_v58  ;;  %v6020_v52 = vld [vmem:[#allocation7 + $0x384] ss:$16 sps:$4 sm:$0xff]   ;;  %v6023_v48 = vld [vmem:[#allocation7 + $0x180] ss:$16 sps:$4 sm:$0xff]  }
 0x757   :  { %v6026_v58 = vld [vmem:[#allocation7 + $0x380] ss:$16 sps:$4 sm:$0xff]  }
 0x759   :  { %2778 = vmatpush2.bf16.msra.mxu0 %v7210_v26  ;;  %2819 = vmatpush2.bf16.msra.mxu1 %v7211_v53  ;;  %v6029_v26 = vld [vmem:[#allocation7 + $0x164] ss:$16 sps:$4 sm:$0xff]  }
 0x75a   :  { %2779 = vmatprep.subr.bf16.mxu0 %v7212_v12  ;;  %2820 = vmatprep.subr.bf16.mxu1 %v7213_v44  ;;  %v6032_v53 = vld [vmem:[#allocation7 + $0x364] ss:$16 sps:$4 sm:$0xff]   ;;  %v6035_v12 = vld [vmem:[#allocation7 + $0x160] ss:$16 sps:$4 sm:$0xff]  }
 0x75b   :  { %v6038_v44 = vld [vmem:[#allocation7 + $0x360] ss:$16 sps:$4 sm:$0xff]  }
 0x75d   :  { %2780 = vmatpush2.bf16.msra.mxu0 %v7214_v28  ;;  %2821 = vmatpush2.bf16.msra.mxu1 %v7215_v29  ;;  %v6041_v28 = vld [vmem:[#allocation7 + $0x144] ss:$16 sps:$4 sm:$0xff]  }
 0x75e   :  { %2781 = vmatprep.subr.bf16.mxu0 %v5566_v15  ;;  %2822 = vmatprep.subr.bf16.mxu1 %v7216_v33  ;;  %v7223_v15 = vld [vmem:[#allocation218_spill] sm:$0xff] }
 0x75f   :  { %v6044_v29 = vld [vmem:[#allocation7 + $0x344] ss:$16 sps:$4 sm:$0xff]   ;;  %v6047_v33 = vld [vmem:[#allocation7 + $0x140] ss:$16 sps:$4 sm:$0xff]  }
 0x761   :  { %2782 = vmatpush2.bf16.msra.mxu0 %v7217_v34  ;;  %2823 = vmatpush2.bf16.msra.mxu1 %v7218_v35  ;;  %v6050_v34 = vld [vmem:[#allocation7 + $0x340] ss:$16 sps:$4 sm:$0xff]   ;;  %v6053_v35 = vld [vmem:[#allocation7 + $0x124] ss:$16 sps:$4 sm:$0xff]  }
 0x762   :  { %2841 = vmatprep.subr.bf16.mxu0 %v7219_v30  ;;  %2882 = vmatprep.subr.bf16.mxu1 %v7220_v32  ;;  %v6056_v30 = vld [vmem:[#allocation7 + $0x324] ss:$16 sps:$4 sm:$0xff]   ;;  %v6059_v32 = vld [vmem:[#allocation7 + $0x120] ss:$16 sps:$4 sm:$0xff]  }
 0x764   :  { %2784 = vmatmul.mubr.bf16.vlgmr.msra.gmra.mxu0 %v5881_v5  ;;  %2825 = vmatmul.mubr.bf16.vlgmr.msra.gmra.mxu1 %v5883_v63  ;;  %v7229_v5 = vld [vmem:[#allocation224_spill] sm:$0xff]  ;;  %v7230_v63 = vld [vmem:[#allocation225_spill] sm:$0xff] }
 0x765   :  { %2842 = vmatpush1.bf16.msra.mxu0 %v5586_v61  ;;  %2883 = vmatpush1.bf16.msra.mxu1 %v7221_v6  ;;  %v7231_v61 = vld [vmem:[#allocation226_spill] sm:$0xff] }
 0x766   :  { %2843 = vmatprep.subr.bf16.mxu0 %v7222_v7  ;;  %2884 = vmatprep.subr.bf16.mxu1 %v7223_v15  ;;  %v6062_v6 = vld [vmem:[#allocation7 + $0x320] ss:$16 sps:$4 sm:$0xff]   ;;  %v6065_v7 = vld [vmem:[#allocation7 + $0x104] ss:$16 sps:$4 sm:$0xff]  }
 0x767   :  { %7244 = vst [vmem:[#allocation19_spill] sm:$0xff] %v6065_v7  ;;  %v6068_v15 = vld [vmem:[#allocation7 + $0x304] ss:$16 sps:$4 sm:$0xff]  }
 0x768   :  { %7245 = vst [vmem:[#allocation24_spill] sm:$0xff] %v6068_v15 }
 0x769   :  { %2844 = vmatpush1.bf16.msra.mxu0 %v7224_v16  ;;  %2885 = vmatpush1.bf16.msra.mxu1 %v7225_v22  ;;  %v6071_v16 = vld [vmem:[#allocation7 + $0x100] ss:$16 sps:$4 sm:$0xff]  }
 0x76a   :  { %2845 = vmatprep.subr.bf16.mxu0 %v7226_v10  ;;  %2886 = vmatprep.subr.bf16.mxu1 %v7227_v9  ;;  %7246 = vst [vmem:[#allocation20_spill] sm:$0xff] %v6071_v16  ;;  %v6074_v22 = vld [vmem:[#allocation7 + $0x300] ss:$16 sps:$4 sm:$0xff]   ;;  %v6077_v10 = vld [vmem:[#allocation7 + $0xec] ss:$16 sps:$4 sm:$0xff]  }
 0x76b   :  { %7247 = vst [vmem:[#allocation25_spill] sm:$0xff] %v6074_v22  ;;  %7248 = vst [vmem:[#allocation21_spill] sm:$0xff] %v6077_v10  ;;  %v6080_v9 = vld [vmem:[#allocation7 + $0x2ec] ss:$16 sps:$4 sm:$0xff]  }
 0x76c   :  { %7249 = vst [vmem:[#allocation26_spill] sm:$0xff] %v6080_v9 }
 0x76d   :  { %2846 = vmatpush1.bf16.msra.mxu0 %v7228_v62  ;;  %2887 = vmatpush1.bf16.msra.mxu1 %v7229_v5 }
 0x76e   :  { %2847 = vmatprep.subr.bf16.mxu0 %v7230_v63  ;;  %2888 = vmatprep.subr.bf16.mxu1 %v7231_v61  ;;  %v7250_v63 = vld [vmem:[#allocation28_spill] sm:$0xff] }
 0x771   :  { %2848 = vmatpush1.bf16.msra.mxu0 %v7232_v59  ;;  %2889 = vmatpush1.bf16.msra.mxu1 %v7233_v49 }
 0x772   :  { %2849 = vmatprep.subr.bf16.mxu0 %v5628_v0  ;;  %2890 = vmatprep.subr.bf16.mxu1 %v7234_v50  ;;  %v5980_v0 = vld [vmem:[#allocation7 + $0x224] ss:$16 sps:$4 sm:$0xff]  }
 0x775   :  { %2850 = vmatpush1.bf16.msra.mxu0 %v7235_v42  ;;  %2891 = vmatpush1.bf16.msra.mxu1 %v5637_v24  ;;  %v5984_v24 = vld [vmem:[#allocation7 + $0x220] ss:$16 sps:$4 sm:$0xff]   ;;  %v7251_v42 = vld [vmem:[#allocation29_spill] sm:$0xff] }
 0x776   :  { %2851 = vmatprep.subr.bf16.mxu0 %v7236_v3  ;;  %2892 = vmatprep.subr.bf16.mxu1 %v5972_v2 }
 0x779   :  { %2852 = vmatpush1.bf16.msra.mxu0 %v5644_v47  ;;  %2893 = vmatpush1.bf16.msra.mxu1 %v5976_v13  ;;  %v5992_v47 = vld [vmem:[#allocation7 + $0x200] ss:$16 sps:$4 sm:$0xff]  }
 0x77a   :  { %2853 = vmatprep.subr.bf16.mxu0 %v5648_v43  ;;  %2894 = vmatprep.subr.bf16.mxu1 %v5980_v0  ;;  %v7237_v43 = vld [vmem:[#allocation232_spill] sm:$0xff] }
 0x77d   :  { %2854 = vmatpush1.bf16.msra.mxu0 %v5652_v27  ;;  %2895 = vmatpush1.bf16.msra.mxu1 %v5984_v24  ;;  %v7238_v27 = vld [vmem:[#allocation233_spill] sm:$0xff] }
 0x77e   :  { %2855 = vmatprep.subr.bf16.mxu0 %v5656_v1  ;;  %2896 = vmatprep.subr.bf16.mxu1 %v5988_v14  ;;  %v7239_v1 = vld [vmem:[#allocation234_spill] sm:$0xff] }
 0x781   :  { %2856 = vmatpush1.bf16.msra.mxu0 %v5660_v25  ;;  %2897 = vmatpush1.bf16.msra.mxu1 %v5992_v47  ;;  %v7240_v25 = vld [vmem:[#allocation235_spill] sm:$0xff] }
 0x782   :  { %2857 = vmatprep.subr.bf16.mxu0 %v7237_v43  ;;  %2898 = vmatprep.subr.bf16.mxu1 %v5996_v41 }
 0x785   :  { %2858 = vmatpush2.bf16.msra.mxu0 %v7238_v27  ;;  %2899 = vmatpush2.bf16.msra.mxu1 %v6000_v56 }
 0x786   :  { %2859 = vmatprep.subr.bf16.mxu0 %v7239_v1  ;;  %2900 = vmatprep.subr.bf16.mxu1 %v6004_v55 }
 0x789   :  { %2860 = vmatpush2.bf16.msra.mxu0 %v7240_v25  ;;  %2901 = vmatpush2.bf16.msra.mxu1 %v6008_v21 }
 0x78a   :  { %2861 = vmatprep.subr.bf16.mxu0 %v7241_v51  ;;  %2902 = vmatprep.subr.bf16.mxu1 %v6012_v57 }
 0x78d   :  { %2862 = vmatpush2.bf16.msra.mxu0 %v7242_v20  ;;  %2903 = vmatpush2.bf16.msra.mxu1 %v6016_v60 }
 0x78e   :  { %2863 = vmatprep.subr.bf16.mxu0 %v7243_v46  ;;  %2904 = vmatprep.subr.bf16.mxu1 %v6020_v52 }
 0x791   :  { %2864 = vmatpush2.bf16.msra.mxu0 %v6023_v48  ;;  %2905 = vmatpush2.bf16.msra.mxu1 %v6026_v58 }
 0x792   :  { %2865 = vmatprep.subr.bf16.mxu0 %v6029_v26  ;;  %2906 = vmatprep.subr.bf16.mxu1 %v6032_v53 }
 0x795   :  { %2866 = vmatpush2.bf16.msra.mxu0 %v6035_v12  ;;  %2907 = vmatpush2.bf16.msra.mxu1 %v6038_v44 }
 0x796   :  { %2867 = vmatprep.subr.bf16.mxu0 %v6041_v28  ;;  %2908 = vmatprep.subr.bf16.mxu1 %v6044_v29 }
 0x799   :  { %2868 = vmatpush2.bf16.msra.mxu0 %v6047_v33  ;;  %2909 = vmatpush2.bf16.msra.mxu1 %v6050_v34 }
 0x79a   :  { %2869 = vmatprep.subr.bf16.mxu0 %v6053_v35  ;;  %2910 = vmatprep.subr.bf16.mxu1 %v6056_v30 }
 0x79d   :  { %2870 = vmatpush2.bf16.msra.mxu0 %v6059_v32  ;;  %2911 = vmatpush2.bf16.msra.mxu1 %v6062_v6 }
 0x79e   :  { %2871 = vmatprep.subr.bf16.mxu0 %v6065_v7  ;;  %2912 = vmatprep.subr.bf16.mxu1 %v6068_v15 }
 0x7a1   :  { %2872 = vmatpush2.bf16.msra.mxu0 %v6071_v16  ;;  %2913 = vmatpush2.bf16.msra.mxu1 %v6074_v22 }
 0x7a2   :  { %2923 = vmatprep.subr.bf16.mxu0 %v6077_v10  ;;  %2964 = vmatprep.subr.bf16.mxu1 %v6080_v9  ;;  %v6088_v9 = vld [vmem:[#allocation7 + $0xe8] ss:$16 sps:$4 sm:$0xff]  }
 0x7a3   :  { %7252 = vst [vmem:[#allocation22_spill] sm:$0xff] %v6088_v9 }
 0x7e4   :  { %v2703_v62 = vpop.f32.mrf.mxu0  ;;  %v2744_v5 = vpop.f32.mrf.mxu1 }
 0x7e5   :  { %v2704_v61 = vadd.f32 %v2703_v62, %v7250_v63  ;;  %v6091_v62 = vld [vmem:[#allocation7 + $0xcc] ss:$16 sps:$4 sm:$0xff]  }
 0x7e6   :  { %v2705_v59 = vpop.f32.mrf.mxu0  ;;  %v2746_v49 = vpop.f32.mrf.mxu1  ;;  %7253 = vst [vmem:[#allocation27_spill] sm:$0xff] %v6091_v62 }
 0x7e7   :  { %v2745_v50 = vadd.f32 %v2744_v5, %v2704_v61  ;;  %v2706_v3 = vadd.f32 %v2705_v59, %v7251_v42  ;;  %v6094_v5 = vld [vmem:[#allocation7 + $0xc8] ss:$16 sps:$4 sm:$0xff]   ;;  %v6097_v61 = vld [vmem:[#allocation7 + $0xac] ss:$16 sps:$4 sm:$0xff]  }
 0x7e8   :  { %v2707_v43 = vpop.f32.mrf.mxu0  ;;  %v2748_v27 = vpop.f32.mrf.mxu1  ;;  %7254 = vst [vmem:[#allocation30_spill] sm:$0xff] %v6094_v5  ;;  %7255 = vst [vmem:[#allocation31_spill] sm:$0xff] %v6097_v61  ;;  %v6100_v59 = vld [vmem:[#allocation7 + $0xa8] ss:$16 sps:$4 sm:$0xff]  }
 0x7e9   :  { %v2747_v1 = vadd.f32 %v2746_v49, %v2706_v3  ;;  %v2833_v25 = vmax.f32 %v2745_v50, 0.0  ;;  %7256 = vst [vmem:[#allocation32_spill] sm:$0xff] %v6100_v59  ;;  %v6103_v49 = vld [vmem:[#allocation7 + $0x8c] ss:$16 sps:$4 sm:$0xff]   ;;  %v6112_v3 = vld [vmem:[#allocation7 + $0x68] ss:$16 sps:$4 sm:$0xff]  }
 0x7ea   :  { %v2708_v51 = vpop.f32.mrf.mxu0  ;;  %v2749_v20 = vpop.f32.mrf.mxu1  ;;  %7257 = vst [vmem:[#allocation33_spill] sm:$0xff] %v6103_v49  ;;  %v6109_v50 = vld [vmem:[#allocation7 + $0x6c] ss:$16 sps:$4 sm:$0xff]   ;;  %7260 = vst [vmem:[#allocation36_spill] sm:$0xff] %v6112_v3  ;;  %v6118_v27 = vld [vmem:[#allocation7 + $0x48] ss:$16 sps:$4 sm:$0xff]  }
 0x7eb   :  { %v2834_v46 = vmax.f32 %v2747_v1, 0.0  ;;  %v6085_v22 = vpack.c.bf16 %v2833_v25, %v2833_v25  ;;  %7259 = vst [vmem:[#allocation35_spill] sm:$0xff] %v6109_v50  ;;  %v6115_v43 = vld [vmem:[#allocation7 + $0x4c] ss:$16 sps:$4 sm:$0xff]   ;;  %7262 = vst [vmem:[#allocation38_spill] sm:$0xff] %v6118_v27 }
 0x7ec   :  { %7261 = vst [vmem:[#allocation37_spill] sm:$0xff] %v6115_v43  ;;  %v6121_v1 = vld [vmem:[#allocation7 + $0x2c] ss:$16 sps:$4 sm:$0xff]   ;;  %v6124_v25 = vld [vmem:[#allocation7 + $0x28] ss:$16 sps:$4 sm:$0xff]  }
 0x7ed   :  { %v2838_v10 = vpack.c.bf16 %v2834_v46, %v2834_v46  ;;  %7263 = vst [vmem:[#allocation39_spill] sm:$0xff] %v6121_v1  ;;  %7264 = vst [vmem:[#allocation40_spill] sm:$0xff] %v6124_v25  ;;  %v6127_v51 = vld [vmem:[#allocation7 + $0xc] ss:$16 sps:$4 sm:$0xff]   ;;  %v6130_v20 = vld [vmem:[#allocation7 + $0x8] ss:$16 sps:$4 sm:$0xff]  }
 0x7ee   :  { %7265 = vst [vmem:[#allocation41_spill] sm:$0xff] %v6127_v51  ;;  %7266 = vst [vmem:[#allocation42_spill] sm:$0xff] %v6130_v20  ;;  %v6133_v46 = vld [vmem:[#allocation7 + $0x1ec] ss:$16 sps:$4 sm:$0xff]  }
 0x7ef   :  { %2873 = vmatprep.mubr.bf16.mxu0 %v2838_v10  ;;  %7267 = vst [vmem:[#allocation43_spill] sm:$0xff] %v6133_v46 }
 0x7f0   :  { %2874 = vmatmul.mubr.bf16.vlgmr.msra.gmra.mxu0 %v6085_v22 }
 0x7f1   :  { %2924 = vmatpush1.bf16.msra.mxu0 %v6088_v9  ;;  %2955 = vmatprep.mubr.bf16.mxu0 %v2838_v10  ;;  %v6106_v10 = vld [vmem:[#allocation7 + $0x88] ss:$16 sps:$4 sm:$0xff]  }
 0x7f2   :  { %2925 = vmatprep.subr.bf16.mxu0 %v6091_v62  ;;  %7258 = vst [vmem:[#allocation34_spill] sm:$0xff] %v6106_v10  ;;  %v6174_v62 = vld [vmem:[#allocation7 + $0x128] ss:$16 sps:$4 sm:$0xff]  }
 0x7f3   :  { %7282 = vst [vmem:[#allocation57_spill] sm:$0xff] %v6174_v62 }
 0x7f5   :  { %2926 = vmatpush1.bf16.msra.mxu0 %v6094_v5 }
 0x7f6   :  { %2927 = vmatprep.subr.bf16.mxu0 %v6097_v61 }
 0x7f9   :  { %2928 = vmatpush1.bf16.msra.mxu0 %v6100_v59 }
 0x7fa   :  { %2929 = vmatprep.subr.bf16.mxu0 %v6103_v49  ;;  %v6170_v49 = vld [vmem:[#allocation7 + $0x12c] ss:$16 sps:$4 sm:$0xff]  }
 0x7fb   :  { %7280 = vst [vmem:[#allocation55_spill] sm:$0xff] %v6170_v49 }
 0x7fd   :  { %2930 = vmatpush1.bf16.msra.mxu0 %v6106_v10 }
 0x7fe   :  { %2931 = vmatprep.subr.bf16.mxu0 %v6109_v50  ;;  %v6167_v50 = vld [vmem:[#allocation7 + $0x148] ss:$16 sps:$4 sm:$0xff]  }
 0x7ff   :  { %7279 = vst [vmem:[#allocation54_spill] sm:$0xff] %v6167_v50 }
 0x801   :  { %2932 = vmatpush1.bf16.msra.mxu0 %v6112_v3  ;;  %v7278_v3 = vld [vmem:[#allocation56_spill] sm:$0xff] }
 0x802   :  { %2933 = vmatprep.subr.bf16.mxu0 %v6115_v43 }
 0x805   :  { %2934 = vmatpush1.bf16.msra.mxu0 %v6118_v27  ;;  %v6136_v27 = vld [vmem:[#allocation7 + $0x1e8] ss:$16 sps:$4 sm:$0xff]  }
 0x806   :  { %2935 = vmatprep.subr.bf16.mxu0 %v6121_v1  ;;  %7268 = vst [vmem:[#allocation44_spill] sm:$0xff] %v6136_v27  ;;  %v6139_v1 = vld [vmem:[#allocation7 + $0x1cc] ss:$16 sps:$4 sm:$0xff]  }
 0x807   :  { %7269 = vst [vmem:[#allocation45_spill] sm:$0xff] %v6139_v1 }
 0x809   :  { %2936 = vmatpush1.bf16.msra.mxu0 %v6124_v25  ;;  %v6142_v25 = vld [vmem:[#allocation7 + $0x1c8] ss:$16 sps:$4 sm:$0xff]  }
 0x80a   :  { %2937 = vmatprep.subr.bf16.mxu0 %v6127_v51  ;;  %7270 = vst [vmem:[#allocation46_spill] sm:$0xff] %v6142_v25  ;;  %v6145_v51 = vld [vmem:[#allocation7 + $0x1ac] ss:$16 sps:$4 sm:$0xff]  }
 0x80b   :  { %7271 = vst [vmem:[#allocation47_spill] sm:$0xff] %v6145_v51 }
 0x80d   :  { %2938 = vmatpush1.bf16.msra.mxu0 %v6130_v20  ;;  %v6148_v20 = vld [vmem:[#allocation7 + $0x1a8] ss:$16 sps:$4 sm:$0xff]  }
 0x80e   :  { %2939 = vmatprep.subr.bf16.mxu0 %v6133_v46  ;;  %7272 = vst [vmem:[#allocation48_spill] sm:$0xff] %v6148_v20  ;;  %v6151_v46 = vld [vmem:[#allocation7 + $0x18c] ss:$16 sps:$4 sm:$0xff]  }
 0x80f   :  { %7273 = vst [vmem:[#allocation49_spill] sm:$0xff] %v6151_v46 }
 0x811   :  { %2940 = vmatpush2.bf16.msra.mxu0 %v6136_v27  ;;  %v6154_v27 = vld [vmem:[#allocation7 + $0x188] ss:$16 sps:$4 sm:$0xff]  }
 0x812   :  { %2941 = vmatprep.subr.bf16.mxu0 %v6139_v1  ;;  %7274 = vst [vmem:[#allocation50_spill] sm:$0xff] %v6154_v27  ;;  %v6157_v1 = vld [vmem:[#allocation7 + $0x16c] ss:$16 sps:$4 sm:$0xff]  }
 0x813   :  { %7275 = vst [vmem:[#allocation51_spill] sm:$0xff] %v6157_v1 }
 0x815   :  { %2942 = vmatpush2.bf16.msra.mxu0 %v6142_v25  ;;  %v6160_v25 = vld [vmem:[#allocation7 + $0x168] ss:$16 sps:$4 sm:$0xff]  }
 0x816   :  { %2943 = vmatprep.subr.bf16.mxu0 %v6145_v51  ;;  %7276 = vst [vmem:[#allocation52_spill] sm:$0xff] %v6160_v25  ;;  %v6163_v51 = vld [vmem:[#allocation7 + $0x14c] ss:$16 sps:$4 sm:$0xff]  }
 0x817   :  { %7277 = vst [vmem:[#allocation53_spill] sm:$0xff] %v6163_v51 }
 0x819   :  { %2944 = vmatpush2.bf16.msra.mxu0 %v6148_v20 }
 0x81a   :  { %2945 = vmatprep.subr.bf16.mxu0 %v6151_v46 }
 0x81d   :  { %2946 = vmatpush2.bf16.msra.mxu0 %v6154_v27 }
 0x81e   :  { %2947 = vmatprep.subr.bf16.mxu0 %v6157_v1 }
 0x821   :  { %2948 = vmatpush2.bf16.msra.mxu0 %v6160_v25  ;;  %v7281_v25 = vld [vmem:[#allocation59_spill] sm:$0xff] }
 0x822   :  { %2949 = vmatprep.subr.bf16.mxu0 %v6163_v51 }
 0x824   :  { %v2785_v20 = vpop.f32.mrf.mxu0  ;;  %v2826_v43 = vpop.f32.mrf.mxu1 }
 0x825   :  { %v2786_v46 = vadd.f32 %v2785_v20, %v7278_v3  ;;  %2950 = vmatpush2.bf16.msra.mxu0 %v6167_v50  ;;  %v6177_v50 = vld [vmem:[#allocation7 + $0x10c] ss:$16 sps:$4 sm:$0xff]  }
 0x826   :  { %v2787_v27 = vpop.f32.mrf.mxu0  ;;  %v2828_v10 = vpop.f32.mrf.mxu1  ;;  %2951 = vmatprep.subr.bf16.mxu0 %v6170_v49  ;;  %7283 = vst [vmem:[#allocation58_spill] sm:$0xff] %v6177_v50  ;;  %v6180_v49 = vld [vmem:[#allocation7 + $0x108] ss:$16 sps:$4 sm:$0xff]  }
 0x827   :  { %v2827_v1 = vadd.f32 %v2826_v43, %v2786_v46  ;;  %v2788_v59 = vadd.f32 %v2787_v27, %v7281_v25  ;;  %7284 = vst [vmem:[#allocation60_spill] sm:$0xff] %v6180_v49  ;;  %v6196_v43 = vld [vmem:[#allocation7 + $0x2ac] ss:$16 sps:$4 sm:$0xff]   ;;  %v4328_v27 = vld [vmem:[#allocation4 + $0xa4] ss:$16 sps:$4 sm:$0xff]  }
 0x828   :  { %v2789_v61 = vpop.f32.mrf.mxu0  ;;  %v2830_v5 = vpop.f32.mrf.mxu1  ;;  %7288 = vst [vmem:[#allocation63_spill] sm:$0xff] %v6196_v43  ;;  %v4332_v46 = vld [vmem:[#allocation4 + $0x84] ss:$16 sps:$4 sm:$0xff]  }
 0x829   :  { %v2829_v51 = vadd.f32 %v2828_v10, %v2788_v59  ;;  %2952 = vmatpush2.bf16.msra.mxu0 %v6174_v62  ;;  %v2835_v20 = vmax.f32 %v2827_v1, 0.0  ;;  %v4320_v5 = vld [vmem:[#allocation4 + $0xe4] ss:$16 sps:$4 sm:$0xff]   ;;  %v6190_v59 = vld [vmem:[#allocation7 + $0x2cc] ss:$16 sps:$4 sm:$0xff]  }
 0x82a   :  { %v2790_v3 = vpop.f32.mrf.mxu0  ;;  %v2831_v9 = vpop.f32.mrf.mxu1  ;;  %2953 = vmatprep.subr.bf16.mxu0 %v6177_v50  ;;  %7286 = vst [vmem:[#allocation62_spill] sm:$0xff] %v6190_v59  ;;  %v4324_v10 = vld [vmem:[#allocation4 + $0xc4] ss:$16 sps:$4 sm:$0xff]   ;;  %v6202_v1 = vld [vmem:[#allocation7 + $0x28c] ss:$16 sps:$4 sm:$0xff]  }
 0x82b   :  { %v2836_v42 = vmax.f32 %v2829_v51, 0.0  ;;  %v6183_v61 = vpack.c.bf16 %v2835_v20, %v2835_v20  ;;  %v6187_v9 = vld [vmem:[#allocation7 + $0x2e8] ss:$16 sps:$4 sm:$0xff]   ;;  %7290 = vst [vmem:[#allocation68_spill] sm:$0xff] %v6202_v1  ;;  %v4331_v51 = vld [vmem:[#allocation4 + $0xa0] ss:$16 sps:$4 sm:$0xff]  }
 0x82c   :  { %7285 = vst [vmem:[#allocation61_spill] sm:$0xff] %v6187_v9  ;;  %v6193_v3 = vld [vmem:[#allocation7 + $0x2c8] ss:$16 sps:$4 sm:$0xff]  }
 0x82d   :  { %v2840_v63 = vpack.c.bf16 %v2836_v42, %v2836_v42  ;;  %2954 = vmatpush2.bf16.msra.mxu0 %v6180_v49  ;;  %v4323_v42 = vld [vmem:[#allocation4 + $0xe0] ss:$16 sps:$4 sm:$0xff]   ;;  %7287 = vst [vmem:[#allocation65_spill] sm:$0xff] %v6193_v3  ;;  %v6205_v20 = vld [vmem:[#allocation7 + $0x288] ss:$16 sps:$4 sm:$0xff]  }
 0x82e   :  { %3063 = vmatprep.subr.bf16.mxu0 %v4320_v5  ;;  %7291 = vst [vmem:[#allocation69_spill] sm:$0xff] %v6205_v20  ;;  %v6208_v5 = vld [vmem:[#allocation7 + $0x26c] ss:$16 sps:$4 sm:$0xff]  }
 0x82f   :  { %2914 = vmatprep.mubr.bf16.mxu1 %v2840_v63  ;;  %7292 = vst [vmem:[#allocation66_spill] sm:$0xff] %v6208_v5 }
 0x830   :  { %2915 = vmatmul.mubr.bf16.vlgmr.msra.gmra.mxu1 %v6183_v61  ;;  %2956 = vmatmul.mubr.bf16.vlgmr.msra.gmra.mxu0 %v6085_v22  ;;  %v4327_v22 = vld [vmem:[#allocation4 + $0xc0] ss:$16 sps:$4 sm:$0xff]  }
 0x831   :  { %2965 = vmatpush1.bf16.msra.mxu1 %v6187_v9  ;;  %2996 = vmatprep.mubr.bf16.mxu1 %v2840_v63  ;;  %v6199_v63 = vld [vmem:[#allocation7 + $0x2a8] ss:$16 sps:$4 sm:$0xff]  }
 0x832   :  { %2966 = vmatprep.subr.bf16.mxu1 %v6190_v59  ;;  %3064 = vmatpush1.bf16.msra.mxu0 %v4323_v42  ;;  %7289 = vst [vmem:[#allocation64_spill] sm:$0xff] %v6199_v63  ;;  %v4335_v42 = vld [vmem:[#allocation4 + $0x80] ss:$16 sps:$4 sm:$0xff]  }
 0x833   :  { %3065 = vmatprep.subr.bf16.mxu0 %v4324_v10  ;;  %v4336_v10 = vld [vmem:[#allocation4 + $0x64] ss:$16 sps:$4 sm:$0xff]   ;;  %v7317_v9 = vld [vmem:[#allocation161_spill] sm:$0xff] }
 0x835   :  { %2967 = vmatpush1.bf16.msra.mxu1 %v6193_v3  ;;  %v7316_v3 = vld [vmem:[#allocation160_spill] sm:$0xff] }
 0x836   :  { %2968 = vmatprep.subr.bf16.mxu1 %v6196_v43  ;;  %3066 = vmatpush1.bf16.msra.mxu0 %v4327_v22  ;;  %v6211_v22 = vld [vmem:[#allocation7 + $0x268] ss:$16 sps:$4 sm:$0xff]  }
 0x837   :  { %3067 = vmatprep.subr.bf16.mxu0 %v4328_v27  ;;  %7293 = vst [vmem:[#allocation67_spill] sm:$0xff] %v6211_v22  ;;  %v6214_v27 = vld [vmem:[#allocation7 + $0x24c] ss:$16 sps:$4 sm:$0xff]  }
 0x838   :  { %7294 = vst [vmem:[#allocation72_spill] sm:$0xff] %v6214_v27 }
 0x839   :  { %2969 = vmatpush1.bf16.msra.mxu1 %v6199_v63  ;;  %v4390_v63 = vld [vmem:[#allocation4 + $0x284] ss:$16 sps:$4 sm:$0xff]  }
 0x83a   :  { %2970 = vmatprep.subr.bf16.mxu1 %v6202_v1  ;;  %3068 = vmatpush1.bf16.msra.mxu0 %v4331_v51  ;;  %v4339_v51 = vld [vmem:[#allocation4 + $0x60] ss:$16 sps:$4 sm:$0xff]   ;;  %v4386_v1 = vld [vmem:[#allocation4 + $0x2c4] ss:$16 sps:$4 sm:$0xff]  }
 0x83b   :  { %3069 = vmatprep.subr.bf16.mxu0 %v4332_v46  ;;  %v4340_v46 = vld [vmem:[#allocation4 + $0x44] ss:$16 sps:$4 sm:$0xff]  }
 0x83d   :  { %2971 = vmatpush1.bf16.msra.mxu1 %v6205_v20  ;;  %v6217_v20 = vld [vmem:[#allocation7 + $0x248] ss:$16 sps:$4 sm:$0xff]  }
 0x83e   :  { %2972 = vmatprep.subr.bf16.mxu1 %v6208_v5  ;;  %3070 = vmatpush1.bf16.msra.mxu0 %v4335_v42  ;;  %7295 = vst [vmem:[#allocation73_spill] sm:$0xff] %v6217_v20  ;;  %v6220_v5 = vld [vmem:[#allocation7 + $0x22c] ss:$16 sps:$4 sm:$0xff]  }
 0x83f   :  { %3071 = vmatprep.subr.bf16.mxu0 %v4336_v10  ;;  %7296 = vst [vmem:[#allocation70_spill] sm:$0xff] %v6220_v5  ;;  %v4343_v42 = vld [vmem:[#allocation4 + $0x40] ss:$16 sps:$4 sm:$0xff]   ;;  %v4344_v10 = vld [vmem:[#allocation4 + $0x24] ss:$16 sps:$4 sm:$0xff]  }
 0x841   :  { %2973 = vmatpush1.bf16.msra.mxu1 %v6211_v22  ;;  %v6223_v22 = vld [vmem:[#allocation7 + $0x228] ss:$16 sps:$4 sm:$0xff]  }
 0x842   :  { %2974 = vmatprep.subr.bf16.mxu1 %v6214_v27  ;;  %3072 = vmatpush1.bf16.msra.mxu0 %v4339_v51  ;;  %7297 = vst [vmem:[#allocation71_spill] sm:$0xff] %v6223_v22  ;;  %v6226_v27 = vld [vmem:[#allocation7 + $0x20c] ss:$16 sps:$4 sm:$0xff]  }
 0x843   :  { %3073 = vmatprep.subr.bf16.mxu0 %v4340_v46  ;;  %7298 = vst [vmem:[#allocation76_spill] sm:$0xff] %v6226_v27  ;;  %v4347_v51 = vld [vmem:[#allocation4 + $0x20] ss:$16 sps:$4 sm:$0xff]   ;;  %v4348_v46 = vld [vmem:[#allocation4 + $0x4] ss:$16 sps:$4 sm:$0xff]  }
 0x845   :  { %2975 = vmatpush1.bf16.msra.mxu1 %v6217_v20  ;;  %v6229_v20 = vld [vmem:[#allocation7 + $0x208] ss:$16 sps:$4 sm:$0xff]  }
 0x846   :  { %2976 = vmatprep.subr.bf16.mxu1 %v6220_v5  ;;  %3074 = vmatpush1.bf16.msra.mxu0 %v4343_v42  ;;  %7299 = vst [vmem:[#allocation77_spill] sm:$0xff] %v6229_v20  ;;  %v6232_v5 = vld [vmem:[#allocation7 + $0x3ec] ss:$16 sps:$4 sm:$0xff]  }
 0x847   :  { %3075 = vmatprep.subr.bf16.mxu0 %v4344_v10  ;;  %7300 = vst [vmem:[#allocation74_spill] sm:$0xff] %v6232_v5  ;;  %v4351_v42 = vld [vmem:[#allocation4] ss:$16 sps:$4 sm:$0xff]   ;;  %v4352_v10 = vld [vmem:[#allocation4 + $0x1e4] ss:$16 sps:$4 sm:$0xff]  }
 0x849   :  { %2977 = vmatpush1.bf16.msra.mxu1 %v6223_v22  ;;  %v6235_v22 = vld [vmem:[#allocation7 + $0x3e8] ss:$16 sps:$4 sm:$0xff]  }
 0x84a   :  { %2978 = vmatprep.subr.bf16.mxu1 %v6226_v27  ;;  %3076 = vmatpush1.bf16.msra.mxu0 %v4347_v51  ;;  %7301 = vst [vmem:[#allocation75_spill] sm:$0xff] %v6235_v22  ;;  %v6238_v27 = vld [vmem:[#allocation7 + $0x3cc] ss:$16 sps:$4 sm:$0xff]  }
 0x84b   :  { %3077 = vmatprep.subr.bf16.mxu0 %v4348_v46  ;;  %7302 = vst [vmem:[#allocation80_spill] sm:$0xff] %v6238_v27  ;;  %v4355_v51 = vld [vmem:[#allocation4 + $0x1e0] ss:$16 sps:$4 sm:$0xff]   ;;  %v4356_v46 = vld [vmem:[#allocation4 + $0x1c4] ss:$16 sps:$4 sm:$0xff]  }
 0x84d   :  { %2979 = vmatpush1.bf16.msra.mxu1 %v6229_v20  ;;  %v6241_v20 = vld [vmem:[#allocation7 + $0x3c8] ss:$16 sps:$4 sm:$0xff]  }
 0x84e   :  { %2980 = vmatprep.subr.bf16.mxu1 %v6232_v5  ;;  %3078 = vmatpush1.bf16.msra.mxu0 %v4351_v42  ;;  %7303 = vst [vmem:[#allocation81_spill] sm:$0xff] %v6241_v20  ;;  %v6244_v5 = vld [vmem:[#allocation7 + $0x3ac] ss:$16 sps:$4 sm:$0xff]  }
 0x84f   :  { %3079 = vmatprep.subr.bf16.mxu0 %v4352_v10  ;;  %7304 = vst [vmem:[#allocation78_spill] sm:$0xff] %v6244_v5  ;;  %v4359_v42 = vld [vmem:[#allocation4 + $0x1c0] ss:$16 sps:$4 sm:$0xff]   ;;  %v4360_v10 = vld [vmem:[#allocation4 + $0x1a4] ss:$16 sps:$4 sm:$0xff]  }
 0x851   :  { %2981 = vmatpush2.bf16.msra.mxu1 %v6235_v22  ;;  %v6247_v22 = vld [vmem:[#allocation7 + $0x3a8] ss:$16 sps:$4 sm:$0xff]  }
 0x852   :  { %2982 = vmatprep.subr.bf16.mxu1 %v6238_v27  ;;  %3080 = vmatpush2.bf16.msra.mxu0 %v4355_v51  ;;  %7305 = vst [vmem:[#allocation79_spill] sm:$0xff] %v6247_v22  ;;  %v6250_v27 = vld [vmem:[#allocation7 + $0x38c] ss:$16 sps:$4 sm:$0xff]  }
 0x853   :  { %3081 = vmatprep.subr.bf16.mxu0 %v4356_v46  ;;  %7306 = vst [vmem:[#allocation84_spill] sm:$0xff] %v6250_v27  ;;  %v4363_v51 = vld [vmem:[#allocation4 + $0x1a0] ss:$16 sps:$4 sm:$0xff]   ;;  %v4364_v46 = vld [vmem:[#allocation4 + $0x184] ss:$16 sps:$4 sm:$0xff]  }
 0x855   :  { %2983 = vmatpush2.bf16.msra.mxu1 %v6241_v20  ;;  %v6253_v20 = vld [vmem:[#allocation7 + $0x388] ss:$16 sps:$4 sm:$0xff]  }
 0x856   :  { %2984 = vmatprep.subr.bf16.mxu1 %v6244_v5  ;;  %3082 = vmatpush2.bf16.msra.mxu0 %v4359_v42  ;;  %7307 = vst [vmem:[#allocation85_spill] sm:$0xff] %v6253_v20  ;;  %v6256_v5 = vld [vmem:[#allocation7 + $0x36c] ss:$16 sps:$4 sm:$0xff]  }
 0x857   :  { %3083 = vmatprep.subr.bf16.mxu0 %v4360_v10  ;;  %7308 = vst [vmem:[#allocation82_spill] sm:$0xff] %v6256_v5  ;;  %v4367_v42 = vld [vmem:[#allocation4 + $0x180] ss:$16 sps:$4 sm:$0xff]   ;;  %v4368_v10 = vld [vmem:[#allocation4 + $0x164] ss:$16 sps:$4 sm:$0xff]  }
 0x859   :  { %2985 = vmatpush2.bf16.msra.mxu1 %v6247_v22  ;;  %v6259_v22 = vld [vmem:[#allocation7 + $0x368] ss:$16 sps:$4 sm:$0xff]  }
 0x85a   :  { %2986 = vmatprep.subr.bf16.mxu1 %v6250_v27  ;;  %3084 = vmatpush2.bf16.msra.mxu0 %v4363_v51  ;;  %7309 = vst [vmem:[#allocation83_spill] sm:$0xff] %v6259_v22  ;;  %v6262_v27 = vld [vmem:[#allocation7 + $0x34c] ss:$16 sps:$4 sm:$0xff]  }
 0x85b   :  { %3085 = vmatprep.subr.bf16.mxu0 %v4364_v46  ;;  %7310 = vst [vmem:[#allocation88_spill] sm:$0xff] %v6262_v27  ;;  %v4371_v51 = vld [vmem:[#allocation4 + $0x160] ss:$16 sps:$4 sm:$0xff]   ;;  %v4372_v46 = vld [vmem:[#allocation4 + $0x144] ss:$16 sps:$4 sm:$0xff]  }
 0x85d   :  { %2987 = vmatpush2.bf16.msra.mxu1 %v6253_v20  ;;  %v6265_v20 = vld [vmem:[#allocation7 + $0x348] ss:$16 sps:$4 sm:$0xff]  }
 0x85e   :  { %2988 = vmatprep.subr.bf16.mxu1 %v6256_v5  ;;  %3086 = vmatpush2.bf16.msra.mxu0 %v4367_v42  ;;  %7311 = vst [vmem:[#allocation89_spill] sm:$0xff] %v6265_v20  ;;  %v6268_v5 = vld [vmem:[#allocation7 + $0x32c] ss:$16 sps:$4 sm:$0xff]  }
 0x85f   :  { %3087 = vmatprep.subr.bf16.mxu0 %v4368_v10  ;;  %7312 = vst [vmem:[#allocation86_spill] sm:$0xff] %v6268_v5  ;;  %v4375_v42 = vld [vmem:[#allocation4 + $0x140] ss:$16 sps:$4 sm:$0xff]   ;;  %v4376_v10 = vld [vmem:[#allocation4 + $0x124] ss:$16 sps:$4 sm:$0xff]  }
 0x861   :  { %2989 = vmatpush2.bf16.msra.mxu1 %v6259_v22  ;;  %v6271_v22 = vld [vmem:[#allocation7 + $0x328] ss:$16 sps:$4 sm:$0xff]  }
 0x862   :  { %2990 = vmatprep.subr.bf16.mxu1 %v6262_v27  ;;  %3088 = vmatpush2.bf16.msra.mxu0 %v4371_v51  ;;  %7313 = vst [vmem:[#allocation87_spill] sm:$0xff] %v6271_v22  ;;  %v6274_v27 = vld [vmem:[#allocation7 + $0x30c] ss:$16 sps:$4 sm:$0xff]  }
 0x863   :  { %3089 = vmatprep.subr.bf16.mxu0 %v4372_v46  ;;  %7314 = vst [vmem:[#allocation92_spill] sm:$0xff] %v6274_v27  ;;  %v4379_v51 = vld [vmem:[#allocation4 + $0x120] ss:$16 sps:$4 sm:$0xff]   ;;  %v4380_v46 = vld [vmem:[#allocation4 + $0x104] ss:$16 sps:$4 sm:$0xff]  }
 0x865   :  { %2991 = vmatpush2.bf16.msra.mxu1 %v6265_v20  ;;  %v6277_v20 = vld [vmem:[#allocation7 + $0x308] ss:$16 sps:$4 sm:$0xff]  }
 0x866   :  { %2992 = vmatprep.subr.bf16.mxu1 %v6268_v5  ;;  %3090 = vmatpush2.bf16.msra.mxu0 %v4375_v42  ;;  %7315 = vst [vmem:[#allocation93_spill] sm:$0xff] %v6277_v20  ;;  %v4382_v5 = vld [vmem:[#allocation4 + $0x2e4] ss:$16 sps:$4 sm:$0xff]   ;;  %v4383_v42 = vld [vmem:[#allocation4 + $0x100] ss:$16 sps:$4 sm:$0xff]  }
 0x867   :  { %3091 = vmatprep.subr.bf16.mxu0 %v4376_v10  ;;  %v4384_v10 = vld [vmem:[#allocation4 + $0xec] ss:$16 sps:$4 sm:$0xff]  }
 0x869   :  { %2993 = vmatpush2.bf16.msra.mxu1 %v6271_v22  ;;  %v4385_v22 = vld [vmem:[#allocation4 + $0x2e0] ss:$16 sps:$4 sm:$0xff]  }
 0x86a   :  { %2994 = vmatprep.subr.bf16.mxu1 %v6274_v27  ;;  %3092 = vmatpush2.bf16.msra.mxu0 %v4379_v51  ;;  %v4387_v27 = vld [vmem:[#allocation4 + $0x2c0] ss:$16 sps:$4 sm:$0xff]   ;;  %v4388_v51 = vld [vmem:[#allocation4 + $0x2a4] ss:$16 sps:$4 sm:$0xff]  }
 0x86b   :  { %3093 = vmatprep.subr.bf16.mxu0 %v4380_v46  ;;  %v4389_v46 = vld [vmem:[#allocation4 + $0x2a0] ss:$16 sps:$4 sm:$0xff]  }
 0x86d   :  { %2995 = vmatpush2.bf16.msra.mxu1 %v6277_v20  ;;  %v4391_v20 = vld [vmem:[#allocation4 + $0x280] ss:$16 sps:$4 sm:$0xff]  }
 0x86e   :  { %3104 = vmatprep.subr.bf16.mxu1 %v4382_v5  ;;  %3094 = vmatpush2.bf16.msra.mxu0 %v4383_v42  ;;  %v4392_v5 = vld [vmem:[#allocation4 + $0x264] ss:$16 sps:$4 sm:$0xff]   ;;  %v4393_v42 = vld [vmem:[#allocation4 + $0x260] ss:$16 sps:$4 sm:$0xff]  }
 0x86f   :  { %3145 = vmatprep.subr.bf16.mxu0 %v4384_v10  ;;  %v4394_v10 = vld [vmem:[#allocation4 + $0x244] ss:$16 sps:$4 sm:$0xff]  }
 0x870   :  { %2997 = vmatmul.mubr.bf16.vlgmr.msra.gmra.mxu1 %v6183_v61  ;;  %v4395_v61 = vld [vmem:[#allocation4 + $0x240] ss:$16 sps:$4 sm:$0xff]  }
 0x871   :  { %3105 = vmatpush1.bf16.msra.mxu1 %v4385_v22  ;;  %v4396_v22 = vld [vmem:[#allocation4 + $0x224] ss:$16 sps:$4 sm:$0xff]  }
 0x872   :  { %3106 = vmatprep.subr.bf16.mxu1 %v4386_v1  ;;  %v4397_v1 = vld [vmem:[#allocation4 + $0x220] ss:$16 sps:$4 sm:$0xff]  }
 0x875   :  { %3107 = vmatpush1.bf16.msra.mxu1 %v4387_v27  ;;  %v4398_v27 = vld [vmem:[#allocation4 + $0x204] ss:$16 sps:$4 sm:$0xff]  }
 0x876   :  { %3108 = vmatprep.subr.bf16.mxu1 %v4388_v51  ;;  %v4399_v51 = vld [vmem:[#allocation4 + $0x200] ss:$16 sps:$4 sm:$0xff]  }
 0x879   :  { %3109 = vmatpush1.bf16.msra.mxu1 %v4389_v46  ;;  %v4400_v46 = vld [vmem:[#allocation4 + $0x3e4] ss:$16 sps:$4 sm:$0xff]  }
 0x87a   :  { %3110 = vmatprep.subr.bf16.mxu1 %v4390_v63  ;;  %v4401_v63 = vld [vmem:[#allocation4 + $0x3e0] ss:$16 sps:$4 sm:$0xff]  }
 0x87d   :  { %3111 = vmatpush1.bf16.msra.mxu1 %v4391_v20  ;;  %v4402_v20 = vld [vmem:[#allocation4 + $0x3c4] ss:$16 sps:$4 sm:$0xff]  }
 0x87e   :  { %3112 = vmatprep.subr.bf16.mxu1 %v4392_v5  ;;  %v4403_v5 = vld [vmem:[#allocation4 + $0x3c0] ss:$16 sps:$4 sm:$0xff]  }
 0x881   :  { %3113 = vmatpush1.bf16.msra.mxu1 %v4393_v42  ;;  %v4404_v42 = vld [vmem:[#allocation4 + $0x3a4] ss:$16 sps:$4 sm:$0xff]  }
 0x882   :  { %3114 = vmatprep.subr.bf16.mxu1 %v4394_v10  ;;  %v4405_v10 = vld [vmem:[#allocation4 + $0x3a0] ss:$16 sps:$4 sm:$0xff]  }
 0x885   :  { %3115 = vmatpush1.bf16.msra.mxu1 %v4395_v61  ;;  %v4406_v61 = vld [vmem:[#allocation4 + $0x384] ss:$16 sps:$4 sm:$0xff]  }
 0x886   :  { %3116 = vmatprep.subr.bf16.mxu1 %v4396_v22  ;;  %v4407_v22 = vld [vmem:[#allocation4 + $0x380] ss:$16 sps:$4 sm:$0xff]  }
 0x889   :  { %3117 = vmatpush1.bf16.msra.mxu1 %v4397_v1  ;;  %v4408_v1 = vld [vmem:[#allocation4 + $0x364] ss:$16 sps:$4 sm:$0xff]  }
 0x88a   :  { %3118 = vmatprep.subr.bf16.mxu1 %v4398_v27  ;;  %v4409_v27 = vld [vmem:[#allocation4 + $0x360] ss:$16 sps:$4 sm:$0xff]  }
 0x88d   :  { %3119 = vmatpush1.bf16.msra.mxu1 %v4399_v51  ;;  %v4410_v51 = vld [vmem:[#allocation4 + $0x344] ss:$16 sps:$4 sm:$0xff]  }
 0x88e   :  { %3120 = vmatprep.subr.bf16.mxu1 %v4400_v46  ;;  %v4411_v46 = vld [vmem:[#allocation4 + $0x340] ss:$16 sps:$4 sm:$0xff]  }
 0x891   :  { %3121 = vmatpush2.bf16.msra.mxu1 %v4401_v63  ;;  %v4412_v63 = vld [vmem:[#allocation4 + $0x324] ss:$16 sps:$4 sm:$0xff]  }
 0x892   :  { %3122 = vmatprep.subr.bf16.mxu1 %v4402_v20  ;;  %v4413_v20 = vld [vmem:[#allocation4 + $0x320] ss:$16 sps:$4 sm:$0xff]  }
 0x895   :  { %3123 = vmatpush2.bf16.msra.mxu1 %v4403_v5  ;;  %v4414_v5 = vld [vmem:[#allocation4 + $0x304] ss:$16 sps:$4 sm:$0xff]  }
 0x896   :  { %3124 = vmatprep.subr.bf16.mxu1 %v4404_v42  ;;  %v4415_v42 = vld [vmem:[#allocation4 + $0x300] ss:$16 sps:$4 sm:$0xff]  }
 0x899   :  { %3125 = vmatpush2.bf16.msra.mxu1 %v4405_v10  ;;  %v4416_v10 = vld [vmem:[#allocation4 + $0x2ec] ss:$16 sps:$4 sm:$0xff]  }
 0x89a   :  { %3126 = vmatprep.subr.bf16.mxu1 %v4406_v61 }
 0x89d   :  { %3127 = vmatpush2.bf16.msra.mxu1 %v4407_v22 }
 0x89e   :  { %3128 = vmatprep.subr.bf16.mxu1 %v4408_v1 }
 0x8a1   :  { %3129 = vmatpush2.bf16.msra.mxu1 %v4409_v27 }
 0x8a2   :  { %3130 = vmatprep.subr.bf16.mxu1 %v4410_v51 }
 0x8a5   :  { %3131 = vmatpush2.bf16.msra.mxu1 %v4411_v46 }
 0x8a6   :  { %3132 = vmatprep.subr.bf16.mxu1 %v4412_v63 }
 0x8a9   :  { %3133 = vmatpush2.bf16.msra.mxu1 %v4413_v20 }
 0x8aa   :  { %3134 = vmatprep.subr.bf16.mxu1 %v4414_v5 }
 0x8ad   :  { %3135 = vmatpush2.bf16.msra.mxu1 %v4415_v42 }
 0x8ae   :  { %3186 = vmatprep.subr.bf16.mxu1 %v4416_v10 }
 0x8b0   :  { %v2875_v61 = vpop.f32.mrf.mxu0 }
 0x8b1   :  { %v2876_v27 = vadd.f32 %v2875_v61, %v7316_v3 }
 0x8b2   :  { %v2877_v22 = vpop.f32.mrf.mxu0 }
 0x8b3   :  { %v2878_v46 = vadd.f32 %v2877_v22, %v7317_v9 }
 0x8b4   :  { %v2879_v43 = vpop.f32.mrf.mxu0 }
 0x8b6   :  { %v2880_v1 = vpop.f32.mrf.mxu0 }
 0x8b7   :  { %v7318_v1 = vld [vmem:[#allocation162_spill] sm:$0xff] }
 0x8f0   :  { %v2916_v59 = vpop.f32.mrf.mxu1  ;;  %v2957_v51 = vpop.f32.mrf.mxu0 }
 0x8f1   :  { %v2917_v49 = vadd.f32 %v2916_v59, %v2876_v27  ;;  %v2958_v59 = vadd.f32 %v2957_v51, %v7164_v54 }
 0x8f2   :  { %v2918_v63 = vpop.f32.mrf.mxu1  ;;  %v2959_v50 = vpop.f32.mrf.mxu0 }
 0x8f3   :  { %v3005_v20 = vmax.f32 %v2917_v49, 0.0  ;;  %v2919_v62 = vadd.f32 %v2918_v63, %v2878_v46  ;;  %v2960_v49 = vadd.f32 %v2959_v50, %v5325_v18 }
 0x8f4   :  { %v2920_v5 = vpop.f32.mrf.mxu1  ;;  %v2961_v25 = vpop.f32.mrf.mxu0 }
 0x8f5   :  { %v3006_v42 = vmax.f32 %v2919_v62, 0.0  ;;  %v3009_v15 = vmul.f32 %v3005_v20, %v5304_v8  ;;  %v3018_v43 = vmul.f32 %v3005_v20, %v5307_v19 }
 0x8f6   :  { %v2921_v16 = vpop.f32.mrf.mxu1  ;;  %v2962_v10 = vpop.f32.mrf.mxu0 }
 0x8f7   :  { %v3010_v61 = vmul.f32 %v3006_v42, %v7318_v1  ;;  %v3019_v3 = vmul.f32 %v3006_v42, %v7163_v45 }
 0x8f9   :  { %v3013_v7 = vadd.f32 %v3010_v61, %v3009_v15  ;;  %v3022_v22 = vadd.f32 %v3019_v3, %v3018_v43 }
 0x930   :  { %v2998_v27 = vpop.f32.mrf.mxu1 }
 0x931   :  { %v2999_v46 = vadd.f32 %v2998_v27, %v2958_v59 }
 0x932   :  { %v3000_v25 = vpop.f32.mrf.mxu1 }
 0x933   :  { %v3007_v62 = vmax.f32 %v2999_v46, 0.0  ;;  %v3001_v16 = vadd.f32 %v3000_v25, %v2960_v49  ;;  %v6298_v49 = vld [vmem:[%s6459_s8] ss:$0 sm:$0xff] }
 0x934   :  { %v3002_v63 = vpop.f32.mrf.mxu1  ;;  %7319 = vst [vmem:[#allocation90_spill] sm:$0xff] %v6298_v49 }
 0x935   :  { %v3011_v5 = vmul.f32 %v3007_v62, %v5333_v23  ;;  %v3020_v20 = vmul.f32 %v3007_v62, %v5337_v17  ;;  %v3008_v10 = vmax.f32 %v3001_v16, 0.0  ;;  %v7322_v62 = vld [vmem:[#allocation15_spill] sm:$0xff]  ;;  %v7323_v63 = vld [vmem:[#allocation16_spill] sm:$0xff] }
 0x936   :  { %v3003_v1 = vpop.f32.mrf.mxu1 }
 0x937   :  { %v3012_v42 = vmul.f32 %v3008_v10, %v5342_v11  ;;  %v3021_v15 = vmul.f32 %v3008_v10, %v5347_v4  ;;  %v3023_v3 = vadd.f32 %v3022_v22, %v3020_v20  ;;  %v3014_v51 = vadd.f32 %v3013_v7, %v3011_v5  ;;  %v6306_v7 = vld [vmem:[%s6451_s0] sm:$0xff]  ;;  %v7324_v20 = vld [vmem:[#allocation17_spill] sm:$0xff] }
 0x938   :  { %7321 = vst [vmem:[#allocation96_spill] sm:$0xff] %v6306_v7 }
 0x939   :  { %v3024_v43 = vadd.f32 %v3023_v3, %v3021_v15  ;;  %v3015_v61 = vadd.f32 %v3014_v51, %v3012_v42  ;;  %v7325_v42 = vld [vmem:[#allocation18_spill] sm:$0xff]  ;;  %v7326_v3 = vld [vmem:[#allocation12_spill] sm:$0xff] }
 0x93b   :  { %3025 = vadd.xlane.f32.xlu0 %v3024_v43  ;;  %3016 = vadd.xlane.f32.xlu1 %v3015_v61  ;;  %v7327_v43 = vld [vmem:[#allocation13_spill] sm:$0xff] }
 0x9c4   :  { %v3026_v50 = vpop.xlane.xlu0 %3025  ;;  %v3017_v59 = vpop.xlane.xlu1 %3016 }
 0x9c5   :  { %v3027_v27 = vsel %vm2228_vm0, %v3017_v59, %v3026_v50  ;;  %v7328_v50 = vld [vmem:[#allocation14_spill] sm:$0xff] }
 0x9c6   :  { %v6301_v1 = vadd.f32 %v6298_v49, %v3027_v27 }
 0x9c8   :  { %7320 = vst [vmem:[#allocation91_spill] sm:$0xff] %v6301_v1  ;;  %v3029_v22 = vadd.f32 %v6306_v7, %v6301_v1 }
 0x9ca   :  { %3040 = vperm.xlu0 %3709, %v3029_v22   ;;  %3032 = vperm.xlu1 %3708, %v3029_v22  }
 0xa45   :  { %v3041_v46 = vpop.permute.xlu0 %3040  ;;  %v3033_v25 = vpop.permute.xlu1 %3032 }
 0xa46   :  { %v3043_v16 = vmul.f32 %v3041_v46, %v7322_v62  ;;  %v3044_v5 = vmul.f32 %v3041_v46, %v7323_v63  ;;  %v3045_v10 = vmul.f32 %v3041_v46, %v7324_v20  ;;  %v3046_v15 = vmul.f32 %v3041_v46, %v7325_v42 }
 0xa47   :  { %v3035_v51 = vmul.f32 %v3033_v25, %v7326_v3  ;;  %v3036_v61 = vmul.f32 %v3033_v25, %v7327_v43  ;;  %v3037_v59 = vmul.f32 %v3033_v25, %v7328_v50  ;;  %v3038_v27 = vmul.f32 %v3033_v25, %v4726_v31  ;;  %v4427_v25 = vld [vmem:[#allocation4 + $0xa8] ss:$16 sps:$4 sm:$0xff]  }
 0xa49   :  { %v3047_v7 = vadd.f32 %v3043_v16, %v3035_v51  ;;  %v3049_v22 = vadd.f32 %v3045_v10, %v3037_v59  ;;  %v3048_v49 = vadd.f32 %v3044_v5, %v3036_v61  ;;  %v3050_v40 = vadd.f32 %v3046_v15, %v3038_v27  ;;  %v4428_v16 = vld [vmem:[#allocation4 + $0x2a8] ss:$16 sps:$4 sm:$0xff]   ;;  %v4429_v5 = vld [vmem:[#allocation4 + $0x8c] ss:$16 sps:$4 sm:$0xff]  }
 0xa4a   :  { %v4431_v10 = vld [vmem:[#allocation4 + $0x88] ss:$16 sps:$4 sm:$0xff]   ;;  %v4433_v51 = vld [vmem:[#allocation4 + $0x6c] ss:$16 sps:$4 sm:$0xff]  }
 0xa4b   :  { %v3052_v62 = vadd.f32 %v3048_v49, %v4741_v36  ;;  %v3054_v63 = vadd.f32 %v3050_v40, %v4744_v37  ;;  %v3051_v20 = vadd.f32 %v3047_v7, %v4747_v38  ;;  %v3053_v46 = vadd.f32 %v3049_v22, %v4750_v39  ;;  %v4419_v36 = vld [vmem:[#allocation4 + $0xe8] ss:$16 sps:$4 sm:$0xff]   ;;  %v4421_v38 = vld [vmem:[#allocation4 + $0xcc] ss:$16 sps:$4 sm:$0xff]  }
 0xa4c   :  { %v4420_v37 = vld [vmem:[#allocation4 + $0x2e8] ss:$16 sps:$4 sm:$0xff]   ;;  %v4422_v39 = vld [vmem:[#allocation4 + $0x2cc] ss:$16 sps:$4 sm:$0xff]  }
 0xa4d   :  { %v3056_v42 = vmax.f32 %v3052_v62, 0.0  ;;  %v3058_v3 = vmax.f32 %v3054_v63, 0.0  ;;  %v3055_v1 = vmax.f32 %v3051_v20, 0.0  ;;  %v3057_v43 = vmax.f32 %v3053_v46, 0.0  ;;  %v4423_v40 = vld [vmem:[#allocation4 + $0xc8] ss:$16 sps:$4 sm:$0xff]  }
 0xa4e   :  { %v4424_v49 = vld [vmem:[#allocation4 + $0x2c8] ss:$16 sps:$4 sm:$0xff]   ;;  %v4426_v7 = vld [vmem:[#allocation4 + $0x2ac] ss:$16 sps:$4 sm:$0xff]  }
 0xa4f   :  { %v3060_v4 = vpack.c.bf16 %v3056_v42, %v3056_v42  ;;  %v3062_v50 = vpack.c.bf16 %v3058_v3, %v3058_v3  ;;  %v6322_v11 = vpack.c.bf16 %v3055_v1, %v3055_v1  ;;  %v6324_v31 = vpack.c.bf16 %v3057_v43, %v3057_v43  ;;  %v4425_v1 = vld [vmem:[#allocation4 + $0xac] ss:$16 sps:$4 sm:$0xff]   ;;  %v4432_v15 = vld [vmem:[#allocation4 + $0x288] ss:$16 sps:$4 sm:$0xff]  }
 0xa50   :  { %v4434_v61 = vld [vmem:[#allocation4 + $0x26c] ss:$16 sps:$4 sm:$0xff]   ;;  %v4435_v59 = vld [vmem:[#allocation4 + $0x68] ss:$16 sps:$4 sm:$0xff]  }
 0xa51   :  { %3095 = vmatprep.mubr.bf16.mxu0 %v3060_v4  ;;  %3136 = vmatprep.mubr.bf16.mxu1 %v3062_v50  ;;  %v4436_v27 = vld [vmem:[#allocation4 + $0x268] ss:$16 sps:$4 sm:$0xff]   ;;  %v4437_v22 = vld [vmem:[#allocation4 + $0x4c] ss:$16 sps:$4 sm:$0xff]  }
 0xa52   :  { %3096 = vmatmul.mubr.bf16.vlgmr.msra.gmra.mxu0 %v6322_v11  ;;  %3137 = vmatmul.mubr.bf16.vlgmr.msra.gmra.mxu1 %v6324_v31  ;;  %v4438_v62 = vld [vmem:[#allocation4 + $0x24c] ss:$16 sps:$4 sm:$0xff]   ;;  %v4439_v63 = vld [vmem:[#allocation4 + $0x48] ss:$16 sps:$4 sm:$0xff]  }
 0xa53   :  { %3146 = vmatpush1.bf16.msra.mxu0 %v4419_v36  ;;  %3187 = vmatpush1.bf16.msra.mxu1 %v4420_v37  ;;  %v4440_v20 = vld [vmem:[#allocation4 + $0x248] ss:$16 sps:$4 sm:$0xff]   ;;  %v4441_v46 = vld [vmem:[#allocation4 + $0x2c] ss:$16 sps:$4 sm:$0xff]  }
 0xa54   :  { %3177 = vmatprep.mubr.bf16.mxu0 %v3060_v4  ;;  %3218 = vmatprep.mubr.bf16.mxu1 %v3062_v50  ;;  %v4430_v4 = vld [vmem:[#allocation4 + $0x28c] ss:$16 sps:$4 sm:$0xff]   ;;  %v4443_v3 = vld [vmem:[#allocation4 + $0x28] ss:$16 sps:$4 sm:$0xff]  }
 0xa55   :  { %3147 = vmatprep.subr.bf16.mxu0 %v4421_v38  ;;  %3188 = vmatprep.subr.bf16.mxu1 %v4422_v39  ;;  %v4442_v42 = vld [vmem:[#allocation4 + $0x22c] ss:$16 sps:$4 sm:$0xff]   ;;  %v4444_v43 = vld [vmem:[#allocation4 + $0x228] ss:$16 sps:$4 sm:$0xff]  }
 0xa56   :  { %v4445_v50 = vld [vmem:[#allocation4 + $0xc] ss:$16 sps:$4 sm:$0xff]   ;;  %v4447_v37 = vld [vmem:[#allocation4 + $0x8] ss:$16 sps:$4 sm:$0xff]  }
 0xa57   :  { %3148 = vmatpush1.bf16.msra.mxu0 %v4423_v40  ;;  %3189 = vmatpush1.bf16.msra.mxu1 %v4424_v49  ;;  %v4446_v36 = vld [vmem:[#allocation4 + $0x20c] ss:$16 sps:$4 sm:$0xff]   ;;  %v4448_v38 = vld [vmem:[#allocation4 + $0x208] ss:$16 sps:$4 sm:$0xff]  }
 0xa58   :  { %3149 = vmatprep.subr.bf16.mxu0 %v4425_v1  ;;  %3190 = vmatprep.subr.bf16.mxu1 %v4426_v7  ;;  %v4449_v39 = vld [vmem:[#allocation4 + $0x1ec] ss:$16 sps:$4 sm:$0xff]   ;;  %v4451_v49 = vld [vmem:[#allocation4 + $0x1e8] ss:$16 sps:$4 sm:$0xff]  }
 0xa59   :  { %v4450_v40 = vld [vmem:[#allocation4 + $0x3ec] ss:$16 sps:$4 sm:$0xff]   ;;  %v4452_v1 = vld [vmem:[#allocation4 + $0x3e8] ss:$16 sps:$4 sm:$0xff]  }
 0xa5a   :  { %v4453_v7 = vld [vmem:[#allocation4 + $0x1cc] ss:$16 sps:$4 sm:$0xff]  }
 0xa5b   :  { %3150 = vmatpush1.bf16.msra.mxu0 %v4427_v25  ;;  %3191 = vmatpush1.bf16.msra.mxu1 %v4428_v16  ;;  %v4454_v25 = vld [vmem:[#allocation4 + $0x3cc] ss:$16 sps:$4 sm:$0xff]   ;;  %v4455_v16 = vld [vmem:[#allocation4 + $0x1c8] ss:$16 sps:$4 sm:$0xff]  }
 0xa5c   :  { %3151 = vmatprep.subr.bf16.mxu0 %v4429_v5  ;;  %3192 = vmatprep.subr.bf16.mxu1 %v4430_v4  ;;  %v4456_v5 = vld [vmem:[#allocation4 + $0x3c8] ss:$16 sps:$4 sm:$0xff]   ;;  %v4457_v4 = vld [vmem:[#allocation4 + $0x1ac] ss:$16 sps:$4 sm:$0xff]  }
 0xa5f   :  { %3152 = vmatpush1.bf16.msra.mxu0 %v4431_v10  ;;  %3193 = vmatpush1.bf16.msra.mxu1 %v4432_v15  ;;  %v4458_v10 = vld [vmem:[#allocation4 + $0x3ac] ss:$16 sps:$4 sm:$0xff]   ;;  %v4459_v15 = vld [vmem:[#allocation4 + $0x1a8] ss:$16 sps:$4 sm:$0xff]  }
 0xa60   :  { %3153 = vmatprep.subr.bf16.mxu0 %v4433_v51  ;;  %3194 = vmatprep.subr.bf16.mxu1 %v4434_v61  ;;  %v4460_v51 = vld [vmem:[#allocation4 + $0x3a8] ss:$16 sps:$4 sm:$0xff]   ;;  %v4461_v61 = vld [vmem:[#allocation4 + $0x18c] ss:$16 sps:$4 sm:$0xff]  }
 0xa63   :  { %3154 = vmatpush1.bf16.msra.mxu0 %v4435_v59  ;;  %3195 = vmatpush1.bf16.msra.mxu1 %v4436_v27  ;;  %v4462_v59 = vld [vmem:[#allocation4 + $0x38c] ss:$16 sps:$4 sm:$0xff]   ;;  %v4463_v27 = vld [vmem:[#allocation4 + $0x188] ss:$16 sps:$4 sm:$0xff]  }
 0xa64   :  { %3155 = vmatprep.subr.bf16.mxu0 %v4437_v22  ;;  %3196 = vmatprep.subr.bf16.mxu1 %v4438_v62  ;;  %v4464_v22 = vld [vmem:[#allocation4 + $0x388] ss:$16 sps:$4 sm:$0xff]   ;;  %v4465_v62 = vld [vmem:[#allocation4 + $0x16c] ss:$16 sps:$4 sm:$0xff]  }
 0xa67   :  { %3156 = vmatpush1.bf16.msra.mxu0 %v4439_v63  ;;  %3197 = vmatpush1.bf16.msra.mxu1 %v4440_v20  ;;  %v4466_v63 = vld [vmem:[#allocation4 + $0x36c] ss:$16 sps:$4 sm:$0xff]   ;;  %v4467_v20 = vld [vmem:[#allocation4 + $0x168] ss:$16 sps:$4 sm:$0xff]  }
 0xa68   :  { %3157 = vmatprep.subr.bf16.mxu0 %v4441_v46  ;;  %3198 = vmatprep.subr.bf16.mxu1 %v4442_v42  ;;  %v4468_v46 = vld [vmem:[#allocation4 + $0x368] ss:$16 sps:$4 sm:$0xff]   ;;  %v4469_v42 = vld [vmem:[#allocation4 + $0x14c] ss:$16 sps:$4 sm:$0xff]  }
 0xa6b   :  { %3158 = vmatpush1.bf16.msra.mxu0 %v4443_v3  ;;  %3199 = vmatpush1.bf16.msra.mxu1 %v4444_v43  ;;  %v4470_v3 = vld [vmem:[#allocation4 + $0x34c] ss:$16 sps:$4 sm:$0xff]   ;;  %v4471_v43 = vld [vmem:[#allocation4 + $0x148] ss:$16 sps:$4 sm:$0xff]  }
 0xa6c   :  { %3159 = vmatprep.subr.bf16.mxu0 %v4445_v50  ;;  %3200 = vmatprep.subr.bf16.mxu1 %v4446_v36  ;;  %v4472_v50 = vld [vmem:[#allocation4 + $0x348] ss:$16 sps:$4 sm:$0xff]   ;;  %v4473_v36 = vld [vmem:[#allocation4 + $0x12c] ss:$16 sps:$4 sm:$0xff]  }
 0xa6f   :  { %3160 = vmatpush1.bf16.msra.mxu0 %v4447_v37  ;;  %3201 = vmatpush1.bf16.msra.mxu1 %v4448_v38  ;;  %v4474_v37 = vld [vmem:[#allocation4 + $0x32c] ss:$16 sps:$4 sm:$0xff]   ;;  %v4475_v38 = vld [vmem:[#allocation4 + $0x128] ss:$16 sps:$4 sm:$0xff]  }
 0xa70   :  { %3161 = vmatprep.subr.bf16.mxu0 %v4449_v39  ;;  %3202 = vmatprep.subr.bf16.mxu1 %v4450_v40  ;;  %v4476_v39 = vld [vmem:[#allocation4 + $0x328] ss:$16 sps:$4 sm:$0xff]   ;;  %v4477_v40 = vld [vmem:[#allocation4 + $0x10c] ss:$16 sps:$4 sm:$0xff]  }
 0xa73   :  { %3162 = vmatpush2.bf16.msra.mxu0 %v4451_v49  ;;  %3203 = vmatpush2.bf16.msra.mxu1 %v4452_v1  ;;  %v4478_v49 = vld [vmem:[#allocation4 + $0x30c] ss:$16 sps:$4 sm:$0xff]   ;;  %v4479_v1 = vld [vmem:[#allocation4 + $0x108] ss:$16 sps:$4 sm:$0xff]  }
 0xa74   :  { %3163 = vmatprep.subr.bf16.mxu0 %v4453_v7  ;;  %3204 = vmatprep.subr.bf16.mxu1 %v4454_v25  ;;  %v4480_v7 = vld [vmem:[#allocation4 + $0x308] ss:$16 sps:$4 sm:$0xff]  }
 0xa75   :  { %v4481_v25 = vld [vmem:[#allocation7 + $0xe4] ss:$16 sps:$4 sm:$0xff]  }
 0xa77   :  { %3164 = vmatpush2.bf16.msra.mxu0 %v4455_v16  ;;  %3205 = vmatpush2.bf16.msra.mxu1 %v4456_v5  ;;  %v4482_v16 = vld [vmem:[#allocation7 + $0x2e4] ss:$16 sps:$4 sm:$0xff]   ;;  %v4483_v5 = vld [vmem:[#allocation7 + $0xe0] ss:$16 sps:$4 sm:$0xff]  }
 0xa78   :  { %3165 = vmatprep.subr.bf16.mxu0 %v4457_v4  ;;  %3206 = vmatprep.subr.bf16.mxu1 %v4458_v10  ;;  %v4484_v4 = vld [vmem:[#allocation7 + $0x2e0] ss:$16 sps:$4 sm:$0xff]   ;;  %v4485_v10 = vld [vmem:[#allocation7 + $0xc4] ss:$16 sps:$4 sm:$0xff]  }
 0xa7b   :  { %3166 = vmatpush2.bf16.msra.mxu0 %v4459_v15  ;;  %3207 = vmatpush2.bf16.msra.mxu1 %v4460_v51  ;;  %v4486_v15 = vld [vmem:[#allocation7 + $0x2c4] ss:$16 sps:$4 sm:$0xff]   ;;  %v4487_v51 = vld [vmem:[#allocation7 + $0xc0] ss:$16 sps:$4 sm:$0xff]  }
 0xa7c   :  { %3167 = vmatprep.subr.bf16.mxu0 %v4461_v61  ;;  %3208 = vmatprep.subr.bf16.mxu1 %v4462_v59  ;;  %v4488_v61 = vld [vmem:[#allocation7 + $0x2c0] ss:$16 sps:$4 sm:$0xff]   ;;  %v4489_v59 = vld [vmem:[#allocation7 + $0xa4] ss:$16 sps:$4 sm:$0xff]  }
 0xa7f   :  { %3168 = vmatpush2.bf16.msra.mxu0 %v4463_v27  ;;  %3209 = vmatpush2.bf16.msra.mxu1 %v4464_v22  ;;  %v4490_v27 = vld [vmem:[#allocation7 + $0x2a4] ss:$16 sps:$4 sm:$0xff]   ;;  %v4491_v22 = vld [vmem:[#allocation7 + $0xa0] ss:$16 sps:$4 sm:$0xff]  }
 0xa80   :  { %3169 = vmatprep.subr.bf16.mxu0 %v4465_v62  ;;  %3210 = vmatprep.subr.bf16.mxu1 %v4466_v63  ;;  %v4494_v62 = vld [vmem:[#allocation7 + $0x284] ss:$16 sps:$4 sm:$0xff]   ;;  %v4495_v63 = vld [vmem:[#allocation7 + $0x80] ss:$16 sps:$4 sm:$0xff]  }
 0xa83   :  { %3170 = vmatpush2.bf16.msra.mxu0 %v4467_v20  ;;  %3211 = vmatpush2.bf16.msra.mxu1 %v4468_v46  ;;  %v4496_v20 = vld [vmem:[#allocation7 + $0x280] ss:$16 sps:$4 sm:$0xff]   ;;  %v4497_v46 = vld [vmem:[#allocation7 + $0x64] ss:$16 sps:$4 sm:$0xff]  }
 0xa84   :  { %3171 = vmatprep.subr.bf16.mxu0 %v4469_v42  ;;  %3212 = vmatprep.subr.bf16.mxu1 %v4470_v3  ;;  %v4498_v42 = vld [vmem:[#allocation7 + $0x264] ss:$16 sps:$4 sm:$0xff]   ;;  %v4499_v3 = vld [vmem:[#allocation7 + $0x60] ss:$16 sps:$4 sm:$0xff]  }
 0xa87   :  { %3172 = vmatpush2.bf16.msra.mxu0 %v4471_v43  ;;  %3213 = vmatpush2.bf16.msra.mxu1 %v4472_v50  ;;  %v4500_v43 = vld [vmem:[#allocation7 + $0x260] ss:$16 sps:$4 sm:$0xff]   ;;  %v4501_v50 = vld [vmem:[#allocation7 + $0x44] ss:$16 sps:$4 sm:$0xff]  }
 0xa88   :  { %3173 = vmatprep.subr.bf16.mxu0 %v4473_v36  ;;  %3214 = vmatprep.subr.bf16.mxu1 %v4474_v37  ;;  %v4502_v36 = vld [vmem:[#allocation7 + $0x40] ss:$16 sps:$4 sm:$0xff]   ;;  %v4503_v37 = vld [vmem:[#allocation7 + $0x24] ss:$16 sps:$4 sm:$0xff]  }
 0xa8b   :  { %3174 = vmatpush2.bf16.msra.mxu0 %v4475_v38  ;;  %3215 = vmatpush2.bf16.msra.mxu1 %v4476_v39  ;;  %v4504_v38 = vld [vmem:[#allocation7 + $0x20] ss:$16 sps:$4 sm:$0xff]   ;;  %v4505_v39 = vld [vmem:[#allocation7 + $0x4] ss:$16 sps:$4 sm:$0xff]  }
 0xa8c   :  { %3175 = vmatprep.subr.bf16.mxu0 %v4477_v40  ;;  %3216 = vmatprep.subr.bf16.mxu1 %v4478_v49  ;;  %v4506_v40 = vld [vmem:[#allocation7] ss:$16 sps:$4 sm:$0xff]  }
 0xa8f   :  { %3176 = vmatpush2.bf16.msra.mxu0 %v4479_v1  ;;  %3217 = vmatpush2.bf16.msra.mxu1 %v4480_v7 }
 0xa90   :  { %3235 = vmatprep.subr.bf16.mxu0 %v4481_v25  ;;  %3276 = vmatprep.subr.bf16.mxu1 %v4482_v16  ;;  %v7337_v16 = vld [vmem:[#allocation22_spill] sm:$0xff] }
 0xa92   :  { %3178 = vmatmul.mubr.bf16.vlgmr.msra.gmra.mxu0 %v6322_v11  ;;  %3219 = vmatmul.mubr.bf16.vlgmr.msra.gmra.mxu1 %v6324_v31  ;;  %v4492_v11 = vld [vmem:[#allocation7 + $0x2a0] ss:$16 sps:$4 sm:$0xff]   ;;  %v4493_v31 = vld [vmem:[#allocation7 + $0x84] ss:$16 sps:$4 sm:$0xff]  }
 0xa93   :  { %3236 = vmatpush1.bf16.msra.mxu0 %v4483_v5  ;;  %3277 = vmatpush1.bf16.msra.mxu1 %v4484_v4  ;;  %v7338_v5 = vld [vmem:[#allocation27_spill] sm:$0xff]  ;;  %v7339_v4 = vld [vmem:[#allocation30_spill] sm:$0xff] }
 0xa94   :  { %3237 = vmatprep.subr.bf16.mxu0 %v4485_v10  ;;  %3278 = vmatprep.subr.bf16.mxu1 %v4486_v15  ;;  %v7340_v10 = vld [vmem:[#allocation31_spill] sm:$0xff]  ;;  %v7341_v15 = vld [vmem:[#allocation32_spill] sm:$0xff] }
 0xa97   :  { %3238 = vmatpush1.bf16.msra.mxu0 %v4487_v51  ;;  %3279 = vmatpush1.bf16.msra.mxu1 %v4488_v61  ;;  %v7342_v51 = vld [vmem:[#allocation33_spill] sm:$0xff]  ;;  %v7343_v61 = vld [vmem:[#allocation34_spill] sm:$0xff] }
 0xa98   :  { %3239 = vmatprep.subr.bf16.mxu0 %v4489_v59  ;;  %3280 = vmatprep.subr.bf16.mxu1 %v4490_v27  ;;  %v7344_v59 = vld [vmem:[#allocation35_spill] sm:$0xff]  ;;  %v7345_v27 = vld [vmem:[#allocation36_spill] sm:$0xff] }
 0xa9b   :  { %3240 = vmatpush1.bf16.msra.mxu0 %v4491_v22  ;;  %3281 = vmatpush1.bf16.msra.mxu1 %v4492_v11  ;;  %v7346_v22 = vld [vmem:[#allocation37_spill] sm:$0xff]  ;;  %v7347_v11 = vld [vmem:[#allocation38_spill] sm:$0xff] }
 0xa9c   :  { %3241 = vmatprep.subr.bf16.mxu0 %v4493_v31  ;;  %3282 = vmatprep.subr.bf16.mxu1 %v4494_v62  ;;  %v7348_v31 = vld [vmem:[#allocation39_spill] sm:$0xff]  ;;  %v7349_v62 = vld [vmem:[#allocation40_spill] sm:$0xff] }
 0xa9f   :  { %3242 = vmatpush1.bf16.msra.mxu0 %v4495_v63  ;;  %3283 = vmatpush1.bf16.msra.mxu1 %v4496_v20  ;;  %v7350_v63 = vld [vmem:[#allocation41_spill] sm:$0xff]  ;;  %v7351_v20 = vld [vmem:[#allocation42_spill] sm:$0xff] }
 0xaa0   :  { %3243 = vmatprep.subr.bf16.mxu0 %v4497_v46  ;;  %3284 = vmatprep.subr.bf16.mxu1 %v4498_v42  ;;  %v7352_v46 = vld [vmem:[#allocation43_spill] sm:$0xff]  ;;  %v7353_v42 = vld [vmem:[#allocation44_spill] sm:$0xff] }
 0xaa3   :  { %3244 = vmatpush1.bf16.msra.mxu0 %v4499_v3  ;;  %3285 = vmatpush1.bf16.msra.mxu1 %v4500_v43  ;;  %v7354_v3 = vld [vmem:[#allocation45_spill] sm:$0xff]  ;;  %v7355_v43 = vld [vmem:[#allocation46_spill] sm:$0xff] }
 0xaa4   :  { %3245 = vmatprep.subr.bf16.mxu0 %v4501_v50  ;;  %3286 = vmatprep.subr.bf16.mxu1 %v5972_v2  ;;  %v4507_v2 = vld [vmem:[#allocation7 + $0x1e4] ss:$16 sps:$4 sm:$0xff]   ;;  %v7356_v50 = vld [vmem:[#allocation47_spill] sm:$0xff] }
 0xaa7   :  { %3246 = vmatpush1.bf16.msra.mxu0 %v4502_v36  ;;  %3287 = vmatpush1.bf16.msra.mxu1 %v5976_v13  ;;  %v4508_v13 = vld [vmem:[#allocation7 + $0x1e0] ss:$16 sps:$4 sm:$0xff]  }
 0xaa8   :  { %3247 = vmatprep.subr.bf16.mxu0 %v4503_v37  ;;  %3288 = vmatprep.subr.bf16.mxu1 %v5980_v0  ;;  %v4509_v0 = vld [vmem:[#allocation7 + $0x1c4] ss:$16 sps:$4 sm:$0xff]   ;;  %v7358_v37 = vld [vmem:[#allocation49_spill] sm:$0xff] }
 0xaa9   :  { %v7357_v36 = vld [vmem:[#allocation48_spill] sm:$0xff] }
 0xaab   :  { %3248 = vmatpush1.bf16.msra.mxu0 %v4504_v38  ;;  %3289 = vmatpush1.bf16.msra.mxu1 %v5984_v24  ;;  %v4510_v24 = vld [vmem:[#allocation7 + $0x1c0] ss:$16 sps:$4 sm:$0xff]  }
 0xaac   :  { %3249 = vmatprep.subr.bf16.mxu0 %v4505_v39  ;;  %3290 = vmatprep.subr.bf16.mxu1 %v5988_v14  ;;  %v4511_v14 = vld [vmem:[#allocation7 + $0x1a4] ss:$16 sps:$4 sm:$0xff]   ;;  %v7360_v39 = vld [vmem:[#allocation51_spill] sm:$0xff] }
 0xaad   :  { %v7359_v38 = vld [vmem:[#allocation50_spill] sm:$0xff] }
 0xaaf   :  { %3250 = vmatpush1.bf16.msra.mxu0 %v4506_v40  ;;  %3291 = vmatpush1.bf16.msra.mxu1 %v5992_v47  ;;  %v4512_v47 = vld [vmem:[#allocation7 + $0x1a0] ss:$16 sps:$4 sm:$0xff]  }
 0xab0   :  { %3251 = vmatprep.subr.bf16.mxu0 %v4507_v2  ;;  %3292 = vmatprep.subr.bf16.mxu1 %v5996_v41  ;;  %v4513_v41 = vld [vmem:[#allocation7 + $0x184] ss:$16 sps:$4 sm:$0xff]   ;;  %v7362_v2 = vld [vmem:[#allocation53_spill] sm:$0xff] }
 0xab1   :  { %v7361_v40 = vld [vmem:[#allocation52_spill] sm:$0xff] }
 0xab3   :  { %3252 = vmatpush2.bf16.msra.mxu0 %v4508_v13  ;;  %3293 = vmatpush2.bf16.msra.mxu1 %v6000_v56  ;;  %v7329_v56 = vld [vmem:[#allocation19_spill] sm:$0xff] }
 0xab4   :  { %3253 = vmatprep.subr.bf16.mxu0 %v4509_v0  ;;  %3294 = vmatprep.subr.bf16.mxu1 %v6004_v55  ;;  %v7330_v55 = vld [vmem:[#allocation24_spill] sm:$0xff] }
 0xab7   :  { %3254 = vmatpush2.bf16.msra.mxu0 %v4510_v24  ;;  %3295 = vmatpush2.bf16.msra.mxu1 %v6008_v21  ;;  %v7331_v21 = vld [vmem:[#allocation20_spill] sm:$0xff] }
 0xab8   :  { %3255 = vmatprep.subr.bf16.mxu0 %v4511_v14  ;;  %3296 = vmatprep.subr.bf16.mxu1 %v6012_v57  ;;  %v7332_v57 = vld [vmem:[#allocation25_spill] sm:$0xff]  ;;  %v7363_v24 = vld [vmem:[#allocation56_spill] sm:$0xff] }
 0xabb   :  { %3256 = vmatpush2.bf16.msra.mxu0 %v4512_v47  ;;  %3297 = vmatpush2.bf16.msra.mxu1 %v6016_v60  ;;  %v7333_v60 = vld [vmem:[#allocation21_spill] sm:$0xff]  ;;  %v7364_v47 = vld [vmem:[#allocation54_spill] sm:$0xff] }
 0xabc   :  { %3257 = vmatprep.subr.bf16.mxu0 %v4513_v41  ;;  %3298 = vmatprep.subr.bf16.mxu1 %v6020_v52  ;;  %v7334_v52 = vld [vmem:[#allocation26_spill] sm:$0xff] }
 0xabf   :  { %3258 = vmatpush2.bf16.msra.mxu0 %v6023_v48  ;;  %3299 = vmatpush2.bf16.msra.mxu1 %v6026_v58 }
 0xac0   :  { %3259 = vmatprep.subr.bf16.mxu0 %v6029_v26  ;;  %3300 = vmatprep.subr.bf16.mxu1 %v6032_v53  ;;  %v7335_v26 = vld [vmem:[#allocation28_spill] sm:$0xff] }
 0xac3   :  { %3260 = vmatpush2.bf16.msra.mxu0 %v6035_v12  ;;  %3301 = vmatpush2.bf16.msra.mxu1 %v6038_v44 }
 0xac4   :  { %3261 = vmatprep.subr.bf16.mxu0 %v6041_v28  ;;  %3302 = vmatprep.subr.bf16.mxu1 %v6044_v29  ;;  %v7336_v29 = vld [vmem:[#allocation29_spill] sm:$0xff] }
 0xac7   :  { %3262 = vmatpush2.bf16.msra.mxu0 %v6047_v33  ;;  %3303 = vmatpush2.bf16.msra.mxu1 %v6050_v34 }
 0xac8   :  { %3263 = vmatprep.subr.bf16.mxu0 %v6053_v35  ;;  %3304 = vmatprep.subr.bf16.mxu1 %v6056_v30 }
 0xacb   :  { %3264 = vmatpush2.bf16.msra.mxu0 %v6059_v32  ;;  %3305 = vmatpush2.bf16.msra.mxu1 %v6062_v6 }
 0xacc   :  { %3265 = vmatprep.subr.bf16.mxu0 %v7329_v56  ;;  %3306 = vmatprep.subr.bf16.mxu1 %v7330_v55  ;;  %v7365_v55 = vld [vmem:[#allocation55_spill] sm:$0xff] }
 0xacf   :  { %3266 = vmatpush2.bf16.msra.mxu0 %v7331_v21  ;;  %3307 = vmatpush2.bf16.msra.mxu1 %v7332_v57  ;;  %v7366_v57 = vld [vmem:[#allocation59_spill] sm:$0xff] }
 0xad0   :  { %3317 = vmatprep.subr.bf16.mxu0 %v7333_v60  ;;  %3358 = vmatprep.subr.bf16.mxu1 %v7334_v52 }
 0xb12   :  { %v3097_v48 = vpop.f32.mrf.mxu0  ;;  %v3138_v58 = vpop.f32.mrf.mxu1 }
 0xb13   :  { %v3098_v53 = vadd.f32 %v3097_v48, %v7335_v26  ;;  %v7367_v26 = vld [vmem:[#allocation57_spill] sm:$0xff] }
 0xb14   :  { %v3099_v12 = vpop.f32.mrf.mxu0  ;;  %v3140_v44 = vpop.f32.mrf.mxu1 }
 0xb15   :  { %v3139_v28 = vadd.f32 %v3138_v58, %v3098_v53  ;;  %v3100_v33 = vadd.f32 %v3099_v12, %v7336_v29 }
 0xb16   :  { %v3101_v34 = vpop.f32.mrf.mxu0  ;;  %v3142_v35 = vpop.f32.mrf.mxu1 }
 0xb17   :  { %v3141_v30 = vadd.f32 %v3140_v44, %v3100_v33  ;;  %v3227_v32 = vmax.f32 %v3139_v28, 0.0  ;;  %v7368_v28 = vld [vmem:[#allocation58_spill] sm:$0xff]  ;;  %v7369_v34 = vld [vmem:[#allocation60_spill] sm:$0xff] }
 0xb18   :  { %v3102_v6 = vpop.f32.mrf.mxu0  ;;  %v3143_v49 = vpop.f32.mrf.mxu1 }
 0xb19   :  { %v3228_v1 = vmax.f32 %v3141_v30, 0.0  ;;  %v3231_v25 = vpack.c.bf16 %v3227_v32, %v3227_v32  ;;  %v7370_v30 = vld [vmem:[#allocation61_spill] sm:$0xff]  ;;  %v7371_v32 = vld [vmem:[#allocation62_spill] sm:$0xff]  ;;  %v7373_v49 = vld [vmem:[#allocation63_spill] sm:$0xff] }
 0xb1a   :  { %v7372_v6 = vld [vmem:[#allocation65_spill] sm:$0xff] }
 0xb1b   :  { %v3232_v7 = vpack.c.bf16 %v3228_v1, %v3228_v1  ;;  %v7374_v1 = vld [vmem:[#allocation64_spill] sm:$0xff] }
 0xb1d   :  { %3267 = vmatprep.mubr.bf16.mxu0 %v3232_v7 }
 0xb1e   :  { %3268 = vmatmul.mubr.bf16.vlgmr.msra.gmra.mxu0 %v3231_v25 }
 0xb1f   :  { %3318 = vmatpush1.bf16.msra.mxu0 %v7337_v16  ;;  %3349 = vmatprep.mubr.bf16.mxu0 %v3232_v7  ;;  %v7375_v7 = vld [vmem:[#allocation68_spill] sm:$0xff]  ;;  %v7376_v16 = vld [vmem:[#allocation69_spill] sm:$0xff] }
 0xb20   :  { %3319 = vmatprep.subr.bf16.mxu0 %v7338_v5  ;;  %v7377_v5 = vld [vmem:[#allocation66_spill] sm:$0xff] }
 0xb23   :  { %3320 = vmatpush1.bf16.msra.mxu0 %v7339_v4  ;;  %v7378_v4 = vld [vmem:[#allocation67_spill] sm:$0xff] }
 0xb24   :  { %3321 = vmatprep.subr.bf16.mxu0 %v7340_v10  ;;  %v7380_v10 = vld [vmem:[#allocation73_spill] sm:$0xff] }
 0xb27   :  { %3322 = vmatpush1.bf16.msra.mxu0 %v7341_v15  ;;  %v7381_v15 = vld [vmem:[#allocation70_spill] sm:$0xff] }
 0xb28   :  { %3323 = vmatprep.subr.bf16.mxu0 %v7342_v51  ;;  %v7382_v51 = vld [vmem:[#allocation71_spill] sm:$0xff] }
 0xb2b   :  { %3324 = vmatpush1.bf16.msra.mxu0 %v7343_v61  ;;  %v7383_v61 = vld [vmem:[#allocation76_spill] sm:$0xff] }
 0xb2c   :  { %3325 = vmatprep.subr.bf16.mxu0 %v7344_v59  ;;  %v7384_v59 = vld [vmem:[#allocation77_spill] sm:$0xff] }
 0xb2f   :  { %3326 = vmatpush1.bf16.msra.mxu0 %v7345_v27  ;;  %v7385_v27 = vld [vmem:[#allocation74_spill] sm:$0xff] }
 0xb30   :  { %3327 = vmatprep.subr.bf16.mxu0 %v7346_v22  ;;  %v7386_v22 = vld [vmem:[#allocation75_spill] sm:$0xff] }
 0xb33   :  { %3328 = vmatpush1.bf16.msra.mxu0 %v7347_v11  ;;  %v7387_v11 = vld [vmem:[#allocation80_spill] sm:$0xff] }
 0xb34   :  { %3329 = vmatprep.subr.bf16.mxu0 %v7348_v31  ;;  %v7388_v31 = vld [vmem:[#allocation81_spill] sm:$0xff] }
 0xb37   :  { %3330 = vmatpush1.bf16.msra.mxu0 %v7349_v62  ;;  %v7389_v62 = vld [vmem:[#allocation78_spill] sm:$0xff] }
 0xb38   :  { %3331 = vmatprep.subr.bf16.mxu0 %v7350_v63  ;;  %v7390_v63 = vld [vmem:[#allocation79_spill] sm:$0xff] }
 0xb3b   :  { %3332 = vmatpush1.bf16.msra.mxu0 %v7351_v20  ;;  %v7391_v20 = vld [vmem:[#allocation84_spill] sm:$0xff] }
 0xb3c   :  { %3333 = vmatprep.subr.bf16.mxu0 %v7352_v46  ;;  %v7392_v46 = vld [vmem:[#allocation85_spill] sm:$0xff] }
 0xb3f   :  { %3334 = vmatpush2.bf16.msra.mxu0 %v7353_v42  ;;  %v7393_v42 = vld [vmem:[#allocation82_spill] sm:$0xff] }
 0xb40   :  { %3335 = vmatprep.subr.bf16.mxu0 %v7354_v3  ;;  %v7394_v3 = vld [vmem:[#allocation83_spill] sm:$0xff] }
 0xb43   :  { %3336 = vmatpush2.bf16.msra.mxu0 %v7355_v43  ;;  %v7395_v43 = vld [vmem:[#allocation88_spill] sm:$0xff] }
 0xb44   :  { %3337 = vmatprep.subr.bf16.mxu0 %v7356_v50  ;;  %v7396_v50 = vld [vmem:[#allocation89_spill] sm:$0xff] }
 0xb47   :  { %3338 = vmatpush2.bf16.msra.mxu0 %v7357_v36  ;;  %v7397_v36 = vld [vmem:[#allocation86_spill] sm:$0xff] }
 0xb48   :  { %3339 = vmatprep.subr.bf16.mxu0 %v7358_v37  ;;  %v7398_v37 = vld [vmem:[#allocation87_spill] sm:$0xff] }
 0xb4b   :  { %3340 = vmatpush2.bf16.msra.mxu0 %v7359_v38  ;;  %v7399_v38 = vld [vmem:[#allocation92_spill] sm:$0xff] }
 0xb4c   :  { %3341 = vmatprep.subr.bf16.mxu0 %v7360_v39  ;;  %v7400_v39 = vld [vmem:[#allocation93_spill] sm:$0xff] }
 0xb4f   :  { %3342 = vmatpush2.bf16.msra.mxu0 %v7361_v40 }
 0xb50   :  { %3343 = vmatprep.subr.bf16.mxu0 %v7362_v2 }
 0xb52   :  { %v3179_v13 = vpop.f32.mrf.mxu0  ;;  %v3220_v0 = vpop.f32.mrf.mxu1 }
 0xb53   :  { %v3180_v14 = vadd.f32 %v3179_v13, %v7363_v24  ;;  %3344 = vmatpush2.bf16.msra.mxu0 %v7364_v47  ;;  %v7401_v24 = vld [vmem:[#allocation160_spill] sm:$0xff] }
 0xb54   :  { %v3181_v41 = vpop.f32.mrf.mxu0  ;;  %v3222_v56 = vpop.f32.mrf.mxu1  ;;  %3345 = vmatprep.subr.bf16.mxu0 %v7365_v55 }
 0xb55   :  { %v3221_v21 = vadd.f32 %v3220_v0, %v3180_v14  ;;  %v3182_v60 = vadd.f32 %v3181_v41, %v7366_v57 }
 0xb56   :  { %v3183_v52 = vpop.f32.mrf.mxu0  ;;  %v3224_v48 = vpop.f32.mrf.mxu1 }
 0xb57   :  { %v3223_v58 = vadd.f32 %v3222_v56, %v3182_v60  ;;  %3346 = vmatpush2.bf16.msra.mxu0 %v7367_v26  ;;  %v3229_v53 = vmax.f32 %v3221_v21, 0.0 }
 0xb58   :  { %v3184_v12 = vpop.f32.mrf.mxu0  ;;  %v3225_v44 = vpop.f32.mrf.mxu1  ;;  %3347 = vmatprep.subr.bf16.mxu0 %v7368_v28 }
 0xb59   :  { %v3230_v29 = vmax.f32 %v3223_v58, 0.0  ;;  %v3233_v35 = vpack.c.bf16 %v3229_v53, %v3229_v53 }
 0xb5b   :  { %v3234_v33 = vpack.c.bf16 %v3230_v29, %v3230_v29  ;;  %3348 = vmatpush2.bf16.msra.mxu0 %v7369_v34  ;;  %v7402_v29 = vld [vmem:[#allocation162_spill] sm:$0xff] }
 0xb5d   :  { %3308 = vmatprep.mubr.bf16.mxu1 %v3234_v33 }
 0xb5e   :  { %3309 = vmatmul.mubr.bf16.vlgmr.msra.gmra.mxu1 %v3233_v35  ;;  %3350 = vmatmul.mubr.bf16.vlgmr.msra.gmra.mxu0 %v3231_v25  ;;  %v7379_v25 = vld [vmem:[#allocation72_spill] sm:$0xff] }
 0xb5f   :  { %3359 = vmatpush1.bf16.msra.mxu1 %v7370_v30  ;;  %3390 = vmatprep.mubr.bf16.mxu1 %v3234_v33 }
 0xb60   :  { %3360 = vmatprep.subr.bf16.mxu1 %v7371_v32 }
 0xb63   :  { %3361 = vmatpush1.bf16.msra.mxu1 %v7372_v6 }
 0xb64   :  { %3362 = vmatprep.subr.bf16.mxu1 %v7373_v49 }
 0xb67   :  { %3363 = vmatpush1.bf16.msra.mxu1 %v7374_v1 }
 0xb68   :  { %3364 = vmatprep.subr.bf16.mxu1 %v7375_v7 }
 0xb6b   :  { %3365 = vmatpush1.bf16.msra.mxu1 %v7376_v16 }
 0xb6c   :  { %3366 = vmatprep.subr.bf16.mxu1 %v7377_v5 }
 0xb6f   :  { %3367 = vmatpush1.bf16.msra.mxu1 %v7378_v4 }
 0xb70   :  { %3368 = vmatprep.subr.bf16.mxu1 %v7379_v25 }
 0xb73   :  { %3369 = vmatpush1.bf16.msra.mxu1 %v7380_v10  ;;  %v7403_v10 = vld [vmem:[#allocation165_spill] sm:$0xff] }
 0xb74   :  { %3370 = vmatprep.subr.bf16.mxu1 %v7381_v15  ;;  %v7404_v15 = vld [vmem:[#allocation166_spill] sm:$0xff] }
 0xb77   :  { %3371 = vmatpush1.bf16.msra.mxu1 %v7382_v51 }
 0xb78   :  { %3372 = vmatprep.subr.bf16.mxu1 %v7383_v61 }
 0xb7b   :  { %3373 = vmatpush1.bf16.msra.mxu1 %v7384_v59 }
 0xb7c   :  { %3374 = vmatprep.subr.bf16.mxu1 %v7385_v27 }
 0xb7f   :  { %3375 = vmatpush2.bf16.msra.mxu1 %v7386_v22  ;;  %v7406_v22 = vld [vmem:[#allocation91_spill] sm:$0xff] }
 0xb80   :  { %3376 = vmatprep.subr.bf16.mxu1 %v7387_v11 }
 0xb83   :  { %3377 = vmatpush2.bf16.msra.mxu1 %v7388_v31 }
 0xb84   :  { %3378 = vmatprep.subr.bf16.mxu1 %v7389_v62 }
 0xb87   :  { %3379 = vmatpush2.bf16.msra.mxu1 %v7390_v63 }
 0xb88   :  { %3380 = vmatprep.subr.bf16.mxu1 %v7391_v20  ;;  %v7408_v20 = vld [vmem:[#allocation168_spill] sm:$0xff] }
 0xb8b   :  { %3381 = vmatpush2.bf16.msra.mxu1 %v7392_v46 }
 0xb8c   :  { %3382 = vmatprep.subr.bf16.mxu1 %v7393_v42  ;;  %v7409_v42 = vld [vmem:[#allocation90_spill] sm:$0xff] }
 0xb8f   :  { %3383 = vmatpush2.bf16.msra.mxu1 %v7394_v3 }
 0xb90   :  { %3384 = vmatprep.subr.bf16.mxu1 %v7395_v43 }
 0xb93   :  { %3385 = vmatpush2.bf16.msra.mxu1 %v7396_v50 }
 0xb94   :  { %3386 = vmatprep.subr.bf16.mxu1 %v7397_v36  ;;  %v7410_v36 = vld [vmem:[#allocation96_spill] sm:$0xff] }
 0xb97   :  { %3387 = vmatpush2.bf16.msra.mxu1 %v7398_v37 }
 0xb98   :  { %3388 = vmatprep.subr.bf16.mxu1 %v7399_v38 }
 0xb9b   :  { %3389 = vmatpush2.bf16.msra.mxu1 %v7400_v39 }
 0xb9e   :  { %3391 = vmatmul.mubr.bf16.vlgmr.msra.gmra.mxu1 %v3233_v35 }
 0xbde   :  { %v3269_v40 = vpop.f32.mrf.mxu0 }
 0xbdf   :  { %v3270_v14 = vadd.f32 %v3269_v40, %v7401_v24 }
 0xbe0   :  { %v3271_v2 = vpop.f32.mrf.mxu0 }
 0xbe1   :  { %v3272_v56 = vadd.f32 %v3271_v2, %v7317_v9 }
 0xbe2   :  { %v3273_v13 = vpop.f32.mrf.mxu0 }
 0xbe4   :  { %v3274_v0 = vpop.f32.mrf.mxu0 }
 0xc1e   :  { %v3310_v47 = vpop.f32.mrf.mxu1  ;;  %v3351_v41 = vpop.f32.mrf.mxu0 }
 0xc1f   :  { %v3311_v55 = vadd.f32 %v3310_v47, %v3270_v14  ;;  %v3352_v30 = vadd.f32 %v3351_v41, %v7164_v54 }
 0xc20   :  { %v3312_v21 = vpop.f32.mrf.mxu1  ;;  %v3353_v57 = vpop.f32.mrf.mxu0 }
 0xc21   :  { %v3399_v60 = vmax.f32 %v3311_v55, 0.0  ;;  %v3313_v52 = vadd.f32 %v3312_v21, %v3272_v56  ;;  %v3354_v6 = vadd.f32 %v3353_v57, %v5325_v18  ;;  %v7405_v18 = vld [vmem:[#allocation23_spill] sm:$0xff] }
 0xc22   :  { %v3314_v48 = vpop.f32.mrf.mxu1  ;;  %v3355_v58 = vpop.f32.mrf.mxu0  ;;  %v3423_v11 = vadd.f32 %v7406_v22, %v7405_v18 }
 0xc23   :  { %v3400_v26 = vmax.f32 %v3313_v52, 0.0  ;;  %v3403_v44 = vmul.f32 %v3399_v60, %v5304_v8  ;;  %v3412_v28 = vmul.f32 %v3399_v60, %v5307_v19 }
 0xc24   :  { %v3315_v53 = vpop.f32.mrf.mxu1  ;;  %v3356_v12 = vpop.f32.mrf.mxu0  ;;  %v3424_v31 = vmul.f32 2.0, %v3423_v11 }
 0xc25   :  { %v3404_v33 = vmul.f32 %v3400_v26, %v7402_v29  ;;  %v3413_v34 = vmul.f32 %v3400_v26, %v7163_v45 }
 0xc26   :  { %v3425_v46 = vadd.f32 %v3424_v31, %v7408_v20 }
 0xc27   :  { %v3407_v35 = vadd.f32 %v3404_v33, %v3403_v44  ;;  %v3416_v9 = vadd.f32 %v3413_v34, %v3412_v28 }
 0xc5e   :  { %v3392_v32 = vpop.f32.mrf.mxu1 }
 0xc5f   :  { %v3393_v49 = vadd.f32 %v3392_v32, %v3352_v30 }
 0xc60   :  { %v3394_v1 = vpop.f32.mrf.mxu1 }
 0xc61   :  { %v3401_v7 = vmax.f32 %v3393_v49, 0.0  ;;  %v3395_v16 = vadd.f32 %v3394_v1, %v3354_v6 }
 0xc62   :  { %v3396_v5 = vpop.f32.mrf.mxu1 }
 0xc63   :  { %v3405_v8 = vmul.f32 %v3401_v7, %v5333_v23  ;;  %v3414_v19 = vmul.f32 %v3401_v7, %v5337_v17  ;;  %v3402_v4 = vmax.f32 %v3395_v16, 0.0 }
 0xc64   :  { %v3397_v25 = vpop.f32.mrf.mxu1 }
 0xc65   :  { %v3406_v45 = vmul.f32 %v3402_v4, %v7403_v10  ;;  %v3415_v51 = vmul.f32 %v3402_v4, %v7404_v15  ;;  %v3417_v61 = vadd.f32 %v3416_v9, %v3414_v19  ;;  %v3408_v54 = vadd.f32 %v3407_v35, %v3405_v8 }
 0xc67   :  { %v3418_v59 = vadd.f32 %v3417_v61, %v3415_v51  ;;  %v3409_v27 = vadd.f32 %v3408_v54, %v3406_v45 }
 0xc69   :  { %3419 = vadd.xlane.f32.xlu0 %v3418_v59  ;;  %3410 = vadd.xlane.f32.xlu1 %v3409_v27 }
 0xcf2   :  { %v3420_v62 = vpop.xlane.xlu0 %3419  ;;  %v3411_v23 = vpop.xlane.xlu1 %3410 }
 0xcf3   :  { %v3421_v17 = vsel %vm2228_vm0, %v3411_v23, %v3420_v62 }
 0xcf4   :  { %v3422_v3 = vadd.f32 %v7409_v42, %v3421_v17 }
 0xcf6   :  { %v3426_v43 = vadd.f32 %v3425_v46, %v3422_v3 }
 0xcf8   :  { %v3427_v50 = vmul.f32 0.16666667, %v3426_v43 }
 0xcfa   :  { %v3428_v37 = vadd.f32 %v7410_v36, %v3427_v50 }
 0xcfc   :  { %3430 = vst.msk [vmem:[%s6460_s9] sm:$0xff] %vm3429_vm1, %v3428_v37 }
 0xcfd   :  { %3435 = vsyncpa [#allocation3], 1 }
 0xcfe   :  { %3436 = vsyncpa [#allocation5], 1 }
 0xcff   :  { %3437 = vsyncpa [#allocation8], 1 }

</bundles_post_ra>
